<compile_context>
chip_gen: v7x
topology: tpu7x:2x2x1
jax: 0.10.0
libtpu: 0.0.40
codegen_flags: <defaults>
</compile_context>

<pallas_src>
import functools

import jax
import jax.numpy as jnp
from jax.experimental import pallas as pl
from jax.experimental.pallas import tpu as pltpu

DIMS = [(1668, 800), (800, 400), (400, 100), (100, 10), (10, 2)]
IN_F = DIMS[0][0]
OUT_F = DIMS[-1][1]


def _leaky_relu(v, negative_slope=0.01):
    # F.leaky_relu default negative_slope = 0.01
    return jnp.where(v >= 0, v, negative_slope * v)


def mlp6_kernel(x_ref,
                w1_ref, b1_ref,
                w2_ref, b2_ref,
                w3_ref, b3_ref,
                w4_ref, b4_ref,
                w5_ref, b5_ref,
                out_ref):
    # x streams in as f32; cast to bf16 in-register so both matmul operands are bf16-native
    # on the MXU.  All accumulation stays f32 via preferred_element_type.
    h = x_ref[...].astype(jnp.bfloat16)

    h = jnp.dot(h, w1_ref[...], preferred_element_type=jnp.float32) + b1_ref[...]
    h = _leaky_relu(h).astype(jnp.bfloat16)

    h = jnp.dot(h, w2_ref[...], preferred_element_type=jnp.float32) + b2_ref[...]
    h = _leaky_relu(h).astype(jnp.bfloat16)

    h = jnp.dot(h, w3_ref[...], preferred_element_type=jnp.float32) + b3_ref[...]
    h = _leaky_relu(h).astype(jnp.bfloat16)

    h = jnp.dot(h, w4_ref[...], preferred_element_type=jnp.float32) + b4_ref[...]
    h = _leaky_relu(h).astype(jnp.bfloat16)

    logits = jnp.dot(h, w5_ref[...], preferred_element_type=jnp.float32) + b5_ref[...]

    # softmax over dim=1 (feature axis); EUP approx reciprocal instead of a VALU divide.
    m = jnp.max(logits, axis=1, keepdims=True)
    e = jnp.exp(logits - m)
    inv = pl.reciprocal(jnp.sum(e, axis=1, keepdims=True), approx=True)
    out_ref[...] = (e * inv).astype(out_ref.dtype)


def _round_up(x, m):
    return (x + m - 1) // m * m


def _pick_tile(batch, tile_b):
    """Batch-tile rows: big tiles for low per-step overhead, but guarantee >= 2 grid steps
    for moderate batches so ("parallel",) can shard across both v7x TensorCores."""
    if batch <= 16:
        return _round_up(batch, 8)
    half = _round_up(pl.cdiv(batch, 2), 16)
    return max(16, min(tile_b, half))


def _const_spec(arr):
    # Full-array block whose block index never changes across the grid: Pallas keeps it
    # VMEM-resident instead of re-streaming it per batch tile.
    # (pipeline_mode=pl.Buffered(1) would shave the redundant second buffer (~3.4 MB) if
    #  VMEM ever gets tight; not needed at the current tile sizes.)
    return pl.BlockSpec(arr.shape, lambda i: (0,) * arr.ndim)


@functools.partial(jax.jit, static_argnames=("tile_b",))
def mlp6_forward(x, params, tile_b=1024):
    """x: (B, 1668) f32; params: dict with bf16 transposed weights (in, out) + f32 biases."""
    B = x.shape[0]
    tile = _pick_tile(B, tile_b)
    grid = (pl.cdiv(B, tile),)   # ragged tail handled by masked block reads/writes

    args = (
        x,
        params["w1"], params["b1"],
        params["w2"], params["b2"],
        params["w3"], params["b3"],
        params["w4"], params["b4"],
        params["w5"], params["b5"],
    )

    in_specs = [pl.BlockSpec((tile, IN_F), lambda i: (i, 0))]
    in_specs += [_const_spec(a) for a in args[1:]]
    out_specs = pl.BlockSpec((tile, OUT_F), lambda i: (i, 0))

    flops = 2 * B * sum(fi * fo for fi, fo in DIMS)
    bytes_accessed = (int(B * IN_F * x.dtype.itemsize)
                      + sum(int(a.size) * a.dtype.itemsize for a in args[1:])
                      + B * OUT_F * 4)
    cost = pl.CostEstimate(flops=flops,
                           transcendentals=B * OUT_F,
                           bytes_accessed=bytes_accessed)

    return pl.pallas_call(
        mlp6_kernel,
        out_shape=jax.ShapeDtypeStruct((B, OUT_F), jnp.float32),
        grid_spec=pltpu.PrefetchScalarGridSpec(
            num_scalar_prefetch=0,
            grid=grid,
            in_specs=in_specs,
            out_specs=out_specs,
        ),
        compiler_params=pltpu.CompilerParams(
            dimension_semantics=("parallel",),
            vmem_limit_bytes=48 * 1024 * 1024,
        ),
        cost_estimate=cost,
    )(*args)


def init_params(key):
    """Deterministic init matching PyTorch Linear shapes; weights stored transposed
    (in, out) in bf16 so the kernel runs x @ W + b on the bf16-native MXU."""
    params = {}
    for i, (fan_in, fan_out) in enumerate(DIMS, start=1):
        key, kw, kb = jax.random.split(key, 3)
        bound = 1.0 / jnp.sqrt(fan_in)  # PyTorch default uniform(-1/sqrt(in), 1/sqrt(in))
        w = jax.random.uniform(kw, (fan_in, fan_out), jnp.float32,
                               minval=-bound, maxval=bound)
        b = jax.random.uniform(kb, (1, fan_out), jnp.float32,
                               minval=-bound, maxval=bound)
        params[f"w{i}"] = w.astype(jnp.bfloat16)
        params[f"b{i}"] = b
    return params


def reference_forward(x, params):
    """Pure-JAX reference with identical bf16/f32 mixed precision."""
    h = x.astype(jnp.bfloat16)
    for i in range(1, 5):
        z = jnp.dot(h, params[f"w{i}"], preferred_element_type=jnp.float32) + params[f"b{i}"]
        h = _leaky_relu(z).astype(jnp.bfloat16)
    logits = jnp.dot(h, params["w5"], preferred_element_type=jnp.float32) + params["b5"]
    return jax.nn.softmax(logits, axis=1)


if __name__ == "__main__":
    key = jax.random.PRNGKey(0)
    key, kx = jax.random.split(key)

    params = init_params(key)

    # Small-batch check: single grid step, x streamed as f32 and cast in-kernel.
    B = 8
    x = jax.random.normal(kx, (B, IN_F), dtype=jnp.float32)
    out = jax.block_until_ready(mlp6_forward(x, params))
    ref = reference_forward(x, params)
    assert out.shape == (B, OUT_F)
    assert jnp.allclose(out, ref, rtol=1e-2, atol=1e-2), "mismatch vs JAX reference (B=8)"
    assert jnp.allclose(jnp.sum(out, axis=1), 1.0, atol=2e-2), "softmax rows must sum to 1"

    # Multi-step grid with a ragged tail block (48 rows -> two 32-row tiles, second partial):
    # exercises the cdiv grid + masked writeback path while weights stay VMEM-resident.
    key, kx2 = jax.random.split(key)
    B2 = 48
    x2 = jax.random.normal(kx2, (B2, IN_F), dtype=jnp.float32)
    out2 = jax.block_until_ready(mlp6_forward(x2, params))
    ref2 = reference_forward(x2, params)
    assert out2.shape == (B2, OUT_F)
    assert jnp.allclose(out2, ref2, rtol=1e-2, atol=1e-2), "mismatch vs JAX reference (B=48)"
    assert jnp.allclose(jnp.sum(out2, axis=1), 1.0, atol=2e-2), "softmax rows must sum to 1"

    print("KERNEL_OK")
</pallas_src>

<mosaic_0001>
module attributes {stable_mosaic.version = 11 : i64} {
  func.func @mlp6_kernel(%arg0: i32, %arg1: memref<8x1668xf32, #tpu.memory_space<vmem>>, %arg2: memref<1668x800xbf16, #tpu.memory_space<vmem>>, %arg3: memref<1x800xf32, #tpu.memory_space<vmem>>, %arg4: memref<800x400xbf16, #tpu.memory_space<vmem>>, %arg5: memref<1x400xf32, #tpu.memory_space<vmem>>, %arg6: memref<400x100xbf16, #tpu.memory_space<vmem>>, %arg7: memref<1x100xf32, #tpu.memory_space<vmem>>, %arg8: memref<100x10xbf16, #tpu.memory_space<vmem>>, %arg9: memref<1x10xf32, #tpu.memory_space<vmem>>, %arg10: memref<10x2xbf16, #tpu.memory_space<vmem>>, %arg11: memref<1x2xf32, #tpu.memory_space<vmem>>, %arg12: memref<8x2xf32, #tpu.memory_space<vmem>>) attributes {dimension_semantics = [#tpu.dimension_semantics<parallel>], iteration_bounds = array<i64: 1>, scalar_prefetch = 0 : i64, scratch_operands = 0 : i64, tpu.core_type = #tpu.core_type<tc>, window_params = [{transform_indices = @transform_0, window_bounds = array<i64: 8, 1668>}, {pipeline_mode = #tpu.pipeline_mode<synchronous>, transform_indices = @transform_1, window_bounds = array<i64: 1668, 800>}, {pipeline_mode = #tpu.pipeline_mode<synchronous>, transform_indices = @transform_2, window_bounds = array<i64: 1, 800>}, {pipeline_mode = #tpu.pipeline_mode<synchronous>, transform_indices = @transform_3, window_bounds = array<i64: 800, 400>}, {pipeline_mode = #tpu.pipeline_mode<synchronous>, transform_indices = @transform_4, window_bounds = array<i64: 1, 400>}, {pipeline_mode = #tpu.pipeline_mode<synchronous>, transform_indices = @transform_5, window_bounds = array<i64: 400, 100>}, {pipeline_mode = #tpu.pipeline_mode<synchronous>, transform_indices = @transform_6, window_bounds = array<i64: 1, 100>}, {pipeline_mode = #tpu.pipeline_mode<synchronous>, transform_indices = @transform_7, window_bounds = array<i64: 100, 10>}, {pipeline_mode = #tpu.pipeline_mode<synchronous>, transform_indices = @transform_8, window_bounds = array<i64: 1, 10>}, {pipeline_mode = #tpu.pipeline_mode<synchronous>, transform_indices = @transform_9, window_bounds = array<i64: 10, 2>}, {pipeline_mode = #tpu.pipeline_mode<synchronous>, transform_indices = @transform_10, window_bounds = array<i64: 1, 2>}, {transform_indices = @transform_11, window_bounds = array<i64: 8, 2>}]} {
    %c0 = arith.constant 0 : index
    %c0_0 = arith.constant 0 : index
    %0 = vector.load %arg1[%c0, %c0_0] : memref<8x1668xf32, #tpu.memory_space<vmem>>, vector<8x1668xf32>
    %1 = arith.truncf %0 : vector<8x1668xf32> to vector<8x1668xbf16>
    %c0_1 = arith.constant 0 : index
    %c0_2 = arith.constant 0 : index
    %2 = vector.load %arg2[%c0_1, %c0_2] : memref<1668x800xbf16, #tpu.memory_space<vmem>>, vector<1668x800xbf16>
    %cst = arith.constant dense<0.000000e+00> : vector<8x800xf32>
    %3 = tpu.matmul %1, %2, %cst {dimension_numbers = #tpu.dot_dimension_numbers<[1], [0], [0], [1], [0, 0, 1, 1], [], []>} : vector<8x1668xbf16>, vector<1668x800xbf16>, vector<8x800xf32> -> vector<8x800xf32>
    %c0_3 = arith.constant 0 : index
    %c0_4 = arith.constant 0 : index
    %4 = vector.load %arg3[%c0_3, %c0_4] : memref<1x800xf32, #tpu.memory_space<vmem>>, vector<1x800xf32>
    %5 = vector.broadcast %4 : vector<1x800xf32> to vector<8x800xf32>
    %6 = arith.addf %3, %5 : vector<8x800xf32>
    %cst_5 = arith.constant 0.000000e+00 : f32
    %7 = vector.broadcast %cst_5 : f32 to vector<8x800xf32>
    %8 = arith.cmpf oge, %6, %7 : vector<8x800xf32>
    %cst_6 = arith.constant 0.00999999977 : f32
    %9 = vector.broadcast %cst_6 : f32 to vector<8x800xf32>
    %10 = arith.mulf %9, %6 : vector<8x800xf32>
    %11 = arith.select %8, %6, %10 : vector<8x800xi1>, vector<8x800xf32>
    %12 = arith.truncf %11 : vector<8x800xf32> to vector<8x800xbf16>
    %c0_7 = arith.constant 0 : index
    %c0_8 = arith.constant 0 : index
    %13 = vector.load %arg4[%c0_7, %c0_8] : memref<800x400xbf16, #tpu.memory_space<vmem>>, vector<800x400xbf16>
    %cst_9 = arith.constant dense<0.000000e+00> : vector<8x400xf32>
    %14 = tpu.matmul %12, %13, %cst_9 {dimension_numbers = #tpu.dot_dimension_numbers<[1], [0], [0], [1], [0, 0, 1, 1], [], []>} : vector<8x800xbf16>, vector<800x400xbf16>, vector<8x400xf32> -> vector<8x400xf32>
    %c0_10 = arith.constant 0 : index
    %c0_11 = arith.constant 0 : index
    %15 = vector.load %arg5[%c0_10, %c0_11] : memref<1x400xf32, #tpu.memory_space<vmem>>, vector<1x400xf32>
    %16 = vector.broadcast %15 : vector<1x400xf32> to vector<8x400xf32>
    %17 = arith.addf %14, %16 : vector<8x400xf32>
    %cst_12 = arith.constant 0.000000e+00 : f32
    %18 = vector.broadcast %cst_12 : f32 to vector<8x400xf32>
    %19 = arith.cmpf oge, %17, %18 : vector<8x400xf32>
    %cst_13 = arith.constant 0.00999999977 : f32
    %20 = vector.broadcast %cst_13 : f32 to vector<8x400xf32>
    %21 = arith.mulf %20, %17 : vector<8x400xf32>
    %22 = arith.select %19, %17, %21 : vector<8x400xi1>, vector<8x400xf32>
    %23 = arith.truncf %22 : vector<8x400xf32> to vector<8x400xbf16>
    %c0_14 = arith.constant 0 : index
    %c0_15 = arith.constant 0 : index
    %24 = vector.load %arg6[%c0_14, %c0_15] : memref<400x100xbf16, #tpu.memory_space<vmem>>, vector<400x100xbf16>
    %cst_16 = arith.constant dense<0.000000e+00> : vector<8x100xf32>
    %25 = tpu.matmul %23, %24, %cst_16 {dimension_numbers = #tpu.dot_dimension_numbers<[1], [0], [0], [1], [0, 0, 1, 1], [], []>} : vector<8x400xbf16>, vector<400x100xbf16>, vector<8x100xf32> -> vector<8x100xf32>
    %c0_17 = arith.constant 0 : index
    %c0_18 = arith.constant 0 : index
    %26 = vector.load %arg7[%c0_17, %c0_18] : memref<1x100xf32, #tpu.memory_space<vmem>>, vector<1x100xf32>
    %27 = vector.broadcast %26 : vector<1x100xf32> to vector<8x100xf32>
    %28 = arith.addf %25, %27 : vector<8x100xf32>
    %cst_19 = arith.constant 0.000000e+00 : f32
    %29 = vector.broadcast %cst_19 : f32 to vector<8x100xf32>
    %30 = arith.cmpf oge, %28, %29 : vector<8x100xf32>
    %cst_20 = arith.constant 0.00999999977 : f32
    %31 = vector.broadcast %cst_20 : f32 to vector<8x100xf32>
    %32 = arith.mulf %31, %28 : vector<8x100xf32>
    %33 = arith.select %30, %28, %32 : vector<8x100xi1>, vector<8x100xf32>
    %34 = arith.truncf %33 : vector<8x100xf32> to vector<8x100xbf16>
    %c0_21 = arith.constant 0 : index
    %c0_22 = arith.constant 0 : index
    %35 = vector.load %arg8[%c0_21, %c0_22] : memref<100x10xbf16, #tpu.memory_space<vmem>>, vector<100x10xbf16>
    %cst_23 = arith.constant dense<0.000000e+00> : vector<8x10xf32>
    %36 = tpu.matmul %34, %35, %cst_23 {dimension_numbers = #tpu.dot_dimension_numbers<[1], [0], [0], [1], [0, 0, 1, 1], [], []>} : vector<8x100xbf16>, vector<100x10xbf16>, vector<8x10xf32> -> vector<8x10xf32>
    %c0_24 = arith.constant 0 : index
    %c0_25 = arith.constant 0 : index
    %37 = vector.load %arg9[%c0_24, %c0_25] : memref<1x10xf32, #tpu.memory_space<vmem>>, vector<1x10xf32>
    %38 = vector.broadcast %37 : vector<1x10xf32> to vector<8x10xf32>
    %39 = arith.addf %36, %38 : vector<8x10xf32>
    %cst_26 = arith.constant 0.000000e+00 : f32
    %40 = vector.broadcast %cst_26 : f32 to vector<8x10xf32>
    %41 = arith.cmpf oge, %39, %40 : vector<8x10xf32>
    %cst_27 = arith.constant 0.00999999977 : f32
    %42 = vector.broadcast %cst_27 : f32 to vector<8x10xf32>
    %43 = arith.mulf %42, %39 : vector<8x10xf32>
    %44 = arith.select %41, %39, %43 : vector<8x10xi1>, vector<8x10xf32>
    %45 = arith.truncf %44 : vector<8x10xf32> to vector<8x10xbf16>
    %c0_28 = arith.constant 0 : index
    %c0_29 = arith.constant 0 : index
    %46 = vector.load %arg10[%c0_28, %c0_29] : memref<10x2xbf16, #tpu.memory_space<vmem>>, vector<10x2xbf16>
    %cst_30 = arith.constant dense<0.000000e+00> : vector<8x2xf32>
    %47 = tpu.matmul %45, %46, %cst_30 {dimension_numbers = #tpu.dot_dimension_numbers<[1], [0], [0], [1], [0, 0, 1, 1], [], []>} : vector<8x10xbf16>, vector<10x2xbf16>, vector<8x2xf32> -> vector<8x2xf32>
    %c0_31 = arith.constant 0 : index
    %c0_32 = arith.constant 0 : index
    %48 = vector.load %arg11[%c0_31, %c0_32] : memref<1x2xf32, #tpu.memory_space<vmem>>, vector<1x2xf32>
    %49 = vector.broadcast %48 : vector<1x2xf32> to vector<8x2xf32>
    %50 = arith.addf %47, %49 : vector<8x2xf32>
    %cst_33 = arith.constant dense<0xFF800000> : vector<8xf32>
    %51 = vector.multi_reduction <maximumf>, %50, %cst_33 [1] : vector<8x2xf32> to vector<8xf32>
    %52 = vector.shape_cast %51 : vector<8xf32> to vector<8x1xf32>
    %53 = vector.broadcast %52 : vector<8x1xf32> to vector<8x2xf32>
    %54 = arith.subf %50, %53 : vector<8x2xf32>
    %55 = math.exp %54 : vector<8x2xf32>
    %cst_34 = arith.constant dense<0.000000e+00> : vector<8xf32>
    %56 = vector.multi_reduction <add>, %55, %cst_34 [1] : vector<8x2xf32> to vector<8xf32>
    %57 = vector.shape_cast %56 : vector<8xf32> to vector<8x1xf32>
    %58 = tpu.reciprocal %57 {approx = true} : vector<8x1xf32> -> vector<8x1xf32>
    %59 = vector.broadcast %58 : vector<8x1xf32> to vector<8x2xf32>
    %60 = arith.mulf %55, %59 : vector<8x2xf32>
    %c0_35 = arith.constant 0 : index
    %c0_36 = arith.constant 0 : index
    %61 = vector.load %arg12[%c0_35, %c0_36] : memref<8x2xf32, #tpu.memory_space<vmem>>, vector<8x2xf32>
    tpu.vector_store %arg12[%c0_35, %c0_36], %60 {strides = array<i32>} : memref<8x2xf32, #tpu.memory_space<vmem>>, vector<8x2xf32>,
    return
  }
  func.func @transform_0(%arg0: i32) -> (i32, i32) {
    %c0_i32 = arith.constant 0 : i32
    %c0_i32_0 = arith.constant 0 : i32
    return %arg0, %c0_i32 : i32, i32
  }
  func.func @transform_1(%arg0: i32) -> (i32, i32) {
    %c0_i32 = arith.constant 0 : i32
    %c0_i32_0 = arith.constant 0 : i32
    %c0_i32_1 = arith.constant 0 : i32
    return %c0_i32, %c0_i32_0 : i32, i32
  }
  func.func @transform_2(%arg0: i32) -> (i32, i32) {
    %c0_i32 = arith.constant 0 : i32
    %c0_i32_0 = arith.constant 0 : i32
    %c0_i32_1 = arith.constant 0 : i32
    return %c0_i32, %c0_i32_0 : i32, i32
  }
  func.func @transform_3(%arg0: i32) -> (i32, i32) {
    %c0_i32 = arith.constant 0 : i32
    %c0_i32_0 = arith.constant 0 : i32
    %c0_i32_1 = arith.constant 0 : i32
    return %c0_i32, %c0_i32_0 : i32, i32
  }
  func.func @transform_4(%arg0: i32) -> (i32, i32) {
    %c0_i32 = arith.constant 0 : i32
    %c0_i32_0 = arith.constant 0 : i32
    %c0_i32_1 = arith.constant 0 : i32
    return %c0_i32, %c0_i32_0 : i32, i32
  }
  func.func @transform_5(%arg0: i32) -> (i32, i32) {
    %c0_i32 = arith.constant 0 : i32
    %c0_i32_0 = arith.constant 0 : i32
    %c0_i32_1 = arith.constant 0 : i32
    return %c0_i32, %c0_i32_0 : i32, i32
  }
  func.func @transform_6(%arg0: i32) -> (i32, i32) {
    %c0_i32 = arith.constant 0 : i32
    %c0_i32_0 = arith.constant 0 : i32
    %c0_i32_1 = arith.constant 0 : i32
    return %c0_i32, %c0_i32_0 : i32, i32
  }
  func.func @transform_7(%arg0: i32) -> (i32, i32) {
    %c0_i32 = arith.constant 0 : i32
    %c0_i32_0 = arith.constant 0 : i32
    %c0_i32_1 = arith.constant 0 : i32
    return %c0_i32, %c0_i32_0 : i32, i32
  }
  func.func @transform_8(%arg0: i32) -> (i32, i32) {
    %c0_i32 = arith.constant 0 : i32
    %c0_i32_0 = arith.constant 0 : i32
    %c0_i32_1 = arith.constant 0 : i32
    return %c0_i32, %c0_i32_0 : i32, i32
  }
  func.func @transform_9(%arg0: i32) -> (i32, i32) {
    %c0_i32 = arith.constant 0 : i32
    %c0_i32_0 = arith.constant 0 : i32
    %c0_i32_1 = arith.constant 0 : i32
    return %c0_i32, %c0_i32_0 : i32, i32
  }
  func.func @transform_10(%arg0: i32) -> (i32, i32) {
    %c0_i32 = arith.constant 0 : i32
    %c0_i32_0 = arith.constant 0 : i32
    %c0_i32_1 = arith.constant 0 : i32
    return %c0_i32, %c0_i32_0 : i32, i32
  }
  func.func @transform_11(%arg0: i32) -> (i32, i32) {
    %c0_i32 = arith.constant 0 : i32
    %c0_i32_0 = arith.constant 0 : i32
    return %arg0, %c0_i32 : i32, i32
  }
}

</mosaic_0001>

<bundles_post_ra>
// kernel: mlp6_forward.1
= control target key start
LH: loop header
LB: loop body
LE: loop exit
PB: predicated region body
PF: predicated region fallthrough
CT: control target
= control target key end

     0   :  { %vm4702_vm0 = vcmask 31744   ;;  %vm4706_vm1 = vcmask 1041408   ;;  %vm7119_vm9 = vcmask 261120   ;;  %vm7674_vm13 = vcmask 130048   ;;  %s13848_s1 = inlined_call_operand.vmem [shape: bf16[1668,800], index: 1, kind: input, shape index: {}]   ;;  %s13849_s0 = inlined_call_operand.vmem [shape: f32[8,1668], index: 0, kind: input, shape index: {}]   ;;  %s13850_s3 = inlined_call_operand.vmem [shape: bf16[800,400], index: 3, kind: input, shape index: {}]   ;;  %s13851_s2 = inlined_call_operand.vmem [shape: f32[1,800], index: 2, kind: input, shape index: {}]   ;;  %s13852_s5 = inlined_call_operand.vmem [shape: bf16[400,100], index: 5, kind: input, shape index: {}]   ;;  %s13853_s4 = inlined_call_operand.vmem [shape: f32[1,400], index: 4, kind: input, shape index: {}]   ;;  %s13854_s7 = inlined_call_operand.vmem [shape: bf16[100,10], index: 7, kind: input, shape index: {}]   ;;  %s13855_s6 = inlined_call_operand.vmem [shape: f32[1,100], index: 6, kind: input, shape index: {}]   ;;  %s13856_s9 = inlined_call_operand.vmem [shape: bf16[10,2], index: 9, kind: input, shape index: {}]   ;;  %s13857_s8 = inlined_call_operand.vmem [shape: f32[1,10], index: 8, kind: input, shape index: {}]   ;;  %s13858_s10 = inlined_call_operand.vmem [shape: f32[1,2], index: 10, kind: input, shape index: {}]   ;;  %s13859_s11 = inlined_call_operand.vmem [shape: f32[8,2], index: 11, kind: output, shape index: {}]  }
   0x1   :  { %v9227_v0 = vld [vmem:[%s13848_s1 + $0x4] ss:$28 sps:$4 sm:$0xff]   ;;  %v9233_v4 = vld [vmem:[%s13848_s1 + $0x3c] ss:$28 sps:$4 sm:$0xff]   ;;  %v9239_v8 = vld [vmem:[%s13848_s1 + $0x74] ss:$28 sps:$4 sm:$0xff]  }
   0x2   :  { %v9229_v1 = vld [vmem:[%s13848_s1 + $0x1504] ss:$28 sps:$4 sm:$0xff]   ;;  %4728 = vmatprep.subr.bf16.mxu0 %v9227_v0  ;;  %v9235_v5 = vld [vmem:[%s13848_s1 + $0x153c] ss:$28 sps:$4 sm:$0xff]   ;;  %v9241_v9 = vld [vmem:[%s13848_s1 + $0x1574] ss:$28 sps:$4 sm:$0xff]  }
   0x3   :  { %v9231_v2 = vld [vmem:[%s13848_s1] ss:$28 sps:$4 sm:$0xff]   ;;  %4974 = vmatprep.subr.bf16.mxu1 %v9229_v1  ;;  %v9237_v6 = vld [vmem:[%s13848_s1 + $0x38] ss:$28 sps:$4 sm:$0xff]   ;;  %v9243_v10 = vld [vmem:[%s13848_s1 + $0x70] ss:$28 sps:$4 sm:$0xff]  }
   0x4   :  { %v9232_v3 = vld [vmem:[%s13848_s1 + $0x1500] ss:$28 sps:$4 sm:$0xff]   ;;  %4729 = vmatpush1.bf16.msra.mxu0 %v9231_v2  ;;  %v9238_v7 = vld [vmem:[%s13848_s1 + $0x1538] ss:$28 sps:$4 sm:$0xff]   ;;  %v9244_v11 = vld [vmem:[%s13848_s1 + $0x1570] ss:$28 sps:$4 sm:$0xff]  }
   0x5   :  { %4975 = vmatpush1.bf16.msra.mxu1 %v9232_v3  ;;  %4730 = vmatprep.subr.bf16.mxu0 %v9233_v4  ;;  %v9245_v12 = vld [vmem:[%s13848_s1 + $0xac] ss:$28 sps:$4 sm:$0xff]   ;;  %v9251_v16 = vld [vmem:[%s13848_s1 + $0xe4] ss:$28 sps:$4 sm:$0xff]   ;;  %v9257_v20 = vld [vmem:[%s13848_s1 + $0x11c] ss:$28 sps:$4 sm:$0xff]  }
   0x6   :  { %4976 = vmatprep.subr.bf16.mxu1 %v9235_v5  ;;  %v9247_v13 = vld [vmem:[%s13848_s1 + $0x15ac] ss:$28 sps:$4 sm:$0xff]   ;;  %v9253_v17 = vld [vmem:[%s13848_s1 + $0x15e4] ss:$28 sps:$4 sm:$0xff]   ;;  %v9259_v21 = vld [vmem:[%s13848_s1 + $0x161c] ss:$28 sps:$4 sm:$0xff]  }
   0x7   :  { %v9249_v14 = vld [vmem:[%s13848_s1 + $0xa8] ss:$28 sps:$4 sm:$0xff]   ;;  %v9255_v18 = vld [vmem:[%s13848_s1 + $0xe0] ss:$28 sps:$4 sm:$0xff]   ;;  %v9261_v22 = vld [vmem:[%s13848_s1 + $0x118] ss:$28 sps:$4 sm:$0xff]  }
   0x8   :  { %4731 = vmatpush1.bf16.msra.mxu0 %v9237_v6  ;;  %v9250_v15 = vld [vmem:[%s13848_s1 + $0x15a8] ss:$28 sps:$4 sm:$0xff]   ;;  %v9256_v19 = vld [vmem:[%s13848_s1 + $0x15e0] ss:$28 sps:$4 sm:$0xff]   ;;  %v9262_v23 = vld [vmem:[%s13848_s1 + $0x1618] ss:$28 sps:$4 sm:$0xff]  }
   0x9   :  { %4977 = vmatpush1.bf16.msra.mxu1 %v9238_v7  ;;  %4732 = vmatprep.subr.bf16.mxu0 %v9239_v8  ;;  %v9263_v24 = vld [vmem:[%s13848_s1 + $0x154] ss:$28 sps:$4 sm:$0xff]   ;;  %v52_v28 = vld [vmem:[%s13849_s0 + $0x68] sm:$0xff]  ;;  %v899_v32 = vld [vmem:[%s13848_s1 + $0x16c0] sm:$0x33]  ;;  %vm10614_vm15 = vmmov 0  }
   0xa   :  { %4978 = vmatprep.subr.bf16.mxu1 %v9241_v9  ;;  %v9265_v25 = vld [vmem:[%s13848_s1 + $0x1654] ss:$28 sps:$4 sm:$0xff]   ;;  %v9269_v29 = vld [vmem:[%s13848_s1 + $0x18c] ss:$28 sps:$4 sm:$0xff]   ;;  %v10768_v31 = vpack.c.bf16 %v52_v28, %v52_v28  ;;  %v9275_v35 = vld [vmem:[%s13848_s1 + $0x1c4] ss:$28 sps:$4 sm:$0xff]   ;;  %v8680_v36 = vcombine.high %v899_v32, %v899_v32  ;;  %v8679_v37 = vcombine.low %v899_v32, %v899_v32 }
   0xb   :  { %v9267_v26 = vld [vmem:[%s13848_s1 + $0x150] ss:$28 sps:$4 sm:$0xff]   ;;  %v9273_v33 = vld [vmem:[%s13848_s1 + $0x188] ss:$28 sps:$4 sm:$0xff]   ;;  %v9278_v38 = vld [vmem:[%s13848_s1 + $0x1c0] ss:$28 sps:$4 sm:$0xff]  }
   0xc   :  { %4733 = vmatpush1.bf16.msra.mxu0 %v9243_v10  ;;  %v9268_v27 = vld [vmem:[%s13848_s1 + $0x1650] ss:$28 sps:$4 sm:$0xff]   ;;  %8687 = vmatprep.mubr.msk.bf16.mxu1 %vm4702_vm0, %v10768_v31  ;;  %v9274_v34 = vld [vmem:[%s13848_s1 + $0x1688] ss:$28 sps:$4 sm:$0xff]   ;;  %v4708_v40 = vsel %vm4706_vm1, %v8679_v37, 0  ;;  %v42_v37 = vld [vmem:[%s13849_s0 + $0x18] sm:$0xff] }
   0xd   :  { %4979 = vmatpush1.bf16.msra.mxu1 %v9244_v11  ;;  %4734 = vmatprep.subr.bf16.mxu0 %v9245_v12  ;;  %v9271_v30 = vld [vmem:[%s13848_s1 + $0x168c] ss:$28 sps:$4 sm:$0xff]   ;;  %v51_v39 = vld [vmem:[%s13849_s0 + $0x60] sm:$0xff]  ;;  %v9280_v41 = vld [vmem:[%s13848_s1 + $0x1fc] ss:$28 sps:$4 sm:$0xff]  }
   0xe   :  { %4980 = vmatprep.subr.bf16.mxu1 %v9247_v13  ;;  %v9284_v42 = vld [vmem:[%s13848_s1 + $0xc] ss:$28 sps:$4 sm:$0xff]   ;;  %v10798_v43 = vpack.c.bf16 %v51_v39, %v51_v39  ;;  %v9285_v45 = vld [vmem:[%s13848_s1 + $0x1f8] ss:$28 sps:$4 sm:$0xff]   ;;  %v9290_v47 = vld [vmem:[%s13848_s1 + $0x44] ss:$28 sps:$4 sm:$0xff]  }
   0xf   :  { %v9282_v44 = vld [vmem:[%s13848_s1 + $0x8] ss:$28 sps:$4 sm:$0xff]   ;;  %v9286_v46 = vld [vmem:[%s13848_s1 + $0x234] ss:$28 sps:$4 sm:$0xff]   ;;  %v9288_v48 = vld [vmem:[%s13848_s1 + $0x40] ss:$28 sps:$4 sm:$0xff]  }
  0x10   :  { %4735 = vmatpush1.bf16.msra.mxu0 %v9249_v14  ;;  %v9291_v49 = vld [vmem:[%s13848_s1 + $0x230] ss:$28 sps:$4 sm:$0xff]   ;;  %v9296_v51 = vld [vmem:[%s13848_s1 + $0x7c] ss:$28 sps:$4 sm:$0xff]   ;;  %v9297_v55 = vld [vmem:[%s13848_s1 + $0x268] ss:$28 sps:$4 sm:$0xff]  }
  0x11   :  { %4981 = vmatpush1.bf16.msra.mxu1 %v9250_v15  ;;  %4736 = vmatprep.subr.bf16.mxu0 %v9251_v16  ;;  %v9292_v50 = vld [vmem:[%s13848_s1 + $0x26c] ss:$28 sps:$4 sm:$0xff]   ;;  %v9294_v53 = vld [vmem:[%s13848_s1 + $0x78] ss:$28 sps:$4 sm:$0xff]   ;;  %v9298_v56 = vld [vmem:[%s13848_s1 + $0x2a4] ss:$28 sps:$4 sm:$0xff]  }
  0x12   :  { %4982 = vmatprep.subr.bf16.mxu1 %v9253_v17  ;;  %v40_v52 = vld [vmem:[%s13849_s0 + $0x8] sm:$0xff]  ;;  %v9302_v57 = vld [vmem:[%s13848_s1 + $0xb4] ss:$28 sps:$4 sm:$0xff]   ;;  %v9303_v59 = vld [vmem:[%s13848_s1 + $0x2a0] ss:$28 sps:$4 sm:$0xff]  }
  0x13   :  { %v10831_v54 = vpack.c.bf16 %v40_v52, %v40_v52  ;;  %v9300_v58 = vld [vmem:[%s13848_s1 + $0xb0] ss:$28 sps:$4 sm:$0xff]   ;;  %v9304_v60 = vld [vmem:[%s13848_s1 + $0x2dc] ss:$28 sps:$4 sm:$0xff]   ;;  %v9306_v62 = vld [vmem:[%s13848_s1 + $0xe8] ss:$28 sps:$4 sm:$0xff]  }
  0x14   :  { %4737 = vmatpush1.bf16.msra.mxu0 %v9255_v18  ;;  %v9308_v61 = vld [vmem:[%s13848_s1 + $0xec] ss:$28 sps:$4 sm:$0xff]   ;;  %v9309_v63 = vld [vmem:[%s13848_s1 + $0x2d8] ss:$28 sps:$4 sm:$0xff]   ;;  %v9314_v1 = vld [vmem:[%s13848_s1 + $0x124] ss:$28 sps:$4 sm:$0xff]  }
  0x15   :  { %4983 = vmatpush1.bf16.msra.mxu1 %v9256_v19  ;;  %4738 = vmatprep.subr.bf16.mxu0 %v9257_v20  ;;  %v9310_v0 = vld [vmem:[%s13848_s1 + $0x314] ss:$28 sps:$4 sm:$0xff]   ;;  %v9312_v2 = vld [vmem:[%s13848_s1 + $0x120] ss:$28 sps:$4 sm:$0xff]   ;;  %v9316_v4 = vld [vmem:[%s13848_s1 + $0x34c] ss:$28 sps:$4 sm:$0xff]  }
  0x16   :  { %4984 = vmatprep.subr.bf16.mxu1 %v9259_v21  ;;  %4760 = vmatprep.mubr.bf16.mxu0 %v10831_v54  ;;  %v9315_v3 = vld [vmem:[%s13848_s1 + $0x310] ss:$28 sps:$4 sm:$0xff]   ;;  %v9320_v5 = vld [vmem:[%s13848_s1 + $0x15c] ss:$28 sps:$4 sm:$0xff]   ;;  %v9321_v7 = vld [vmem:[%s13848_s1 + $0x348] ss:$28 sps:$4 sm:$0xff]  }
  0x17   :  { %v9318_v6 = vld [vmem:[%s13848_s1 + $0x158] ss:$28 sps:$4 sm:$0xff]   ;;  %v39_v8 = vld [vmem:[%s13849_s0] sm:$0xff]  ;;  %v9325_v13 = vld [vmem:[%s13848_s1 + $0x190] ss:$28 sps:$4 sm:$0xff]  }
  0x18   :  { %4739 = vmatpush1.bf16.msra.mxu0 %v9261_v22  ;;  %v9324_v9 = vld [vmem:[%s13848_s1 + $0x384] ss:$28 sps:$4 sm:$0xff]   ;;  %v9327_v10 = vld [vmem:[%s13848_s1 + $0x194] ss:$28 sps:$4 sm:$0xff]   ;;  %v10898_v12 = vpack.c.bf16 %v39_v8, %v39_v8  ;;  %v9330_v14 = vld [vmem:[%s13848_s1 + $0x3bc] ss:$28 sps:$4 sm:$0xff]  }
  0x19   :  { %4985 = vmatpush1.bf16.msra.mxu1 %v9262_v23  ;;  %4740 = vmatprep.subr.bf16.mxu0 %v9263_v24  ;;  %v9322_v11 = vld [vmem:[%s13848_s1 + $0x380] ss:$28 sps:$4 sm:$0xff]   ;;  %v9333_v15 = vld [vmem:[%s13848_s1 + $0x1cc] ss:$28 sps:$4 sm:$0xff]   ;;  %v9328_v16 = vld [vmem:[%s13848_s1 + $0x3b8] ss:$28 sps:$4 sm:$0xff]  }
  0x1a   :  { %4986 = vmatprep.subr.bf16.mxu1 %v9265_v25  ;;  %v9331_v17 = vld [vmem:[%s13848_s1 + $0x1c8] ss:$28 sps:$4 sm:$0xff]   ;;  %v9336_v18 = vld [vmem:[%s13848_s1 + $0x3f4] ss:$28 sps:$4 sm:$0xff]   ;;  %v9337_v21 = vld [vmem:[%s13848_s1 + $0x200] ss:$28 sps:$4 sm:$0xff]  }
  0x1b   :  { %v9339_v19 = vld [vmem:[%s13848_s1 + $0x204] ss:$28 sps:$4 sm:$0xff]   ;;  %v9334_v20 = vld [vmem:[%s13848_s1 + $0x3f0] ss:$28 sps:$4 sm:$0xff]   ;;  %v9345_v23 = vld [vmem:[%s13848_s1 + $0x23c] ss:$28 sps:$4 sm:$0xff]  }
  0x1c   :  { %4741 = vmatpush1.bf16.msra.mxu0 %v9267_v26  ;;  %v9342_v22 = vld [vmem:[%s13848_s1 + $0x42c] ss:$28 sps:$4 sm:$0xff]   ;;  %v9343_v25 = vld [vmem:[%s13848_s1 + $0x238] ss:$28 sps:$4 sm:$0xff]   ;;  %v9348_v26 = vld [vmem:[%s13848_s1 + $0x464] ss:$28 sps:$4 sm:$0xff]  }
  0x1d   :  { %4987 = vmatpush1.bf16.msra.mxu1 %v9268_v27  ;;  %4742 = vmatprep.subr.bf16.mxu0 %v9269_v29  ;;  %v9340_v24 = vld [vmem:[%s13848_s1 + $0x428] ss:$28 sps:$4 sm:$0xff]   ;;  %v9351_v27 = vld [vmem:[%s13848_s1 + $0x274] ss:$28 sps:$4 sm:$0xff]   ;;  %v9346_v28 = vld [vmem:[%s13848_s1 + $0x460] ss:$28 sps:$4 sm:$0xff]  }
  0x1e   :  { %4988 = vmatprep.subr.bf16.mxu1 %v9271_v30  ;;  %v9349_v29 = vld [vmem:[%s13848_s1 + $0x270] ss:$28 sps:$4 sm:$0xff]   ;;  %v9354_v30 = vld [vmem:[%s13848_s1 + $0x49c] ss:$28 sps:$4 sm:$0xff]   ;;  %v9411_v8 = vld [vmem:[%s13848_s1 + $0x4a4] ss:$28 sps:$4 sm:$0xff]  }
  0x1f   :  { %v9357_v32 = vld [vmem:[%s13848_s1 + $0x2ac] ss:$28 sps:$4 sm:$0xff]   ;;  %v9376_v52 = vld [vmem:[%s13848_s1 + $0x578] ss:$28 sps:$4 sm:$0xff]  }
  0x20   :  { %4743 = vmatpush1.bf16.msra.mxu0 %v9273_v33  ;;  %v9352_v33 = vld [vmem:[%s13848_s1 + $0x498] ss:$28 sps:$4 sm:$0xff]   ;;  %v9358_v39 = vld [vmem:[%s13848_s1 + $0x4d0] ss:$28 sps:$4 sm:$0xff]  }
  0x21   :  { %4989 = vmatpush1.bf16.msra.mxu1 %v9274_v34  ;;  %4744 = vmatprep.subr.bf16.mxu0 %v9275_v35  ;;  %v9355_v34 = vld [vmem:[%s13848_s1 + $0x2a8] ss:$28 sps:$4 sm:$0xff]   ;;  %v9360_v35 = vld [vmem:[%s13848_s1 + $0x4d4] ss:$28 sps:$4 sm:$0xff]  }
  0x22   :  { %8686 = vmatprep.subr.msk.bf16.mxu1 %vm4706_vm1, %v8680_v36  ;;  %v9363_v36 = vld [vmem:[%s13848_s1 + $0x2e4] ss:$28 sps:$4 sm:$0xff]  }
  0x24   :  { %4745 = vmatpush1.bf16.msra.mxu0 %v9278_v38  ;;  %v10973_v38 = vpack.c.bf16 %v42_v37, %v42_v37  ;;  %v9444_v37 = vld [vmem:[%s13848_s1 + $0x7e4] ss:$28 sps:$4 sm:$0xff]  }
  0x25   :  { %4991 = vmatpush1.bf16.msra.mxu1 %v4708_v40  ;;  %4746 = vmatprep.subr.bf16.mxu0 %v9280_v41  ;;  %v9361_v40 = vld [vmem:[%s13848_s1 + $0x2e0] ss:$28 sps:$4 sm:$0xff]   ;;  %v9366_v41 = vld [vmem:[%s13848_s1 + $0x50c] ss:$28 sps:$4 sm:$0xff]  }
  0x26   :  { %5015 = vmatprep.subr.bf16.mxu1 %v9284_v42  ;;  %v9369_v42 = vld [vmem:[%s13848_s1 + $0x31c] ss:$28 sps:$4 sm:$0xff]  }
  0x28   :  { %5007 = vmatmul.mubr.bf16.vlgmr.msra.gmra.mrb[0].mxu1 %v10798_v43  ;;  %4747 = vmatpush1.bf16.msra.mxu0 %v9285_v45  ;;  %v9367_v45 = vld [vmem:[%s13848_s1 + $0x318] ss:$28 sps:$4 sm:$0xff]  }
  0x29   :  { %5016 = vmatpush1.bf16.msra.mxu1 %v9282_v44  ;;  %4748 = vmatprep.subr.bf16.mxu0 %v9286_v46  ;;  %v9364_v44 = vld [vmem:[%s13848_s1 + $0x508] ss:$28 sps:$4 sm:$0xff]  }
  0x2a   :  { %5017 = vmatprep.subr.bf16.mxu1 %v9290_v47  ;;  %5047 = vmatprep.mubr.bf16.mxu1 %v10831_v54  ;;  %v9372_v46 = vld [vmem:[%s13848_s1 + $0x544] ss:$28 sps:$4 sm:$0xff]   ;;  %v9375_v47 = vld [vmem:[%s13848_s1 + $0x354] ss:$28 sps:$4 sm:$0xff]  }
  0x2c   :  { %4749 = vmatpush1.bf16.msra.mxu0 %v9291_v49  ;;  %v9373_v49 = vld [vmem:[%s13848_s1 + $0x350] ss:$28 sps:$4 sm:$0xff]  }
  0x2d   :  { %5018 = vmatpush1.bf16.msra.mxu1 %v9288_v48  ;;  %4750 = vmatprep.subr.bf16.mxu0 %v9292_v50  ;;  %v9370_v48 = vld [vmem:[%s13848_s1 + $0x540] ss:$28 sps:$4 sm:$0xff]  }
  0x2e   :  { %5019 = vmatprep.subr.bf16.mxu1 %v9296_v51  ;;  %v9378_v50 = vld [vmem:[%s13848_s1 + $0x57c] ss:$28 sps:$4 sm:$0xff]   ;;  %v9381_v51 = vld [vmem:[%s13848_s1 + $0x38c] ss:$28 sps:$4 sm:$0xff]  }
  0x30   :  { %4751 = vmatpush1.bf16.msra.mxu0 %v9297_v55  ;;  %v9384_v55 = vld [vmem:[%s13848_s1 + $0x5b4] ss:$28 sps:$4 sm:$0xff]  }
  0x31   :  { %5020 = vmatpush1.bf16.msra.mxu1 %v9294_v53  ;;  %4752 = vmatprep.subr.bf16.mxu0 %v9298_v56  ;;  %v9379_v53 = vld [vmem:[%s13848_s1 + $0x388] ss:$28 sps:$4 sm:$0xff]  }
  0x32   :  { %5021 = vmatprep.subr.bf16.mxu1 %v9302_v57  ;;  %v9387_v56 = vld [vmem:[%s13848_s1 + $0x3c4] ss:$28 sps:$4 sm:$0xff]   ;;  %v9382_v57 = vld [vmem:[%s13848_s1 + $0x5b0] ss:$28 sps:$4 sm:$0xff]  }
  0x34   :  { %4753 = vmatpush1.bf16.msra.mxu0 %v9303_v59  ;;  %v9390_v59 = vld [vmem:[%s13848_s1 + $0x5ec] ss:$28 sps:$4 sm:$0xff]  }
  0x35   :  { %5022 = vmatpush1.bf16.msra.mxu1 %v9300_v58  ;;  %4754 = vmatprep.subr.bf16.mxu0 %v9304_v60  ;;  %v9385_v58 = vld [vmem:[%s13848_s1 + $0x3c0] ss:$28 sps:$4 sm:$0xff]  }
  0x36   :  { %5023 = vmatprep.subr.bf16.mxu1 %v9308_v61  ;;  %v9393_v60 = vld [vmem:[%s13848_s1 + $0x3fc] ss:$28 sps:$4 sm:$0xff]   ;;  %v9388_v61 = vld [vmem:[%s13848_s1 + $0x5e8] ss:$28 sps:$4 sm:$0xff]  }
  0x38   :  { %4755 = vmatpush1.bf16.msra.mxu0 %v9309_v63  ;;  %v9396_v63 = vld [vmem:[%s13848_s1 + $0x624] ss:$28 sps:$4 sm:$0xff]  }
  0x39   :  { %5024 = vmatpush1.bf16.msra.mxu1 %v9306_v62  ;;  %4756 = vmatprep.subr.bf16.mxu0 %v9310_v0  ;;  %v9391_v62 = vld [vmem:[%s13848_s1 + $0x3f8] ss:$28 sps:$4 sm:$0xff]  }
  0x3a   :  { %5025 = vmatprep.subr.bf16.mxu1 %v9314_v1  ;;  %v9399_v0 = vld [vmem:[%s13848_s1 + $0x434] ss:$28 sps:$4 sm:$0xff]   ;;  %v9394_v1 = vld [vmem:[%s13848_s1 + $0x620] ss:$28 sps:$4 sm:$0xff]  }
  0x3c   :  { %4757 = vmatpush1.bf16.msra.mxu0 %v9315_v3  ;;  %v9402_v3 = vld [vmem:[%s13848_s1 + $0x65c] ss:$28 sps:$4 sm:$0xff]  }
  0x3d   :  { %5026 = vmatpush1.bf16.msra.mxu1 %v9312_v2  ;;  %4758 = vmatprep.subr.bf16.mxu0 %v9316_v4  ;;  %v9397_v2 = vld [vmem:[%s13848_s1 + $0x430] ss:$28 sps:$4 sm:$0xff]  }
  0x3e   :  { %5027 = vmatprep.subr.bf16.mxu1 %v9320_v5  ;;  %v9405_v4 = vld [vmem:[%s13848_s1 + $0x46c] ss:$28 sps:$4 sm:$0xff]   ;;  %v9400_v5 = vld [vmem:[%s13848_s1 + $0x658] ss:$28 sps:$4 sm:$0xff]  }
  0x40   :  { %4759 = vmatpush1.bf16.msra.mxu0 %v9321_v7  ;;  %v9408_v7 = vld [vmem:[%s13848_s1 + $0x694] ss:$28 sps:$4 sm:$0xff]  }
  0x41   :  { %5028 = vmatpush1.bf16.msra.mxu1 %v9318_v6  ;;  %4769 = vmatprep.subr.bf16.mxu0 %v9324_v9  ;;  %v9403_v6 = vld [vmem:[%s13848_s1 + $0x468] ss:$28 sps:$4 sm:$0xff]   ;;  %v9406_v9 = vld [vmem:[%s13848_s1 + $0x690] ss:$28 sps:$4 sm:$0xff]  }
  0x42   :  { %5029 = vmatprep.subr.bf16.mxu1 %v9327_v10  ;;  %v9409_v10 = vld [vmem:[%s13848_s1 + $0x4a0] ss:$28 sps:$4 sm:$0xff]  }
  0x43   :  { %4761 = vmatmul.mubr.bf16.vlgmr.msra.gmra.mrb[0].mxu0 %v10898_v12 }
  0x44   :  { %4770 = vmatpush1.bf16.msra.mxu0 %v9322_v11  ;;  %4801 = vmatprep.mubr.bf16.mxu0 %v10973_v38  ;;  %v9414_v11 = vld [vmem:[%s13848_s1 + $0x6cc] ss:$28 sps:$4 sm:$0xff]  }
  0x45   :  { %5030 = vmatpush1.bf16.msra.mxu1 %v9325_v13  ;;  %4771 = vmatprep.subr.bf16.mxu0 %v9330_v14  ;;  %v9417_v13 = vld [vmem:[%s13848_s1 + $0x4dc] ss:$28 sps:$4 sm:$0xff]   ;;  %v9412_v14 = vld [vmem:[%s13848_s1 + $0x6c8] ss:$28 sps:$4 sm:$0xff]  }
  0x46   :  { %5031 = vmatprep.subr.bf16.mxu1 %v9333_v15  ;;  %v9415_v15 = vld [vmem:[%s13848_s1 + $0x4d8] ss:$28 sps:$4 sm:$0xff]  }
  0x48   :  { %4772 = vmatpush1.bf16.msra.mxu0 %v9328_v16  ;;  %v9420_v16 = vld [vmem:[%s13848_s1 + $0x704] ss:$28 sps:$4 sm:$0xff]  }
  0x49   :  { %5032 = vmatpush1.bf16.msra.mxu1 %v9331_v17  ;;  %4773 = vmatprep.subr.bf16.mxu0 %v9336_v18  ;;  %v41_v17 = vld [vmem:[%s13849_s0 + $0x10] sm:$0xff] }
  0x4a   :  { %5033 = vmatprep.subr.bf16.mxu1 %v9339_v19  ;;  %v9423_v18 = vld [vmem:[%s13848_s1 + $0x514] ss:$28 sps:$4 sm:$0xff]   ;;  %v9418_v19 = vld [vmem:[%s13848_s1 + $0x700] ss:$28 sps:$4 sm:$0xff]  }
  0x4c   :  { %4774 = vmatpush1.bf16.msra.mxu0 %v9334_v20  ;;  %v9421_v20 = vld [vmem:[%s13848_s1 + $0x510] ss:$28 sps:$4 sm:$0xff]  }
  0x4d   :  { %5034 = vmatpush1.bf16.msra.mxu1 %v9337_v21  ;;  %4775 = vmatprep.subr.bf16.mxu0 %v9342_v22  ;;  %v11107_v21 = vpack.c.bf16 %v41_v17, %v41_v17  ;;  %v9426_v22 = vld [vmem:[%s13848_s1 + $0x73c] ss:$28 sps:$4 sm:$0xff]   ;;  %v9504_v17 = vld [vmem:[%s13848_s1 + $0xa14] ss:$28 sps:$4 sm:$0xff]  }
  0x4e   :  { %5035 = vmatprep.subr.bf16.mxu1 %v9345_v23  ;;  %v9429_v23 = vld [vmem:[%s13848_s1 + $0x54c] ss:$28 sps:$4 sm:$0xff]  }
  0x50   :  { %4776 = vmatpush1.bf16.msra.mxu0 %v9340_v24  ;;  %v44_v24 = vld [vmem:[%s13849_s0 + $0x28] sm:$0xff] }
  0x51   :  { %5036 = vmatpush1.bf16.msra.mxu1 %v9343_v25  ;;  %4777 = vmatprep.subr.bf16.mxu0 %v9348_v26  ;;  %v11118_v25 = vpack.c.bf16 %v44_v24, %v44_v24  ;;  %v9424_v26 = vld [vmem:[%s13848_s1 + $0x738] ss:$28 sps:$4 sm:$0xff]   ;;  %v9508_v24 = vld [vmem:[%s13848_s1 + $0xa48] ss:$28 sps:$4 sm:$0xff]  }
  0x52   :  { %5037 = vmatprep.subr.bf16.mxu1 %v9351_v27  ;;  %v9427_v27 = vld [vmem:[%s13848_s1 + $0x548] ss:$28 sps:$4 sm:$0xff]  }
  0x54   :  { %4778 = vmatpush1.bf16.msra.mxu0 %v9346_v28  ;;  %v9432_v28 = vld [vmem:[%s13848_s1 + $0x774] ss:$28 sps:$4 sm:$0xff]  }
  0x55   :  { %5038 = vmatpush1.bf16.msra.mxu1 %v9349_v29  ;;  %4779 = vmatprep.subr.bf16.mxu0 %v9354_v30  ;;  %v9435_v29 = vld [vmem:[%s13848_s1 + $0x584] ss:$28 sps:$4 sm:$0xff]   ;;  %v9430_v30 = vld [vmem:[%s13848_s1 + $0x770] ss:$28 sps:$4 sm:$0xff]  }
  0x56   :  { %5039 = vmatprep.subr.bf16.mxu1 %v9357_v32  ;;  %v9433_v32 = vld [vmem:[%s13848_s1 + $0x580] ss:$28 sps:$4 sm:$0xff]  }
  0x58   :  { %4780 = vmatpush1.bf16.msra.mxu0 %v9352_v33  ;;  %v9438_v33 = vld [vmem:[%s13848_s1 + $0x7ac] ss:$28 sps:$4 sm:$0xff]  }
  0x59   :  { %5040 = vmatpush1.bf16.msra.mxu1 %v9355_v34  ;;  %4781 = vmatprep.subr.bf16.mxu0 %v9360_v35  ;;  %v9441_v34 = vld [vmem:[%s13848_s1 + $0x5bc] ss:$28 sps:$4 sm:$0xff]   ;;  %v9436_v35 = vld [vmem:[%s13848_s1 + $0x7a8] ss:$28 sps:$4 sm:$0xff]  }
  0x5a   :  { %5041 = vmatprep.subr.bf16.mxu1 %v9363_v36  ;;  %v9439_v36 = vld [vmem:[%s13848_s1 + $0x5b8] ss:$28 sps:$4 sm:$0xff]  }
  0x5c   :  { %4782 = vmatpush1.bf16.msra.mxu0 %v9358_v39  ;;  %v9447_v39 = vld [vmem:[%s13848_s1 + $0x5f4] ss:$28 sps:$4 sm:$0xff]  }
  0x5d   :  { %5042 = vmatpush1.bf16.msra.mxu1 %v9361_v40  ;;  %4783 = vmatprep.subr.bf16.mxu0 %v9366_v41  ;;  %v9442_v40 = vld [vmem:[%s13848_s1 + $0x7e0] ss:$28 sps:$4 sm:$0xff]   ;;  %v9445_v41 = vld [vmem:[%s13848_s1 + $0x5f0] ss:$28 sps:$4 sm:$0xff]  }
  0x5e   :  { %5043 = vmatprep.subr.bf16.mxu1 %v9369_v42  ;;  %v9450_v42 = vld [vmem:[%s13848_s1 + $0x81c] ss:$28 sps:$4 sm:$0xff]  }
  0x60   :  { %4784 = vmatpush1.bf16.msra.mxu0 %v9364_v44  ;;  %v9453_v44 = vld [vmem:[%s13848_s1 + $0x62c] ss:$28 sps:$4 sm:$0xff]  }
  0x61   :  { %5044 = vmatpush1.bf16.msra.mxu1 %v9367_v45  ;;  %4785 = vmatprep.subr.bf16.mxu0 %v9372_v46  ;;  %v9448_v45 = vld [vmem:[%s13848_s1 + $0x818] ss:$28 sps:$4 sm:$0xff]   ;;  %v9451_v46 = vld [vmem:[%s13848_s1 + $0x628] ss:$28 sps:$4 sm:$0xff]  }
  0x62   :  { %5045 = vmatprep.subr.bf16.mxu1 %v9375_v47  ;;  %v9456_v47 = vld [vmem:[%s13848_s1 + $0x854] ss:$28 sps:$4 sm:$0xff]  }
  0x64   :  { %4786 = vmatpush1.bf16.msra.mxu0 %v9370_v48  ;;  %v9459_v48 = vld [vmem:[%s13848_s1 + $0x664] ss:$28 sps:$4 sm:$0xff]  }
  0x65   :  { %5046 = vmatpush1.bf16.msra.mxu1 %v9373_v49  ;;  %4787 = vmatprep.subr.bf16.mxu0 %v9378_v50  ;;  %v9454_v49 = vld [vmem:[%s13848_s1 + $0x850] ss:$28 sps:$4 sm:$0xff]   ;;  %v9457_v50 = vld [vmem:[%s13848_s1 + $0x660] ss:$28 sps:$4 sm:$0xff]  }
  0x66   :  { %5056 = vmatprep.subr.bf16.mxu1 %v9381_v51  ;;  %v9462_v51 = vld [vmem:[%s13848_s1 + $0x88c] ss:$28 sps:$4 sm:$0xff]  }
  0x68   :  { %5048 = vmatmul.mubr.bf16.vlgmr.msra.gmra.mrb[4].mxu1 %v10898_v12  ;;  %4788 = vmatpush1.bf16.msra.mxu0 %v9376_v52  ;;  %v9465_v52 = vld [vmem:[%s13848_s1 + $0x69c] ss:$28 sps:$4 sm:$0xff]  }
  0x69   :  { %5057 = vmatpush1.bf16.msra.mxu1 %v9379_v53  ;;  %4789 = vmatprep.subr.bf16.mxu0 %v9384_v55  ;;  %v9460_v53 = vld [vmem:[%s13848_s1 + $0x888] ss:$28 sps:$4 sm:$0xff]   ;;  %v9463_v55 = vld [vmem:[%s13848_s1 + $0x698] ss:$28 sps:$4 sm:$0xff]  }
  0x6a   :  { %5058 = vmatprep.subr.bf16.mxu1 %v9387_v56  ;;  %5088 = vmatprep.mubr.bf16.mxu1 %v10973_v38  ;;  %v9468_v56 = vld [vmem:[%s13848_s1 + $0x8c4] ss:$28 sps:$4 sm:$0xff]  }
  0x6c   :  { %4790 = vmatpush1.bf16.msra.mxu0 %v9382_v57  ;;  %v9471_v57 = vld [vmem:[%s13848_s1 + $0x6d4] ss:$28 sps:$4 sm:$0xff]  }
  0x6d   :  { %5059 = vmatpush1.bf16.msra.mxu1 %v9385_v58  ;;  %4791 = vmatprep.subr.bf16.mxu0 %v9390_v59  ;;  %v9466_v58 = vld [vmem:[%s13848_s1 + $0x8c0] ss:$28 sps:$4 sm:$0xff]   ;;  %v9469_v59 = vld [vmem:[%s13848_s1 + $0x6d0] ss:$28 sps:$4 sm:$0xff]  }
  0x6e   :  { %5060 = vmatprep.subr.bf16.mxu1 %v9393_v60  ;;  %v9474_v60 = vld [vmem:[%s13848_s1 + $0x8fc] ss:$28 sps:$4 sm:$0xff]  }
  0x70   :  { %4792 = vmatpush1.bf16.msra.mxu0 %v9388_v61  ;;  %v9477_v61 = vld [vmem:[%s13848_s1 + $0x70c] ss:$28 sps:$4 sm:$0xff]  }
  0x71   :  { %5061 = vmatpush1.bf16.msra.mxu1 %v9391_v62  ;;  %4793 = vmatprep.subr.bf16.mxu0 %v9396_v63  ;;  %v9472_v62 = vld [vmem:[%s13848_s1 + $0x8f8] ss:$28 sps:$4 sm:$0xff]   ;;  %v9475_v63 = vld [vmem:[%s13848_s1 + $0x708] ss:$28 sps:$4 sm:$0xff]  }
  0x72   :  { %5062 = vmatprep.subr.bf16.mxu1 %v9399_v0  ;;  %v9480_v0 = vld [vmem:[%s13848_s1 + $0x934] ss:$28 sps:$4 sm:$0xff]  }
  0x74   :  { %4794 = vmatpush1.bf16.msra.mxu0 %v9394_v1  ;;  %v9483_v1 = vld [vmem:[%s13848_s1 + $0x744] ss:$28 sps:$4 sm:$0xff]  }
  0x75   :  { %5063 = vmatpush1.bf16.msra.mxu1 %v9397_v2  ;;  %4795 = vmatprep.subr.bf16.mxu0 %v9402_v3  ;;  %v9478_v2 = vld [vmem:[%s13848_s1 + $0x930] ss:$28 sps:$4 sm:$0xff]   ;;  %v9481_v3 = vld [vmem:[%s13848_s1 + $0x740] ss:$28 sps:$4 sm:$0xff]  }
  0x76   :  { %5064 = vmatprep.subr.bf16.mxu1 %v9405_v4  ;;  %v9486_v4 = vld [vmem:[%s13848_s1 + $0x96c] ss:$28 sps:$4 sm:$0xff]  }
  0x78   :  { %4796 = vmatpush1.bf16.msra.mxu0 %v9400_v5  ;;  %v9489_v5 = vld [vmem:[%s13848_s1 + $0x77c] ss:$28 sps:$4 sm:$0xff]  }
  0x79   :  { %5065 = vmatpush1.bf16.msra.mxu1 %v9403_v6  ;;  %4797 = vmatprep.subr.bf16.mxu0 %v9408_v7  ;;  %v9484_v6 = vld [vmem:[%s13848_s1 + $0x968] ss:$28 sps:$4 sm:$0xff]   ;;  %v9487_v7 = vld [vmem:[%s13848_s1 + $0x778] ss:$28 sps:$4 sm:$0xff]  }
  0x7a   :  { %5066 = vmatprep.subr.bf16.mxu1 %v9411_v8  ;;  %v9492_v8 = vld [vmem:[%s13848_s1 + $0x9a4] ss:$28 sps:$4 sm:$0xff]  }
  0x7c   :  { %4798 = vmatpush1.bf16.msra.mxu0 %v9406_v9  ;;  %v9495_v9 = vld [vmem:[%s13848_s1 + $0x7b4] ss:$28 sps:$4 sm:$0xff]  }
  0x7d   :  { %5067 = vmatpush1.bf16.msra.mxu1 %v9409_v10  ;;  %4799 = vmatprep.subr.bf16.mxu0 %v9414_v11  ;;  %v9490_v10 = vld [vmem:[%s13848_s1 + $0x9a0] ss:$28 sps:$4 sm:$0xff]   ;;  %v9493_v11 = vld [vmem:[%s13848_s1 + $0x7b0] ss:$28 sps:$4 sm:$0xff]  }
  0x7e   :  { %5068 = vmatprep.subr.bf16.mxu1 %v9417_v13  ;;  %v9498_v13 = vld [vmem:[%s13848_s1 + $0x9dc] ss:$28 sps:$4 sm:$0xff]  }
  0x80   :  { %4800 = vmatpush1.bf16.msra.mxu0 %v9412_v14  ;;  %v9501_v14 = vld [vmem:[%s13848_s1 + $0x7ec] ss:$28 sps:$4 sm:$0xff]  }
  0x81   :  { %5069 = vmatpush1.bf16.msra.mxu1 %v9415_v15  ;;  %4810 = vmatprep.subr.bf16.mxu0 %v9420_v16  ;;  %v9496_v15 = vld [vmem:[%s13848_s1 + $0x9d8] ss:$28 sps:$4 sm:$0xff]   ;;  %v9499_v16 = vld [vmem:[%s13848_s1 + $0x7e8] ss:$28 sps:$4 sm:$0xff]  }
  0x82   :  { %5070 = vmatprep.subr.bf16.mxu1 %v9423_v18  ;;  %v9507_v18 = vld [vmem:[%s13848_s1 + $0x824] ss:$28 sps:$4 sm:$0xff]  }
  0x83   :  { %4802 = vmatmul.mubr.bf16.vlgmr.msra.gmra.mrb[0].mxu0 %v11107_v21 }
  0x84   :  { %4811 = vmatpush1.bf16.msra.mxu0 %v9418_v19  ;;  %4842 = vmatprep.mubr.bf16.mxu0 %v11118_v25  ;;  %v9502_v19 = vld [vmem:[%s13848_s1 + $0xa10] ss:$28 sps:$4 sm:$0xff]  }
  0x85   :  { %5071 = vmatpush1.bf16.msra.mxu1 %v9421_v20  ;;  %4812 = vmatprep.subr.bf16.mxu0 %v9426_v22  ;;  %v9505_v20 = vld [vmem:[%s13848_s1 + $0x820] ss:$28 sps:$4 sm:$0xff]   ;;  %v9510_v22 = vld [vmem:[%s13848_s1 + $0xa4c] ss:$28 sps:$4 sm:$0xff]  }
  0x86   :  { %5072 = vmatprep.subr.bf16.mxu1 %v9429_v23  ;;  %v9513_v23 = vld [vmem:[%s13848_s1 + $0x85c] ss:$28 sps:$4 sm:$0xff]  }
  0x88   :  { %4813 = vmatpush1.bf16.msra.mxu0 %v9424_v26  ;;  %v9511_v26 = vld [vmem:[%s13848_s1 + $0x858] ss:$28 sps:$4 sm:$0xff]  }
  0x89   :  { %5073 = vmatpush1.bf16.msra.mxu1 %v9427_v27  ;;  %4814 = vmatprep.subr.bf16.mxu0 %v9432_v28  ;;  %v9516_v27 = vld [vmem:[%s13848_s1 + $0xa84] ss:$28 sps:$4 sm:$0xff]  }
  0x8a   :  { %5074 = vmatprep.subr.bf16.mxu1 %v9435_v29  ;;  %v43_v28 = vld [vmem:[%s13849_s0 + $0x20] sm:$0xff]  ;;  %v9519_v29 = vld [vmem:[%s13848_s1 + $0x894] ss:$28 sps:$4 sm:$0xff]  }
  0x8c   :  { %4815 = vmatpush1.bf16.msra.mxu0 %v9430_v30  ;;  %v9514_v30 = vld [vmem:[%s13848_s1 + $0xa80] ss:$28 sps:$4 sm:$0xff]  }
  0x8d   :  { %5075 = vmatpush1.bf16.msra.mxu1 %v9433_v32  ;;  %4816 = vmatprep.subr.bf16.mxu0 %v9438_v33  ;;  %v11310_v32 = vpack.c.bf16 %v43_v28, %v43_v28  ;;  %v46_v33 = vld [vmem:[%s13849_s0 + $0x38] sm:$0xff] }
  0x8e   :  { %5076 = vmatprep.subr.bf16.mxu1 %v9441_v34  ;;  %v9517_v34 = vld [vmem:[%s13848_s1 + $0x890] ss:$28 sps:$4 sm:$0xff]   ;;  %v9592_v28 = vld [vmem:[%s13848_s1 + $0xd58] ss:$28 sps:$4 sm:$0xff]  }
  0x90   :  { %4817 = vmatpush1.bf16.msra.mxu0 %v9436_v35  ;;  %v9522_v35 = vld [vmem:[%s13848_s1 + $0xabc] ss:$28 sps:$4 sm:$0xff]  }
  0x91   :  { %5077 = vmatpush1.bf16.msra.mxu1 %v9439_v36  ;;  %4818 = vmatprep.subr.bf16.mxu0 %v9444_v37  ;;  %v9525_v36 = vld [vmem:[%s13848_s1 + $0x8cc] ss:$28 sps:$4 sm:$0xff]   ;;  %v11324_v37 = vpack.c.bf16 %v46_v33, %v46_v33  ;;  %v9603_v33 = vld [vmem:[%s13848_s1 + $0xba4] ss:$28 sps:$4 sm:$0xff]  }
  0x92   :  { %5078 = vmatprep.subr.bf16.mxu1 %v9447_v39  ;;  %v9520_v39 = vld [vmem:[%s13848_s1 + $0xab8] ss:$28 sps:$4 sm:$0xff]  }
  0x94   :  { %4819 = vmatpush1.bf16.msra.mxu0 %v9442_v40  ;;  %v9523_v40 = vld [vmem:[%s13848_s1 + $0x8c8] ss:$28 sps:$4 sm:$0xff]  }
  0x95   :  { %5079 = vmatpush1.bf16.msra.mxu1 %v9445_v41  ;;  %4820 = vmatprep.subr.bf16.mxu0 %v9450_v42  ;;  %v9528_v41 = vld [vmem:[%s13848_s1 + $0xaf4] ss:$28 sps:$4 sm:$0xff]   ;;  %v9531_v42 = vld [vmem:[%s13848_s1 + $0x904] ss:$28 sps:$4 sm:$0xff]  }
  0x96   :  { %5080 = vmatprep.subr.bf16.mxu1 %v9453_v44  ;;  %v9526_v44 = vld [vmem:[%s13848_s1 + $0xaf0] ss:$28 sps:$4 sm:$0xff]  }
  0x98   :  { %4821 = vmatpush1.bf16.msra.mxu0 %v9448_v45  ;;  %v9529_v45 = vld [vmem:[%s13848_s1 + $0x900] ss:$28 sps:$4 sm:$0xff]  }
  0x99   :  { %5081 = vmatpush1.bf16.msra.mxu1 %v9451_v46  ;;  %4822 = vmatprep.subr.bf16.mxu0 %v9456_v47  ;;  %v9534_v46 = vld [vmem:[%s13848_s1 + $0xb2c] ss:$28 sps:$4 sm:$0xff]   ;;  %v9537_v47 = vld [vmem:[%s13848_s1 + $0x93c] ss:$28 sps:$4 sm:$0xff]  }
  0x9a   :  { %5082 = vmatprep.subr.bf16.mxu1 %v9459_v48  ;;  %v9532_v48 = vld [vmem:[%s13848_s1 + $0xb28] ss:$28 sps:$4 sm:$0xff]  }
  0x9c   :  { %4823 = vmatpush1.bf16.msra.mxu0 %v9454_v49  ;;  %v9535_v49 = vld [vmem:[%s13848_s1 + $0x938] ss:$28 sps:$4 sm:$0xff]  }
  0x9d   :  { %5083 = vmatpush1.bf16.msra.mxu1 %v9457_v50  ;;  %4824 = vmatprep.subr.bf16.mxu0 %v9462_v51  ;;  %v9540_v50 = vld [vmem:[%s13848_s1 + $0xb64] ss:$28 sps:$4 sm:$0xff]   ;;  %v9543_v51 = vld [vmem:[%s13848_s1 + $0x974] ss:$28 sps:$4 sm:$0xff]  }
  0x9e   :  { %5084 = vmatprep.subr.bf16.mxu1 %v9465_v52  ;;  %v9538_v52 = vld [vmem:[%s13848_s1 + $0xb60] ss:$28 sps:$4 sm:$0xff]  }
  0xa0   :  { %4825 = vmatpush1.bf16.msra.mxu0 %v9460_v53  ;;  %v9541_v53 = vld [vmem:[%s13848_s1 + $0x970] ss:$28 sps:$4 sm:$0xff]  }
  0xa1   :  { %5085 = vmatpush1.bf16.msra.mxu1 %v9463_v55  ;;  %4826 = vmatprep.subr.bf16.mxu0 %v9468_v56  ;;  %v9546_v55 = vld [vmem:[%s13848_s1 + $0xb9c] ss:$28 sps:$4 sm:$0xff]   ;;  %v9549_v56 = vld [vmem:[%s13848_s1 + $0x9ac] ss:$28 sps:$4 sm:$0xff]  }
  0xa2   :  { %5086 = vmatprep.subr.bf16.mxu1 %v9471_v57  ;;  %v9544_v57 = vld [vmem:[%s13848_s1 + $0xb98] ss:$28 sps:$4 sm:$0xff]  }
  0xa4   :  { %4827 = vmatpush1.bf16.msra.mxu0 %v9466_v58  ;;  %v9547_v58 = vld [vmem:[%s13848_s1 + $0x9a8] ss:$28 sps:$4 sm:$0xff]  }
  0xa5   :  { %5087 = vmatpush1.bf16.msra.mxu1 %v9469_v59  ;;  %4828 = vmatprep.subr.bf16.mxu0 %v9474_v60  ;;  %v9552_v59 = vld [vmem:[%s13848_s1 + $0xbd4] ss:$28 sps:$4 sm:$0xff]   ;;  %v9555_v60 = vld [vmem:[%s13848_s1 + $0x9e4] ss:$28 sps:$4 sm:$0xff]  }
  0xa6   :  { %5097 = vmatprep.subr.bf16.mxu1 %v9477_v61  ;;  %v9550_v61 = vld [vmem:[%s13848_s1 + $0xbd0] ss:$28 sps:$4 sm:$0xff]  }
  0xa8   :  { %5089 = vmatmul.mubr.bf16.vlgmr.msra.gmra.mrb[4].mxu1 %v11107_v21  ;;  %4829 = vmatpush1.bf16.msra.mxu0 %v9472_v62  ;;  %v9553_v62 = vld [vmem:[%s13848_s1 + $0x9e0] ss:$28 sps:$4 sm:$0xff]  }
  0xa9   :  { %5098 = vmatpush1.bf16.msra.mxu1 %v9475_v63  ;;  %4830 = vmatprep.subr.bf16.mxu0 %v9480_v0  ;;  %v9558_v63 = vld [vmem:[%s13848_s1 + $0xc0c] ss:$28 sps:$4 sm:$0xff]   ;;  %v9561_v0 = vld [vmem:[%s13848_s1 + $0xa1c] ss:$28 sps:$4 sm:$0xff]  }
  0xaa   :  { %5099 = vmatprep.subr.bf16.mxu1 %v9483_v1  ;;  %5129 = vmatprep.mubr.bf16.mxu1 %v11118_v25  ;;  %v9556_v1 = vld [vmem:[%s13848_s1 + $0xc08] ss:$28 sps:$4 sm:$0xff]  }
  0xac   :  { %4831 = vmatpush1.bf16.msra.mxu0 %v9478_v2  ;;  %v9559_v2 = vld [vmem:[%s13848_s1 + $0xa18] ss:$28 sps:$4 sm:$0xff]  }
  0xad   :  { %5100 = vmatpush1.bf16.msra.mxu1 %v9481_v3  ;;  %4832 = vmatprep.subr.bf16.mxu0 %v9486_v4  ;;  %v9564_v3 = vld [vmem:[%s13848_s1 + $0xc44] ss:$28 sps:$4 sm:$0xff]   ;;  %v9567_v4 = vld [vmem:[%s13848_s1 + $0xa54] ss:$28 sps:$4 sm:$0xff]  }
  0xae   :  { %5101 = vmatprep.subr.bf16.mxu1 %v9489_v5  ;;  %v9562_v5 = vld [vmem:[%s13848_s1 + $0xc40] ss:$28 sps:$4 sm:$0xff]  }
  0xb0   :  { %4833 = vmatpush1.bf16.msra.mxu0 %v9484_v6  ;;  %v9565_v6 = vld [vmem:[%s13848_s1 + $0xa50] ss:$28 sps:$4 sm:$0xff]  }
  0xb1   :  { %5102 = vmatpush1.bf16.msra.mxu1 %v9487_v7  ;;  %4834 = vmatprep.subr.bf16.mxu0 %v9492_v8  ;;  %v9570_v7 = vld [vmem:[%s13848_s1 + $0xc7c] ss:$28 sps:$4 sm:$0xff]   ;;  %v9573_v8 = vld [vmem:[%s13848_s1 + $0xa8c] ss:$28 sps:$4 sm:$0xff]  }
  0xb2   :  { %5103 = vmatprep.subr.bf16.mxu1 %v9495_v9  ;;  %v9568_v9 = vld [vmem:[%s13848_s1 + $0xc78] ss:$28 sps:$4 sm:$0xff]  }
  0xb4   :  { %4835 = vmatpush1.bf16.msra.mxu0 %v9490_v10  ;;  %v9571_v10 = vld [vmem:[%s13848_s1 + $0xa88] ss:$28 sps:$4 sm:$0xff]  }
  0xb5   :  { %5104 = vmatpush1.bf16.msra.mxu1 %v9493_v11  ;;  %4836 = vmatprep.subr.bf16.mxu0 %v9498_v13  ;;  %v9576_v11 = vld [vmem:[%s13848_s1 + $0xcb4] ss:$28 sps:$4 sm:$0xff]   ;;  %v9579_v13 = vld [vmem:[%s13848_s1 + $0xac4] ss:$28 sps:$4 sm:$0xff]  }
  0xb6   :  { %5105 = vmatprep.subr.bf16.mxu1 %v9501_v14  ;;  %v9574_v14 = vld [vmem:[%s13848_s1 + $0xcb0] ss:$28 sps:$4 sm:$0xff]  }
  0xb8   :  { %4837 = vmatpush1.bf16.msra.mxu0 %v9496_v15  ;;  %v9577_v15 = vld [vmem:[%s13848_s1 + $0xac0] ss:$28 sps:$4 sm:$0xff]  }
  0xb9   :  { %5106 = vmatpush1.bf16.msra.mxu1 %v9499_v16  ;;  %4838 = vmatprep.subr.bf16.mxu0 %v9504_v17  ;;  %v9582_v16 = vld [vmem:[%s13848_s1 + $0xcec] ss:$28 sps:$4 sm:$0xff]   ;;  %v9585_v17 = vld [vmem:[%s13848_s1 + $0xafc] ss:$28 sps:$4 sm:$0xff]  }
  0xba   :  { %5107 = vmatprep.subr.bf16.mxu1 %v9507_v18  ;;  %v9580_v18 = vld [vmem:[%s13848_s1 + $0xce8] ss:$28 sps:$4 sm:$0xff]  }
  0xbc   :  { %4839 = vmatpush1.bf16.msra.mxu0 %v9502_v19  ;;  %v9583_v19 = vld [vmem:[%s13848_s1 + $0xaf8] ss:$28 sps:$4 sm:$0xff]  }
  0xbd   :  { %5108 = vmatpush1.bf16.msra.mxu1 %v9505_v20  ;;  %4840 = vmatprep.subr.bf16.mxu0 %v9510_v22  ;;  %v9588_v20 = vld [vmem:[%s13848_s1 + $0xd24] ss:$28 sps:$4 sm:$0xff]   ;;  %v9591_v22 = vld [vmem:[%s13848_s1 + $0xb34] ss:$28 sps:$4 sm:$0xff]  }
  0xbe   :  { %5109 = vmatprep.subr.bf16.mxu1 %v9513_v23  ;;  %v9586_v23 = vld [vmem:[%s13848_s1 + $0xd20] ss:$28 sps:$4 sm:$0xff]  }
  0xc0   :  { %4841 = vmatpush1.bf16.msra.mxu0 %v9508_v24  ;;  %v9589_v24 = vld [vmem:[%s13848_s1 + $0xb30] ss:$28 sps:$4 sm:$0xff]  }
  0xc1   :  { %5110 = vmatpush1.bf16.msra.mxu1 %v9511_v26  ;;  %4851 = vmatprep.subr.bf16.mxu0 %v9516_v27  ;;  %v9594_v26 = vld [vmem:[%s13848_s1 + $0xd5c] ss:$28 sps:$4 sm:$0xff]   ;;  %v9597_v27 = vld [vmem:[%s13848_s1 + $0xb6c] ss:$28 sps:$4 sm:$0xff]  }
  0xc2   :  { %5111 = vmatprep.subr.bf16.mxu1 %v9519_v29  ;;  %v9595_v29 = vld [vmem:[%s13848_s1 + $0xb68] ss:$28 sps:$4 sm:$0xff]  }
  0xc3   :  { %4843 = vmatmul.mubr.bf16.vlgmr.msra.gmra.mrb[0].mxu0 %v11310_v32 }
  0xc4   :  { %4852 = vmatpush1.bf16.msra.mxu0 %v9514_v30  ;;  %4883 = vmatprep.mubr.bf16.mxu0 %v11324_v37  ;;  %v9600_v30 = vld [vmem:[%s13848_s1 + $0xd94] ss:$28 sps:$4 sm:$0xff]  }
  0xc5   :  { %5112 = vmatpush1.bf16.msra.mxu1 %v9517_v34  ;;  %4853 = vmatprep.subr.bf16.mxu0 %v9522_v35  ;;  %v9598_v34 = vld [vmem:[%s13848_s1 + $0xd90] ss:$28 sps:$4 sm:$0xff]   ;;  %v9601_v35 = vld [vmem:[%s13848_s1 + $0xba0] ss:$28 sps:$4 sm:$0xff]  }
  0xc6   :  { %5113 = vmatprep.subr.bf16.mxu1 %v9525_v36  ;;  %v9606_v36 = vld [vmem:[%s13848_s1 + $0xdcc] ss:$28 sps:$4 sm:$0xff]  }
  0xc8   :  { %4854 = vmatpush1.bf16.msra.mxu0 %v9520_v39  ;;  %v9609_v39 = vld [vmem:[%s13848_s1 + $0xbdc] ss:$28 sps:$4 sm:$0xff]  }
  0xc9   :  { %5114 = vmatpush1.bf16.msra.mxu1 %v9523_v40  ;;  %4855 = vmatprep.subr.bf16.mxu0 %v9528_v41  ;;  %v9604_v40 = vld [vmem:[%s13848_s1 + $0xdc8] ss:$28 sps:$4 sm:$0xff]   ;;  %v9607_v41 = vld [vmem:[%s13848_s1 + $0xbd8] ss:$28 sps:$4 sm:$0xff]  }
  0xca   :  { %5115 = vmatprep.subr.bf16.mxu1 %v9531_v42  ;;  %v45_v42 = vld [vmem:[%s13849_s0 + $0x30] sm:$0xff] }
  0xcc   :  { %4856 = vmatpush1.bf16.msra.mxu0 %v9526_v44 }
  0xcd   :  { %5116 = vmatpush1.bf16.msra.mxu1 %v9529_v45  ;;  %4857 = vmatprep.subr.bf16.mxu0 %v9534_v46  ;;  %v9612_v45 = vld [vmem:[%s13848_s1 + $0xe04] ss:$28 sps:$4 sm:$0xff]   ;;  %v9615_v46 = vld [vmem:[%s13848_s1 + $0xc14] ss:$28 sps:$4 sm:$0xff]  }
  0xce   :  { %5117 = vmatprep.subr.bf16.mxu1 %v9537_v47 }
  0xd0   :  { %4858 = vmatpush1.bf16.msra.mxu0 %v9532_v48  ;;  %v9610_v48 = vld [vmem:[%s13848_s1 + $0xe00] ss:$28 sps:$4 sm:$0xff]  }
  0xd1   :  { %5118 = vmatpush1.bf16.msra.mxu1 %v9535_v49  ;;  %4859 = vmatprep.subr.bf16.mxu0 %v9540_v50  ;;  %v11520_v50 = vpack.c.bf16 %v45_v42, %v45_v42  ;;  %v9679_v42 = vld [vmem:[%s13848_s1 + $0xe78] ss:$28 sps:$4 sm:$0xff]  }
  0xd2   :  { %5119 = vmatprep.subr.bf16.mxu1 %v9543_v51  ;;  %v48_v51 = vld [vmem:[%s13849_s0 + $0x48] sm:$0xff] }
  0xd4   :  { %4860 = vmatpush1.bf16.msra.mxu0 %v9538_v52 }
  0xd5   :  { %5120 = vmatpush1.bf16.msra.mxu1 %v9541_v53  ;;  %4861 = vmatprep.subr.bf16.mxu0 %v9546_v55  ;;  %v9613_v53 = vld [vmem:[%s13848_s1 + $0xc10] ss:$28 sps:$4 sm:$0xff]   ;;  %v9618_v55 = vld [vmem:[%s13848_s1 + $0xe3c] ss:$28 sps:$4 sm:$0xff]  }
  0xd6   :  { %5121 = vmatprep.subr.bf16.mxu1 %v9549_v56  ;;  %v9621_v56 = vld [vmem:[%s13848_s1 + $0xc4c] ss:$28 sps:$4 sm:$0xff]  }
  0xd8   :  { %4862 = vmatpush1.bf16.msra.mxu0 %v9544_v57  ;;  %v11534_v57 = vpack.c.bf16 %v48_v51, %v48_v51  ;;  %v9690_v51 = vld [vmem:[%s13848_s1 + $0x10dc] ss:$28 sps:$4 sm:$0xff]  }
  0xd9   :  { %5122 = vmatpush1.bf16.msra.mxu1 %v9547_v58  ;;  %4863 = vmatprep.subr.bf16.mxu0 %v9552_v59  ;;  %v9616_v58 = vld [vmem:[%s13848_s1 + $0xe38] ss:$28 sps:$4 sm:$0xff]   ;;  %v9619_v59 = vld [vmem:[%s13848_s1 + $0xc48] ss:$28 sps:$4 sm:$0xff]  }
  0xda   :  { %5123 = vmatprep.subr.bf16.mxu1 %v9555_v60  ;;  %v9624_v60 = vld [vmem:[%s13848_s1 + $0xe74] ss:$28 sps:$4 sm:$0xff]  }
  0xdc   :  { %4864 = vmatpush1.bf16.msra.mxu0 %v9550_v61  ;;  %v9627_v61 = vld [vmem:[%s13848_s1 + $0xc84] ss:$28 sps:$4 sm:$0xff]  }
  0xdd   :  { %5124 = vmatpush1.bf16.msra.mxu1 %v9553_v62  ;;  %4865 = vmatprep.subr.bf16.mxu0 %v9558_v63  ;;  %v9622_v62 = vld [vmem:[%s13848_s1 + $0xe70] ss:$28 sps:$4 sm:$0xff]   ;;  %v9625_v63 = vld [vmem:[%s13848_s1 + $0xc80] ss:$28 sps:$4 sm:$0xff]  }
  0xde   :  { %5125 = vmatprep.subr.bf16.mxu1 %v9561_v0  ;;  %v9630_v0 = vld [vmem:[%s13848_s1 + $0xeac] ss:$28 sps:$4 sm:$0xff]  }
  0xe0   :  { %4866 = vmatpush1.bf16.msra.mxu0 %v9556_v1  ;;  %v9633_v1 = vld [vmem:[%s13848_s1 + $0xcbc] ss:$28 sps:$4 sm:$0xff]  }
  0xe1   :  { %5126 = vmatpush1.bf16.msra.mxu1 %v9559_v2  ;;  %4867 = vmatprep.subr.bf16.mxu0 %v9564_v3  ;;  %v9628_v2 = vld [vmem:[%s13848_s1 + $0xea8] ss:$28 sps:$4 sm:$0xff]   ;;  %v9631_v3 = vld [vmem:[%s13848_s1 + $0xcb8] ss:$28 sps:$4 sm:$0xff]  }
  0xe2   :  { %5127 = vmatprep.subr.bf16.mxu1 %v9567_v4  ;;  %v9636_v4 = vld [vmem:[%s13848_s1 + $0xee4] ss:$28 sps:$4 sm:$0xff]  }
  0xe4   :  { %4868 = vmatpush1.bf16.msra.mxu0 %v9562_v5  ;;  %v9639_v5 = vld [vmem:[%s13848_s1 + $0xcf4] ss:$28 sps:$4 sm:$0xff]  }
  0xe5   :  { %5128 = vmatpush1.bf16.msra.mxu1 %v9565_v6  ;;  %4869 = vmatprep.subr.bf16.mxu0 %v9570_v7  ;;  %v9634_v6 = vld [vmem:[%s13848_s1 + $0xee0] ss:$28 sps:$4 sm:$0xff]   ;;  %v9637_v7 = vld [vmem:[%s13848_s1 + $0xcf0] ss:$28 sps:$4 sm:$0xff]  }
  0xe6   :  { %5138 = vmatprep.subr.bf16.mxu1 %v9573_v8  ;;  %v9642_v8 = vld [vmem:[%s13848_s1 + $0xf1c] ss:$28 sps:$4 sm:$0xff]  }
  0xe8   :  { %5130 = vmatmul.mubr.bf16.vlgmr.msra.gmra.mrb[4].mxu1 %v11310_v32  ;;  %4870 = vmatpush1.bf16.msra.mxu0 %v9568_v9  ;;  %v9645_v9 = vld [vmem:[%s13848_s1 + $0xd2c] ss:$28 sps:$4 sm:$0xff]  }
  0xe9   :  { %5139 = vmatpush1.bf16.msra.mxu1 %v9571_v10  ;;  %4871 = vmatprep.subr.bf16.mxu0 %v9576_v11  ;;  %v9640_v10 = vld [vmem:[%s13848_s1 + $0xf18] ss:$28 sps:$4 sm:$0xff]   ;;  %v9643_v11 = vld [vmem:[%s13848_s1 + $0xd28] ss:$28 sps:$4 sm:$0xff]  }
  0xea   :  { %5140 = vmatprep.subr.bf16.mxu1 %v9579_v13  ;;  %5170 = vmatprep.mubr.bf16.mxu1 %v11324_v37  ;;  %v9648_v13 = vld [vmem:[%s13848_s1 + $0xf54] ss:$28 sps:$4 sm:$0xff]  }
  0xec   :  { %4872 = vmatpush1.bf16.msra.mxu0 %v9574_v14  ;;  %v9651_v14 = vld [vmem:[%s13848_s1 + $0xd64] ss:$28 sps:$4 sm:$0xff]  }
  0xed   :  { %5141 = vmatpush1.bf16.msra.mxu1 %v9577_v15  ;;  %4873 = vmatprep.subr.bf16.mxu0 %v9582_v16  ;;  %v9646_v15 = vld [vmem:[%s13848_s1 + $0xf50] ss:$28 sps:$4 sm:$0xff]   ;;  %v9649_v16 = vld [vmem:[%s13848_s1 + $0xd60] ss:$28 sps:$4 sm:$0xff]  }
  0xee   :  { %5142 = vmatprep.subr.bf16.mxu1 %v9585_v17  ;;  %v9654_v17 = vld [vmem:[%s13848_s1 + $0xf8c] ss:$28 sps:$4 sm:$0xff]  }
  0xf0   :  { %4874 = vmatpush1.bf16.msra.mxu0 %v9580_v18  ;;  %v9657_v18 = vld [vmem:[%s13848_s1 + $0xd9c] ss:$28 sps:$4 sm:$0xff]  }
  0xf1   :  { %5143 = vmatpush1.bf16.msra.mxu1 %v9583_v19  ;;  %4875 = vmatprep.subr.bf16.mxu0 %v9588_v20  ;;  %v9652_v19 = vld [vmem:[%s13848_s1 + $0xf88] ss:$28 sps:$4 sm:$0xff]   ;;  %v9655_v20 = vld [vmem:[%s13848_s1 + $0xd98] ss:$28 sps:$4 sm:$0xff]  }
  0xf2   :  { %5144 = vmatprep.subr.bf16.mxu1 %v9591_v22  ;;  %v9660_v22 = vld [vmem:[%s13848_s1 + $0xfc4] ss:$28 sps:$4 sm:$0xff]  }
  0xf4   :  { %4876 = vmatpush1.bf16.msra.mxu0 %v9586_v23  ;;  %v9663_v23 = vld [vmem:[%s13848_s1 + $0xdd4] ss:$28 sps:$4 sm:$0xff]  }
  0xf5   :  { %5145 = vmatpush1.bf16.msra.mxu1 %v9589_v24  ;;  %4877 = vmatprep.subr.bf16.mxu0 %v9594_v26  ;;  %v9658_v24 = vld [vmem:[%s13848_s1 + $0xfc0] ss:$28 sps:$4 sm:$0xff]   ;;  %v9661_v26 = vld [vmem:[%s13848_s1 + $0xdd0] ss:$28 sps:$4 sm:$0xff]  }
  0xf6   :  { %5146 = vmatprep.subr.bf16.mxu1 %v9597_v27  ;;  %v9666_v27 = vld [vmem:[%s13848_s1 + $0xffc] ss:$28 sps:$4 sm:$0xff]  }
  0xf8   :  { %4878 = vmatpush1.bf16.msra.mxu0 %v9592_v28  ;;  %v9669_v28 = vld [vmem:[%s13848_s1 + $0xe0c] ss:$28 sps:$4 sm:$0xff]  }
  0xf9   :  { %5147 = vmatpush1.bf16.msra.mxu1 %v9595_v29  ;;  %4879 = vmatprep.subr.bf16.mxu0 %v9600_v30  ;;  %v9664_v29 = vld [vmem:[%s13848_s1 + $0xff8] ss:$28 sps:$4 sm:$0xff]   ;;  %v9667_v30 = vld [vmem:[%s13848_s1 + $0xe08] ss:$28 sps:$4 sm:$0xff]  }
  0xfa   :  { %5148 = vmatprep.subr.bf16.mxu1 %v9603_v33  ;;  %v9672_v33 = vld [vmem:[%s13848_s1 + $0x1034] ss:$28 sps:$4 sm:$0xff]  }
  0xfb   :  { %v11507_v44 = vpop.f32.mrb[0].mxu1 }
  0xfc   :  { %4880 = vmatpush1.bf16.msra.mxu0 %v9598_v34  ;;  %v11515_v47 = vpop.f32.mrb[1].mxu1  ;;  %v9675_v34 = vld [vmem:[%s13848_s1 + $0xe44] ss:$28 sps:$4 sm:$0xff]  }
  0xfd   :  { %5149 = vmatpush1.bf16.msra.mxu1 %v9601_v35  ;;  %4881 = vmatprep.subr.bf16.mxu0 %v9606_v36  ;;  %v5012_v49 = vpop.f32.mrb[2].mxu1  ;;  %v9670_v35 = vld [vmem:[%s13848_s1 + $0x1030] ss:$28 sps:$4 sm:$0xff]   ;;  %v9673_v36 = vld [vmem:[%s13848_s1 + $0xe40] ss:$28 sps:$4 sm:$0xff]  }
  0xfe   :  { %5150 = vmatprep.subr.bf16.mxu1 %v9609_v39  ;;  %v5013_v52 = vpop.f32.mrb[3].mxu1  ;;  %v9678_v39 = vld [vmem:[%s13848_s1 + $0x106c] ss:$28 sps:$4 sm:$0xff]  }
  0xff   :  { %v9685_v49 = vld [vmem:[%s13848_s1 + $0xeb0] ss:$28 sps:$4 sm:$0xff]  }
 0x100   :  { %4882 = vmatpush1.bf16.msra.mxu0 %v9604_v40  ;;  %v9681_v40 = vld [vmem:[%s13848_s1 + $0xe7c] ss:$28 sps:$4 sm:$0xff]   ;;  %v9693_v52 = vld [vmem:[%s13848_s1 + $0xeec] ss:$28 sps:$4 sm:$0xff]  }
 0x101   :  { %5151 = vmatpush1.bf16.msra.mxu1 %v9607_v41  ;;  %4892 = vmatprep.subr.bf16.mxu0 %v9612_v45  ;;  %v9676_v41 = vld [vmem:[%s13848_s1 + $0x1068] ss:$28 sps:$4 sm:$0xff]  }
 0x102   :  { %5152 = vmatprep.subr.bf16.mxu1 %v9615_v46  ;;  %v9684_v45 = vld [vmem:[%s13848_s1 + $0x10a4] ss:$28 sps:$4 sm:$0xff]   ;;  %v9687_v46 = vld [vmem:[%s13848_s1 + $0xeb4] ss:$28 sps:$4 sm:$0xff]  }
 0x103   :  { %4884 = vmatmul.mubr.bf16.vlgmr.msra.gmra.mrb[0].mxu0 %v11520_v50 }
 0x104   :  { %4893 = vmatpush1.bf16.msra.mxu0 %v9610_v48  ;;  %4924 = vmatprep.mubr.bf16.mxu0 %v11534_v57  ;;  %v9682_v48 = vld [vmem:[%s13848_s1 + $0x10a0] ss:$28 sps:$4 sm:$0xff]  }
 0x105   :  { %5153 = vmatpush1.bf16.msra.mxu1 %v9613_v53  ;;  %4894 = vmatprep.subr.bf16.mxu0 %v9618_v55  ;;  %v9688_v53 = vld [vmem:[%s13848_s1 + $0x10d8] ss:$28 sps:$4 sm:$0xff]   ;;  %v9691_v55 = vld [vmem:[%s13848_s1 + $0xee8] ss:$28 sps:$4 sm:$0xff]  }
 0x106   :  { %5154 = vmatprep.subr.bf16.mxu1 %v9621_v56  ;;  %v9696_v56 = vld [vmem:[%s13848_s1 + $0x1114] ss:$28 sps:$4 sm:$0xff]  }
 0x108   :  { %4895 = vmatpush1.bf16.msra.mxu0 %v9616_v58  ;;  %v9699_v58 = vld [vmem:[%s13848_s1 + $0xf24] ss:$28 sps:$4 sm:$0xff]  }
 0x109   :  { %5155 = vmatpush1.bf16.msra.mxu1 %v9619_v59  ;;  %4896 = vmatprep.subr.bf16.mxu0 %v9624_v60  ;;  %v9694_v59 = vld [vmem:[%s13848_s1 + $0x1110] ss:$28 sps:$4 sm:$0xff]   ;;  %v9697_v60 = vld [vmem:[%s13848_s1 + $0xf20] ss:$28 sps:$4 sm:$0xff]  }
 0x10a   :  { %5156 = vmatprep.subr.bf16.mxu1 %v9627_v61  ;;  %v9702_v61 = vld [vmem:[%s13848_s1 + $0x114c] ss:$28 sps:$4 sm:$0xff]  }
 0x10c   :  { %4897 = vmatpush1.bf16.msra.mxu0 %v9622_v62  ;;  %v9705_v62 = vld [vmem:[%s13848_s1 + $0xf5c] ss:$28 sps:$4 sm:$0xff]  }
 0x10d   :  { %5157 = vmatpush1.bf16.msra.mxu1 %v9625_v63  ;;  %4898 = vmatprep.subr.bf16.mxu0 %v9630_v0  ;;  %v9700_v63 = vld [vmem:[%s13848_s1 + $0x1148] ss:$28 sps:$4 sm:$0xff]   ;;  %v9703_v0 = vld [vmem:[%s13848_s1 + $0xf58] ss:$28 sps:$4 sm:$0xff]  }
 0x10e   :  { %5158 = vmatprep.subr.bf16.mxu1 %v9633_v1  ;;  %v9708_v1 = vld [vmem:[%s13848_s1 + $0x1184] ss:$28 sps:$4 sm:$0xff]  }
 0x110   :  { %4899 = vmatpush1.bf16.msra.mxu0 %v9628_v2  ;;  %v47_v2 = vld [vmem:[%s13849_s0 + $0x40] sm:$0xff] }
 0x111   :  { %5159 = vmatpush1.bf16.msra.mxu1 %v9631_v3  ;;  %4900 = vmatprep.subr.bf16.mxu0 %v9636_v4  ;;  %v9711_v3 = vld [vmem:[%s13848_s1 + $0xf94] ss:$28 sps:$4 sm:$0xff]   ;;  %v50_v4 = vld [vmem:[%s13849_s0 + $0x58] sm:$0xff] }
 0x112   :  { %5160 = vmatprep.subr.bf16.mxu1 %v9639_v5  ;;  %v11726_v5 = vpack.c.bf16 %v47_v2, %v47_v2  ;;  %v9780_v2 = vld [vmem:[%s13848_s1 + $0x1424] ss:$28 sps:$4 sm:$0xff]  }
 0x114   :  { %4901 = vmatpush1.bf16.msra.mxu0 %v9634_v6  ;;  %v9706_v6 = vld [vmem:[%s13848_s1 + $0x1180] ss:$28 sps:$4 sm:$0xff]  }
 0x115   :  { %5161 = vmatpush1.bf16.msra.mxu1 %v9637_v7  ;;  %4902 = vmatprep.subr.bf16.mxu0 %v9642_v8  ;;  %v9709_v7 = vld [vmem:[%s13848_s1 + $0xf90] ss:$28 sps:$4 sm:$0xff]   ;;  %v9714_v8 = vld [vmem:[%s13848_s1 + $0x11bc] ss:$28 sps:$4 sm:$0xff]  }
 0x116   :  { %5162 = vmatprep.subr.bf16.mxu1 %v9645_v9  ;;  %v9717_v9 = vld [vmem:[%s13848_s1 + $0xfcc] ss:$28 sps:$4 sm:$0xff]  }
 0x118   :  { %4903 = vmatpush1.bf16.msra.mxu0 %v9640_v10  ;;  %v9712_v10 = vld [vmem:[%s13848_s1 + $0x11b8] ss:$28 sps:$4 sm:$0xff]  }
 0x119   :  { %5163 = vmatpush1.bf16.msra.mxu1 %v9643_v11  ;;  %4904 = vmatprep.subr.bf16.mxu0 %v9648_v13  ;;  %v11743_v11 = vpack.c.bf16 %v50_v4, %v50_v4  ;;  %v9715_v13 = vld [vmem:[%s13848_s1 + $0xfc8] ss:$28 sps:$4 sm:$0xff]   ;;  %v9778_v4 = vld [vmem:[%s13848_s1 + $0x1420] ss:$28 sps:$4 sm:$0xff]  }
 0x11a   :  { %5164 = vmatprep.subr.bf16.mxu1 %v9651_v14  ;;  %v9720_v14 = vld [vmem:[%s13848_s1 + $0x11f4] ss:$28 sps:$4 sm:$0xff]  }
 0x11c   :  { %4905 = vmatpush1.bf16.msra.mxu0 %v9646_v15  ;;  %v9723_v15 = vld [vmem:[%s13848_s1 + $0x1004] ss:$28 sps:$4 sm:$0xff]  }
 0x11d   :  { %5165 = vmatpush1.bf16.msra.mxu1 %v9649_v16  ;;  %4906 = vmatprep.subr.bf16.mxu0 %v9654_v17  ;;  %v9718_v16 = vld [vmem:[%s13848_s1 + $0x11f0] ss:$28 sps:$4 sm:$0xff]   ;;  %v9721_v17 = vld [vmem:[%s13848_s1 + $0x1000] ss:$28 sps:$4 sm:$0xff]  }
 0x11e   :  { %5166 = vmatprep.subr.bf16.mxu1 %v9657_v18  ;;  %v9726_v18 = vld [vmem:[%s13848_s1 + $0x122c] ss:$28 sps:$4 sm:$0xff]  }
 0x120   :  { %4907 = vmatpush1.bf16.msra.mxu0 %v9652_v19  ;;  %v9729_v19 = vld [vmem:[%s13848_s1 + $0x103c] ss:$28 sps:$4 sm:$0xff]  }
 0x121   :  { %5167 = vmatpush1.bf16.msra.mxu1 %v9655_v20  ;;  %4908 = vmatprep.subr.bf16.mxu0 %v9660_v22  ;;  %v9724_v20 = vld [vmem:[%s13848_s1 + $0x1228] ss:$28 sps:$4 sm:$0xff]   ;;  %v9727_v22 = vld [vmem:[%s13848_s1 + $0x1038] ss:$28 sps:$4 sm:$0xff]  }
 0x122   :  { %5168 = vmatprep.subr.bf16.mxu1 %v9663_v23  ;;  %v9732_v23 = vld [vmem:[%s13848_s1 + $0x1264] ss:$28 sps:$4 sm:$0xff]  }
 0x124   :  { %4909 = vmatpush1.bf16.msra.mxu0 %v9658_v24  ;;  %v9735_v24 = vld [vmem:[%s13848_s1 + $0x1074] ss:$28 sps:$4 sm:$0xff]  }
 0x125   :  { %5169 = vmatpush1.bf16.msra.mxu1 %v9661_v26  ;;  %4910 = vmatprep.subr.bf16.mxu0 %v9666_v27  ;;  %v9730_v26 = vld [vmem:[%s13848_s1 + $0x1260] ss:$28 sps:$4 sm:$0xff]   ;;  %v9733_v27 = vld [vmem:[%s13848_s1 + $0x1070] ss:$28 sps:$4 sm:$0xff]  }
 0x126   :  { %5179 = vmatprep.subr.bf16.mxu1 %v9669_v28  ;;  %v9738_v28 = vld [vmem:[%s13848_s1 + $0x129c] ss:$28 sps:$4 sm:$0xff]  }
 0x128   :  { %5171 = vmatmul.mubr.bf16.vlgmr.msra.gmra.mrb[4].mxu1 %v11520_v50  ;;  %4911 = vmatpush1.bf16.msra.mxu0 %v9664_v29  ;;  %v9741_v29 = vld [vmem:[%s13848_s1 + $0x10ac] ss:$28 sps:$4 sm:$0xff]  }
 0x129   :  { %5180 = vmatpush1.bf16.msra.mxu1 %v9667_v30  ;;  %4912 = vmatprep.subr.bf16.mxu0 %v9672_v33  ;;  %v9736_v30 = vld [vmem:[%s13848_s1 + $0x1298] ss:$28 sps:$4 sm:$0xff]   ;;  %v9739_v33 = vld [vmem:[%s13848_s1 + $0x10a8] ss:$28 sps:$4 sm:$0xff]  }
 0x12a   :  { %5181 = vmatprep.subr.bf16.mxu1 %v9675_v34  ;;  %5211 = vmatprep.mubr.bf16.mxu1 %v11534_v57  ;;  %v9744_v34 = vld [vmem:[%s13848_s1 + $0x12d4] ss:$28 sps:$4 sm:$0xff]  }
 0x12c   :  { %4913 = vmatpush1.bf16.msra.mxu0 %v9670_v35  ;;  %v9747_v35 = vld [vmem:[%s13848_s1 + $0x10e4] ss:$28 sps:$4 sm:$0xff]  }
 0x12d   :  { %5182 = vmatpush1.bf16.msra.mxu1 %v9673_v36  ;;  %4914 = vmatprep.subr.bf16.mxu0 %v9678_v39  ;;  %v9742_v36 = vld [vmem:[%s13848_s1 + $0x12d0] ss:$28 sps:$4 sm:$0xff]   ;;  %v9745_v39 = vld [vmem:[%s13848_s1 + $0x10e0] ss:$28 sps:$4 sm:$0xff]  }
 0x12e   :  { %5183 = vmatprep.subr.bf16.mxu1 %v9681_v40  ;;  %v9750_v40 = vld [vmem:[%s13848_s1 + $0x130c] ss:$28 sps:$4 sm:$0xff]  }
 0x130   :  { %4915 = vmatpush1.bf16.msra.mxu0 %v9676_v41  ;;  %v9753_v41 = vld [vmem:[%s13848_s1 + $0x111c] ss:$28 sps:$4 sm:$0xff]  }
 0x131   :  { %5184 = vmatpush1.bf16.msra.mxu1 %v9679_v42  ;;  %4916 = vmatprep.subr.bf16.mxu0 %v9684_v45  ;;  %v9748_v42 = vld [vmem:[%s13848_s1 + $0x1308] ss:$28 sps:$4 sm:$0xff]   ;;  %v9751_v45 = vld [vmem:[%s13848_s1 + $0x1118] ss:$28 sps:$4 sm:$0xff]  }
 0x132   :  { %5185 = vmatprep.subr.bf16.mxu1 %v9687_v46  ;;  %v9756_v46 = vld [vmem:[%s13848_s1 + $0x1344] ss:$28 sps:$4 sm:$0xff]  }
 0x134   :  { %4917 = vmatpush1.bf16.msra.mxu0 %v9682_v48  ;;  %v9759_v48 = vld [vmem:[%s13848_s1 + $0x1154] ss:$28 sps:$4 sm:$0xff]  }
 0x135   :  { %5186 = vmatpush1.bf16.msra.mxu1 %v9685_v49  ;;  %4918 = vmatprep.subr.bf16.mxu0 %v9690_v51  ;;  %v9754_v49 = vld [vmem:[%s13848_s1 + $0x1340] ss:$28 sps:$4 sm:$0xff]   ;;  %v9757_v51 = vld [vmem:[%s13848_s1 + $0x1150] ss:$28 sps:$4 sm:$0xff]  }
 0x136   :  { %5187 = vmatprep.subr.bf16.mxu1 %v9693_v52  ;;  %v9762_v52 = vld [vmem:[%s13848_s1 + $0x137c] ss:$28 sps:$4 sm:$0xff]  }
 0x138   :  { %4919 = vmatpush1.bf16.msra.mxu0 %v9688_v53  ;;  %v9765_v53 = vld [vmem:[%s13848_s1 + $0x118c] ss:$28 sps:$4 sm:$0xff]  }
 0x139   :  { %5188 = vmatpush1.bf16.msra.mxu1 %v9691_v55  ;;  %4920 = vmatprep.subr.bf16.mxu0 %v9696_v56  ;;  %v9760_v55 = vld [vmem:[%s13848_s1 + $0x1378] ss:$28 sps:$4 sm:$0xff]   ;;  %v9763_v56 = vld [vmem:[%s13848_s1 + $0x1188] ss:$28 sps:$4 sm:$0xff]  }
 0x13a   :  { %5189 = vmatprep.subr.bf16.mxu1 %v9699_v58  ;;  %v9768_v58 = vld [vmem:[%s13848_s1 + $0x13b4] ss:$28 sps:$4 sm:$0xff]  }
 0x13c   :  { %4921 = vmatpush1.bf16.msra.mxu0 %v9694_v59  ;;  %v9771_v59 = vld [vmem:[%s13848_s1 + $0x11c4] ss:$28 sps:$4 sm:$0xff]  }
 0x13d   :  { %5190 = vmatpush1.bf16.msra.mxu1 %v9697_v60  ;;  %4922 = vmatprep.subr.bf16.mxu0 %v9702_v61  ;;  %v9766_v60 = vld [vmem:[%s13848_s1 + $0x13b0] ss:$28 sps:$4 sm:$0xff]   ;;  %v9769_v61 = vld [vmem:[%s13848_s1 + $0x11c0] ss:$28 sps:$4 sm:$0xff]  }
 0x13e   :  { %5191 = vmatprep.subr.bf16.mxu1 %v9705_v62  ;;  %v9774_v62 = vld [vmem:[%s13848_s1 + $0x13ec] ss:$28 sps:$4 sm:$0xff]  }
 0x140   :  { %4923 = vmatpush1.bf16.msra.mxu0 %v9700_v63  ;;  %v9777_v63 = vld [vmem:[%s13848_s1 + $0x11fc] ss:$28 sps:$4 sm:$0xff]  }
 0x141   :  { %5192 = vmatpush1.bf16.msra.mxu1 %v9703_v0  ;;  %4933 = vmatprep.subr.bf16.mxu0 %v9708_v1  ;;  %v9772_v0 = vld [vmem:[%s13848_s1 + $0x13e8] ss:$28 sps:$4 sm:$0xff]   ;;  %v9775_v1 = vld [vmem:[%s13848_s1 + $0x11f8] ss:$28 sps:$4 sm:$0xff]  }
 0x142   :  { %5193 = vmatprep.subr.bf16.mxu1 %v9711_v3  ;;  %v9783_v3 = vld [vmem:[%s13848_s1 + $0x1234] ss:$28 sps:$4 sm:$0xff]  }
 0x143   :  { %4925 = vmatmul.mubr.bf16.vlgmr.msra.gmra.mrb[0].mxu0 %v11726_v5 }
 0x144   :  { %4934 = vmatpush1.bf16.msra.mxu0 %v9706_v6  ;;  %4965 = vmatprep.mubr.bf16.mxu0 %v11743_v11  ;;  %v9781_v6 = vld [vmem:[%s13848_s1 + $0x1230] ss:$28 sps:$4 sm:$0xff]  }
 0x145   :  { %5194 = vmatpush1.bf16.msra.mxu1 %v9709_v7  ;;  %4935 = vmatprep.subr.bf16.mxu0 %v9714_v8  ;;  %v9786_v7 = vld [vmem:[%s13848_s1 + $0x145c] ss:$28 sps:$4 sm:$0xff]   ;;  %v9789_v8 = vld [vmem:[%s13848_s1 + $0x126c] ss:$28 sps:$4 sm:$0xff]  }
 0x146   :  { %5195 = vmatprep.subr.bf16.mxu1 %v9717_v9  ;;  %v9784_v9 = vld [vmem:[%s13848_s1 + $0x1458] ss:$28 sps:$4 sm:$0xff]  }
 0x148   :  { %4936 = vmatpush1.bf16.msra.mxu0 %v9712_v10  ;;  %v9787_v10 = vld [vmem:[%s13848_s1 + $0x1268] ss:$28 sps:$4 sm:$0xff]  }
 0x149   :  { %5196 = vmatpush1.bf16.msra.mxu1 %v9715_v13  ;;  %4937 = vmatprep.subr.bf16.mxu0 %v9720_v14  ;;  %v9792_v13 = vld [vmem:[%s13848_s1 + $0x1494] ss:$28 sps:$4 sm:$0xff]   ;;  %v9795_v14 = vld [vmem:[%s13848_s1 + $0x12a4] ss:$28 sps:$4 sm:$0xff]  }
 0x14a   :  { %5197 = vmatprep.subr.bf16.mxu1 %v9723_v15  ;;  %v9790_v15 = vld [vmem:[%s13848_s1 + $0x1490] ss:$28 sps:$4 sm:$0xff]  }
 0x14c   :  { %4938 = vmatpush1.bf16.msra.mxu0 %v9718_v16  ;;  %v9793_v16 = vld [vmem:[%s13848_s1 + $0x12a0] ss:$28 sps:$4 sm:$0xff]  }
 0x14d   :  { %5198 = vmatpush1.bf16.msra.mxu1 %v9721_v17  ;;  %4939 = vmatprep.subr.bf16.mxu0 %v9726_v18  ;;  %v9798_v17 = vld [vmem:[%s13848_s1 + $0x14cc] ss:$28 sps:$4 sm:$0xff]   ;;  %v9801_v18 = vld [vmem:[%s13848_s1 + $0x12dc] ss:$28 sps:$4 sm:$0xff]  }
 0x14e   :  { %5199 = vmatprep.subr.bf16.mxu1 %v9729_v19  ;;  %v9796_v19 = vld [vmem:[%s13848_s1 + $0x14c8] ss:$28 sps:$4 sm:$0xff]  }
 0x150   :  { %4940 = vmatpush1.bf16.msra.mxu0 %v9724_v20  ;;  %v9799_v20 = vld [vmem:[%s13848_s1 + $0x12d8] ss:$28 sps:$4 sm:$0xff]  }
 0x151   :  { %5200 = vmatpush1.bf16.msra.mxu1 %v9727_v22  ;;  %4941 = vmatprep.subr.bf16.mxu0 %v9732_v23  ;;  %v49_v22 = vld [vmem:[%s13849_s0 + $0x50] sm:$0xff] }
 0x152   :  { %5201 = vmatprep.subr.bf16.mxu1 %v9735_v24  ;;  %v9804_v23 = vld [vmem:[%s13848_s1 + $0x1314] ss:$28 sps:$4 sm:$0xff]  }
 0x153   :  { %v9807_v24 = vld [vmem:[%s13848_s1 + $0x14] ss:$28 sps:$4 sm:$0xff]  }
 0x154   :  { %4942 = vmatpush1.bf16.msra.mxu0 %v9730_v26  ;;  %v9802_v26 = vld [vmem:[%s13848_s1 + $0x1310] ss:$28 sps:$4 sm:$0xff]  }
 0x155   :  { %5202 = vmatpush1.bf16.msra.mxu1 %v9733_v27  ;;  %4943 = vmatprep.subr.bf16.mxu0 %v9738_v28  ;;  %v11932_v27 = vpack.c.bf16 %v49_v22, %v49_v22  ;;  %v9805_v28 = vld [vmem:[%s13848_s1 + $0x10] ss:$28 sps:$4 sm:$0xff]   ;;  %v9871_v22 = vld [vmem:[%s13848_s1 + $0x278] ss:$28 sps:$4 sm:$0xff]  }
 0x156   :  { %5203 = vmatprep.subr.bf16.mxu1 %v9741_v29  ;;  %v9810_v29 = vld [vmem:[%s13848_s1 + $0x134c] ss:$28 sps:$4 sm:$0xff]  }
 0x158   :  { %4944 = vmatpush1.bf16.msra.mxu0 %v9736_v30  ;;  %v9813_v30 = vld [vmem:[%s13848_s1 + $0x4c] ss:$28 sps:$4 sm:$0xff]  }
 0x159   :  { %5204 = vmatpush1.bf16.msra.mxu1 %v9739_v33  ;;  %4945 = vmatprep.subr.bf16.mxu0 %v9744_v34  ;;  %v9808_v33 = vld [vmem:[%s13848_s1 + $0x1348] ss:$28 sps:$4 sm:$0xff]  }
 0x15a   :  { %5205 = vmatprep.subr.bf16.mxu1 %v9747_v35  ;;  %v9811_v34 = vld [vmem:[%s13848_s1 + $0x48] ss:$28 sps:$4 sm:$0xff]  }
 0x15b   :  { %v9816_v35 = vld [vmem:[%s13848_s1 + $0x1384] ss:$28 sps:$4 sm:$0xff]  }
 0x15c   :  { %4946 = vmatpush1.bf16.msra.mxu0 %v9742_v36  ;;  %v9819_v36 = vld [vmem:[%s13848_s1 + $0x84] ss:$28 sps:$4 sm:$0xff]  }
 0x15d   :  { %5206 = vmatpush1.bf16.msra.mxu1 %v9745_v39  ;;  %4947 = vmatprep.subr.bf16.mxu0 %v9750_v40  ;;  %v9814_v39 = vld [vmem:[%s13848_s1 + $0x1380] ss:$28 sps:$4 sm:$0xff]  }
 0x15e   :  { %5207 = vmatprep.subr.bf16.mxu1 %v9753_v41  ;;  %v9817_v40 = vld [vmem:[%s13848_s1 + $0x80] ss:$28 sps:$4 sm:$0xff]  }
 0x15f   :  { %v9822_v41 = vld [vmem:[%s13848_s1 + $0x13bc] ss:$28 sps:$4 sm:$0xff]  }
 0x160   :  { %4948 = vmatpush1.bf16.msra.mxu0 %v9748_v42  ;;  %v9825_v42 = vld [vmem:[%s13848_s1 + $0xbc] ss:$28 sps:$4 sm:$0xff]  }
 0x161   :  { %5208 = vmatpush1.bf16.msra.mxu1 %v9751_v45  ;;  %4949 = vmatprep.subr.bf16.mxu0 %v9756_v46  ;;  %v9820_v45 = vld [vmem:[%s13848_s1 + $0x13b8] ss:$28 sps:$4 sm:$0xff]  }
 0x162   :  { %5209 = vmatprep.subr.bf16.mxu1 %v9759_v48  ;;  %v9823_v46 = vld [vmem:[%s13848_s1 + $0xb8] ss:$28 sps:$4 sm:$0xff]  }
 0x163   :  { %v9828_v48 = vld [vmem:[%s13848_s1 + $0x13f4] ss:$28 sps:$4 sm:$0xff]  }
 0x164   :  { %4950 = vmatpush1.bf16.msra.mxu0 %v9754_v49  ;;  %v9831_v49 = vld [vmem:[%s13848_s1 + $0xf4] ss:$28 sps:$4 sm:$0xff]  }
 0x165   :  { %5210 = vmatpush1.bf16.msra.mxu1 %v9757_v51  ;;  %4951 = vmatprep.subr.bf16.mxu0 %v9762_v52  ;;  %v9826_v51 = vld [vmem:[%s13848_s1 + $0x13f0] ss:$28 sps:$4 sm:$0xff]  }
 0x166   :  { %5220 = vmatprep.subr.bf16.mxu1 %v9765_v53  ;;  %v9829_v52 = vld [vmem:[%s13848_s1 + $0xf0] ss:$28 sps:$4 sm:$0xff]  }
 0x167   :  { %v9834_v53 = vld [vmem:[%s13848_s1 + $0x142c] ss:$28 sps:$4 sm:$0xff]  }
 0x168   :  { %5212 = vmatmul.mubr.bf16.vlgmr.msra.gmra.mrb[4].mxu1 %v11726_v5  ;;  %4952 = vmatpush1.bf16.msra.mxu0 %v9760_v55  ;;  %v9837_v55 = vld [vmem:[%s13848_s1 + $0x12c] ss:$28 sps:$4 sm:$0xff]  }
 0x169   :  { %5221 = vmatpush1.bf16.msra.mxu1 %v9763_v56  ;;  %4953 = vmatprep.subr.bf16.mxu0 %v9768_v58  ;;  %v9832_v56 = vld [vmem:[%s13848_s1 + $0x1428] ss:$28 sps:$4 sm:$0xff]  }
 0x16a   :  { %5222 = vmatprep.subr.bf16.mxu1 %v9771_v59  ;;  %5252 = vmatprep.mubr.bf16.mxu1 %v11743_v11  ;;  %v9835_v58 = vld [vmem:[%s13848_s1 + $0x128] ss:$28 sps:$4 sm:$0xff]  }
 0x16b   :  { %v9840_v59 = vld [vmem:[%s13848_s1 + $0x1464] ss:$28 sps:$4 sm:$0xff]  }
 0x16c   :  { %4954 = vmatpush1.bf16.msra.mxu0 %v9766_v60  ;;  %v9843_v60 = vld [vmem:[%s13848_s1 + $0x164] ss:$28 sps:$4 sm:$0xff]  }
 0x16d   :  { %5223 = vmatpush1.bf16.msra.mxu1 %v9769_v61  ;;  %4955 = vmatprep.subr.bf16.mxu0 %v9774_v62  ;;  %v9838_v61 = vld [vmem:[%s13848_s1 + $0x1460] ss:$28 sps:$4 sm:$0xff]  }
 0x16e   :  { %5224 = vmatprep.subr.bf16.mxu1 %v9777_v63  ;;  %v9841_v62 = vld [vmem:[%s13848_s1 + $0x160] ss:$28 sps:$4 sm:$0xff]  }
 0x16f   :  { %v9846_v63 = vld [vmem:[%s13848_s1 + $0x149c] ss:$28 sps:$4 sm:$0xff]  }
 0x170   :  { %4956 = vmatpush1.bf16.msra.mxu0 %v9772_v0  ;;  %v9849_v0 = vld [vmem:[%s13848_s1 + $0x19c] ss:$28 sps:$4 sm:$0xff]  }
 0x171   :  { %5225 = vmatpush1.bf16.msra.mxu1 %v9775_v1  ;;  %4957 = vmatprep.subr.bf16.mxu0 %v9780_v2  ;;  %v9844_v1 = vld [vmem:[%s13848_s1 + $0x1498] ss:$28 sps:$4 sm:$0xff]  }
 0x172   :  { %5226 = vmatprep.subr.bf16.mxu1 %v9783_v3  ;;  %v9847_v2 = vld [vmem:[%s13848_s1 + $0x198] ss:$28 sps:$4 sm:$0xff]  }
 0x173   :  { %v9852_v3 = vld [vmem:[%s13848_s1 + $0x14d4] ss:$28 sps:$4 sm:$0xff]  }
 0x174   :  { %4958 = vmatpush1.bf16.msra.mxu0 %v9778_v4  ;;  %v9855_v4 = vld [vmem:[%s13848_s1 + $0x1d4] ss:$28 sps:$4 sm:$0xff]  }
 0x175   :  { %5227 = vmatpush1.bf16.msra.mxu1 %v9781_v6  ;;  %4959 = vmatprep.subr.bf16.mxu0 %v9786_v7  ;;  %v9850_v6 = vld [vmem:[%s13848_s1 + $0x14d0] ss:$28 sps:$4 sm:$0xff]  }
 0x176   :  { %5228 = vmatprep.subr.bf16.mxu1 %v9789_v8  ;;  %v9853_v7 = vld [vmem:[%s13848_s1 + $0x1d0] ss:$28 sps:$4 sm:$0xff]  }
 0x177   :  { %v9858_v8 = vld [vmem:[%s13848_s1 + $0x150c] ss:$28 sps:$4 sm:$0xff]  }
 0x178   :  { %4960 = vmatpush1.bf16.msra.mxu0 %v9784_v9  ;;  %v9861_v9 = vld [vmem:[%s13848_s1 + $0x20c] ss:$28 sps:$4 sm:$0xff]  }
 0x179   :  { %5229 = vmatpush1.bf16.msra.mxu1 %v9787_v10  ;;  %4961 = vmatprep.subr.bf16.mxu0 %v9792_v13  ;;  %v9856_v10 = vld [vmem:[%s13848_s1 + $0x1508] ss:$28 sps:$4 sm:$0xff]  }
 0x17a   :  { %5230 = vmatprep.subr.bf16.mxu1 %v9795_v14  ;;  %v9859_v13 = vld [vmem:[%s13848_s1 + $0x208] ss:$28 sps:$4 sm:$0xff]  }
 0x17b   :  { %v9864_v14 = vld [vmem:[%s13848_s1 + $0x1544] ss:$28 sps:$4 sm:$0xff]  }
 0x17c   :  { %4962 = vmatpush1.bf16.msra.mxu0 %v9790_v15  ;;  %v9867_v15 = vld [vmem:[%s13848_s1 + $0x244] ss:$28 sps:$4 sm:$0xff]  }
 0x17d   :  { %5231 = vmatpush1.bf16.msra.mxu1 %v9793_v16  ;;  %4963 = vmatprep.subr.bf16.mxu0 %v9798_v17  ;;  %v9862_v16 = vld [vmem:[%s13848_s1 + $0x1540] ss:$28 sps:$4 sm:$0xff]  }
 0x17e   :  { %5232 = vmatprep.subr.bf16.mxu1 %v9801_v18  ;;  %v9865_v17 = vld [vmem:[%s13848_s1 + $0x240] ss:$28 sps:$4 sm:$0xff]  }
 0x17f   :  { %v9870_v18 = vld [vmem:[%s13848_s1 + $0x157c] ss:$28 sps:$4 sm:$0xff]  }
 0x180   :  { %4964 = vmatpush1.bf16.msra.mxu0 %v9796_v19  ;;  %v9873_v19 = vld [vmem:[%s13848_s1 + $0x27c] ss:$28 sps:$4 sm:$0xff]  }
 0x181   :  { %5233 = vmatpush1.bf16.msra.mxu1 %v9799_v20  ;;  %5302 = vmatprep.subr.bf16.mxu0 %v9807_v24  ;;  %v9868_v20 = vld [vmem:[%s13848_s1 + $0x1578] ss:$28 sps:$4 sm:$0xff]  }
 0x182   :  { %5234 = vmatprep.subr.bf16.mxu1 %v9804_v23  ;;  %v9876_v23 = vld [vmem:[%s13848_s1 + $0x15b4] ss:$28 sps:$4 sm:$0xff]  }
 0x183   :  { %4966 = vmatmul.mubr.bf16.vlgmr.msra.gmra.mrb[0].mxu0 %v11932_v27  ;;  %v9879_v24 = vld [vmem:[%s13848_s1 + $0x2b4] ss:$28 sps:$4 sm:$0xff]  }
 0x184   :  { %5303 = vmatpush1.bf16.msra.mxu0 %v9805_v28  ;;  %5334 = vmatprep.mubr.bf16.mxu0 %v10831_v54  ;;  %v9877_v28 = vld [vmem:[%s13848_s1 + $0x2b0] ss:$28 sps:$4 sm:$0xff]  }
 0x185   :  { %5235 = vmatpush1.bf16.msra.mxu1 %v9802_v26  ;;  %5304 = vmatprep.subr.bf16.mxu0 %v9813_v30  ;;  %v9874_v26 = vld [vmem:[%s13848_s1 + $0x15b0] ss:$28 sps:$4 sm:$0xff]  }
 0x186   :  { %5236 = vmatprep.subr.bf16.mxu1 %v9810_v29  ;;  %v9882_v29 = vld [vmem:[%s13848_s1 + $0x15ec] ss:$28 sps:$4 sm:$0xff]  }
 0x187   :  { %v9885_v30 = vld [vmem:[%s13848_s1 + $0x2ec] ss:$28 sps:$4 sm:$0xff]  }
 0x188   :  { %5305 = vmatpush1.bf16.msra.mxu0 %v9811_v34  ;;  %v9883_v34 = vld [vmem:[%s13848_s1 + $0x2e8] ss:$28 sps:$4 sm:$0xff]  }
 0x189   :  { %5237 = vmatpush1.bf16.msra.mxu1 %v9808_v33  ;;  %5306 = vmatprep.subr.bf16.mxu0 %v9819_v36  ;;  %v9880_v33 = vld [vmem:[%s13848_s1 + $0x15e8] ss:$28 sps:$4 sm:$0xff]  }
 0x18a   :  { %5238 = vmatprep.subr.bf16.mxu1 %v9816_v35  ;;  %v9888_v35 = vld [vmem:[%s13848_s1 + $0x1624] ss:$28 sps:$4 sm:$0xff]  }
 0x18b   :  { %v9891_v36 = vld [vmem:[%s13848_s1 + $0x324] ss:$28 sps:$4 sm:$0xff]  }
 0x18c   :  { %5307 = vmatpush1.bf16.msra.mxu0 %v9817_v40  ;;  %v9889_v40 = vld [vmem:[%s13848_s1 + $0x320] ss:$28 sps:$4 sm:$0xff]  }
 0x18d   :  { %5239 = vmatpush1.bf16.msra.mxu1 %v9814_v39  ;;  %5308 = vmatprep.subr.bf16.mxu0 %v9825_v42  ;;  %v9886_v39 = vld [vmem:[%s13848_s1 + $0x1620] ss:$28 sps:$4 sm:$0xff]  }
 0x18e   :  { %5240 = vmatprep.subr.bf16.mxu1 %v9822_v41  ;;  %v9894_v41 = vld [vmem:[%s13848_s1 + $0x165c] ss:$28 sps:$4 sm:$0xff]  }
 0x18f   :  { %v9897_v42 = vld [vmem:[%s13848_s1 + $0x35c] ss:$28 sps:$4 sm:$0xff]  }
 0x190   :  { %5309 = vmatpush1.bf16.msra.mxu0 %v9823_v46  ;;  %v9895_v46 = vld [vmem:[%s13848_s1 + $0x358] ss:$28 sps:$4 sm:$0xff]  }
 0x191   :  { %5241 = vmatpush1.bf16.msra.mxu1 %v9820_v45  ;;  %5310 = vmatprep.subr.bf16.mxu0 %v9831_v49  ;;  %v9892_v45 = vld [vmem:[%s13848_s1 + $0x1658] ss:$28 sps:$4 sm:$0xff]  }
 0x192   :  { %5242 = vmatprep.subr.bf16.mxu1 %v9828_v48  ;;  %v9900_v48 = vld [vmem:[%s13848_s1 + $0x1694] ss:$28 sps:$4 sm:$0xff]  }
 0x193   :  { %v9903_v49 = vld [vmem:[%s13848_s1 + $0x394] ss:$28 sps:$4 sm:$0xff]  }
 0x194   :  { %5311 = vmatpush1.bf16.msra.mxu0 %v9829_v52  ;;  %v9898_v52 = vld [vmem:[%s13848_s1 + $0x1690] ss:$28 sps:$4 sm:$0xff]  }
 0x195   :  { %5243 = vmatpush1.bf16.msra.mxu1 %v9826_v51  ;;  %5312 = vmatprep.subr.bf16.mxu0 %v9837_v55  ;;  %v900_v51 = vld [vmem:[%s13848_s1 + $0x16c8] sm:$0x33] }
 0x196   :  { %5244 = vmatprep.subr.bf16.mxu1 %v9834_v53  ;;  %v9901_v53 = vld [vmem:[%s13848_s1 + $0x390] ss:$28 sps:$4 sm:$0xff]   ;;  %v8682_v55 = vcombine.high %v900_v51, %v900_v51 }
 0x198   :  { %5313 = vmatpush1.bf16.msra.mxu0 %v9835_v58  ;;  %v8681_v58 = vcombine.low %v900_v51, %v900_v51  ;;  %v9959_v51 = vld [vmem:[%s13848_s1 + $0x630] ss:$28 sps:$4 sm:$0xff]  }
 0x199   :  { %5245 = vmatpush1.bf16.msra.mxu1 %v9832_v56  ;;  %5314 = vmatprep.subr.bf16.mxu0 %v9843_v60  ;;  %v9907_v56 = vld [vmem:[%s13848_s1 + $0x3cc] ss:$28 sps:$4 sm:$0xff]   ;;  %v9911_v60 = vld [vmem:[%s13848_s1 + $0x404] ss:$28 sps:$4 sm:$0xff]  }
 0x19a   :  { %5246 = vmatprep.subr.bf16.mxu1 %v9840_v59  ;;  %v9905_v59 = vld [vmem:[%s13848_s1 + $0x3c8] ss:$28 sps:$4 sm:$0xff]  }
 0x19c   :  { %5315 = vmatpush1.bf16.msra.mxu0 %v9841_v62  ;;  %v9912_v62 = vld [vmem:[%s13848_s1 + $0x1d8] ss:$28 sps:$4 sm:$0xff]  }
 0x19d   :  { %5247 = vmatpush1.bf16.msra.mxu1 %v9838_v61  ;;  %5316 = vmatprep.subr.bf16.mxu0 %v9849_v0  ;;  %v4714_v61 = vsel %vm4706_vm1, %v8681_v58, 0  ;;  %v9913_v0 = vld [vmem:[%s13848_s1 + $0x18] ss:$28 sps:$4 sm:$0xff]   ;;  %v9971_v58 = vld [vmem:[%s13848_s1 + $0x6a4] ss:$28 sps:$4 sm:$0xff]  }
 0x19e   :  { %5248 = vmatprep.subr.bf16.mxu1 %v9846_v63  ;;  %v9909_v63 = vld [vmem:[%s13848_s1 + $0x400] ss:$28 sps:$4 sm:$0xff]  }
 0x1a0   :  { %5317 = vmatpush1.bf16.msra.mxu0 %v9847_v2  ;;  %v9917_v2 = vld [vmem:[%s13848_s1 + $0x210] ss:$28 sps:$4 sm:$0xff]  }
 0x1a1   :  { %5249 = vmatpush1.bf16.msra.mxu1 %v9844_v1  ;;  %5318 = vmatprep.subr.bf16.mxu0 %v9855_v4  ;;  %v9916_v1 = vld [vmem:[%s13848_s1 + $0x43c] ss:$28 sps:$4 sm:$0xff]   ;;  %v9918_v4 = vld [vmem:[%s13848_s1 + $0x50] ss:$28 sps:$4 sm:$0xff]  }
 0x1a2   :  { %5250 = vmatprep.subr.bf16.mxu1 %v9852_v3  ;;  %v9914_v3 = vld [vmem:[%s13848_s1 + $0x438] ss:$28 sps:$4 sm:$0xff]  }
 0x1a4   :  { %5319 = vmatpush1.bf16.msra.mxu0 %v9853_v7  ;;  %v9922_v7 = vld [vmem:[%s13848_s1 + $0x248] ss:$28 sps:$4 sm:$0xff]  }
 0x1a5   :  { %5251 = vmatpush1.bf16.msra.mxu1 %v9850_v6  ;;  %5320 = vmatprep.subr.bf16.mxu0 %v9861_v9  ;;  %v9921_v6 = vld [vmem:[%s13848_s1 + $0x474] ss:$28 sps:$4 sm:$0xff]   ;;  %v9923_v9 = vld [vmem:[%s13848_s1 + $0x88] ss:$28 sps:$4 sm:$0xff]  }
 0x1a6   :  { %5261 = vmatprep.subr.bf16.mxu1 %v9858_v8  ;;  %v9919_v8 = vld [vmem:[%s13848_s1 + $0x470] ss:$28 sps:$4 sm:$0xff]  }
 0x1a8   :  { %5253 = vmatmul.mubr.bf16.vlgmr.msra.gmra.mrb[4].mxu1 %v11932_v27  ;;  %5321 = vmatpush1.bf16.msra.mxu0 %v9859_v13  ;;  %v9927_v13 = vld [vmem:[%s13848_s1 + $0x280] ss:$28 sps:$4 sm:$0xff]  }
 0x1a9   :  { %5262 = vmatpush1.bf16.msra.mxu1 %v9856_v10  ;;  %5322 = vmatprep.subr.bf16.mxu0 %v9867_v15  ;;  %v9926_v10 = vld [vmem:[%s13848_s1 + $0x4ac] ss:$28 sps:$4 sm:$0xff]   ;;  %v9931_v15 = vld [vmem:[%s13848_s1 + $0x4e4] ss:$28 sps:$4 sm:$0xff]  }
 0x1aa   :  { %5263 = vmatprep.subr.bf16.mxu1 %v9864_v14  ;;  %8689 = vmatprep.mubr.msk.bf16.mxu1 %vm4702_vm0, %v10768_v31  ;;  %v9928_v14 = vld [vmem:[%s13848_s1 + $0xc0] ss:$28 sps:$4 sm:$0xff]  }
 0x1ac   :  { %5323 = vmatpush1.bf16.msra.mxu0 %v9865_v17  ;;  %v9929_v17 = vld [vmem:[%s13848_s1 + $0x4e0] ss:$28 sps:$4 sm:$0xff]  }
 0x1ad   :  { %5264 = vmatpush1.bf16.msra.mxu1 %v9862_v16  ;;  %5324 = vmatprep.subr.bf16.mxu0 %v9873_v19  ;;  %v9932_v16 = vld [vmem:[%s13848_s1 + $0x2b8] ss:$28 sps:$4 sm:$0xff]  }
 0x1ae   :  { %5265 = vmatprep.subr.bf16.mxu1 %v9870_v18  ;;  %v9933_v18 = vld [vmem:[%s13848_s1 + $0xf8] ss:$28 sps:$4 sm:$0xff]  }
 0x1af   :  { %v9936_v19 = vld [vmem:[%s13848_s1 + $0x51c] ss:$28 sps:$4 sm:$0xff]  }
 0x1b0   :  { %5325 = vmatpush1.bf16.msra.mxu0 %v9871_v22  ;;  %v9934_v22 = vld [vmem:[%s13848_s1 + $0x518] ss:$28 sps:$4 sm:$0xff]  }
 0x1b1   :  { %5266 = vmatpush1.bf16.msra.mxu1 %v9868_v20  ;;  %5326 = vmatprep.subr.bf16.mxu0 %v9879_v24  ;;  %v9937_v20 = vld [vmem:[%s13848_s1 + $0x2f0] ss:$28 sps:$4 sm:$0xff]  }
 0x1b2   :  { %5267 = vmatprep.subr.bf16.mxu1 %v9876_v23  ;;  %v9938_v23 = vld [vmem:[%s13848_s1 + $0x130] ss:$28 sps:$4 sm:$0xff]  }
 0x1b3   :  { %v9941_v24 = vld [vmem:[%s13848_s1 + $0x554] ss:$28 sps:$4 sm:$0xff]  }
 0x1b4   :  { %5327 = vmatpush1.bf16.msra.mxu0 %v9877_v28  ;;  %v9939_v28 = vld [vmem:[%s13848_s1 + $0x550] ss:$28 sps:$4 sm:$0xff]  }
 0x1b5   :  { %5268 = vmatpush1.bf16.msra.mxu1 %v9874_v26  ;;  %5328 = vmatprep.subr.bf16.mxu0 %v9885_v30  ;;  %v9942_v26 = vld [vmem:[%s13848_s1 + $0x328] ss:$28 sps:$4 sm:$0xff]  }
 0x1b6   :  { %5269 = vmatprep.subr.bf16.mxu1 %v9882_v29  ;;  %v9943_v29 = vld [vmem:[%s13848_s1 + $0x168] ss:$28 sps:$4 sm:$0xff]  }
 0x1b7   :  { %v9946_v30 = vld [vmem:[%s13848_s1 + $0x58c] ss:$28 sps:$4 sm:$0xff]  }
 0x1b8   :  { %5329 = vmatpush1.bf16.msra.mxu0 %v9883_v34  ;;  %v9944_v34 = vld [vmem:[%s13848_s1 + $0x588] ss:$28 sps:$4 sm:$0xff]  }
 0x1b9   :  { %5270 = vmatpush1.bf16.msra.mxu1 %v9880_v33  ;;  %5330 = vmatprep.subr.bf16.mxu0 %v9891_v36  ;;  %v9947_v33 = vld [vmem:[%s13848_s1 + $0x360] ss:$28 sps:$4 sm:$0xff]  }
 0x1ba   :  { %5271 = vmatprep.subr.bf16.mxu1 %v9888_v35  ;;  %v9948_v35 = vld [vmem:[%s13848_s1 + $0x1a0] ss:$28 sps:$4 sm:$0xff]  }
 0x1bb   :  { %v9951_v36 = vld [vmem:[%s13848_s1 + $0x5c4] ss:$28 sps:$4 sm:$0xff]  }
 0x1bc   :  { %5331 = vmatpush1.bf16.msra.mxu0 %v9889_v40  ;;  %v9949_v40 = vld [vmem:[%s13848_s1 + $0x5c0] ss:$28 sps:$4 sm:$0xff]  }
 0x1bd   :  { %5272 = vmatpush1.bf16.msra.mxu1 %v9886_v39  ;;  %5332 = vmatprep.subr.bf16.mxu0 %v9897_v42  ;;  %v9952_v39 = vld [vmem:[%s13848_s1 + $0x558] ss:$28 sps:$4 sm:$0xff]  }
 0x1be   :  { %5273 = vmatprep.subr.bf16.mxu1 %v9894_v41  ;;  %v9953_v41 = vld [vmem:[%s13848_s1 + $0x398] ss:$28 sps:$4 sm:$0xff]  }
 0x1bf   :  { %v9956_v42 = vld [vmem:[%s13848_s1 + $0x5fc] ss:$28 sps:$4 sm:$0xff]  }
 0x1c0   :  { %5333 = vmatpush1.bf16.msra.mxu0 %v9895_v46  ;;  %v9954_v46 = vld [vmem:[%s13848_s1 + $0x5f8] ss:$28 sps:$4 sm:$0xff]  }
 0x1c1   :  { %5274 = vmatpush1.bf16.msra.mxu1 %v9892_v45  ;;  %5343 = vmatprep.subr.bf16.mxu0 %v9903_v49  ;;  %v9957_v45 = vld [vmem:[%s13848_s1 + $0x590] ss:$28 sps:$4 sm:$0xff]  }
 0x1c2   :  { %5275 = vmatprep.subr.bf16.mxu1 %v9900_v48  ;;  %v9958_v48 = vld [vmem:[%s13848_s1 + $0x3d0] ss:$28 sps:$4 sm:$0xff]  }
 0x1c3   :  { %5335 = vmatmul.mubr.bf16.vlgmr.msra.gmra.mrb[4].mxu0 %v10898_v12  ;;  %v9961_v49 = vld [vmem:[%s13848_s1 + $0x634] ss:$28 sps:$4 sm:$0xff]  }
 0x1c4   :  { %5344 = vmatpush1.bf16.msra.mxu0 %v9901_v53  ;;  %5375 = vmatprep.mubr.bf16.mxu0 %v10973_v38  ;;  %v9966_v53 = vld [vmem:[%s13848_s1 + $0x66c] ss:$28 sps:$4 sm:$0xff]  }
 0x1c5   :  { %5276 = vmatpush1.bf16.msra.mxu1 %v9898_v52  ;;  %5345 = vmatprep.subr.bf16.mxu0 %v9907_v56  ;;  %v9963_v52 = vld [vmem:[%s13848_s1 + $0x408] ss:$28 sps:$4 sm:$0xff]   ;;  %v9968_v56 = vld [vmem:[%s13848_s1 + $0x440] ss:$28 sps:$4 sm:$0xff]  }
 0x1c6   :  { %8688 = vmatprep.subr.msk.bf16.mxu1 %vm4706_vm1, %v8682_v55  ;;  %v9964_v55 = vld [vmem:[%s13848_s1 + $0x668] ss:$28 sps:$4 sm:$0xff]  }
 0x1c8   :  { %5346 = vmatpush1.bf16.msra.mxu0 %v9905_v59  ;;  %v9972_v59 = vld [vmem:[%s13848_s1 + $0x638] ss:$28 sps:$4 sm:$0xff]  }
 0x1c9   :  { %5278 = vmatpush1.bf16.msra.mxu1 %v4714_v61  ;;  %5347 = vmatprep.subr.bf16.mxu0 %v9911_v60  ;;  %v9969_v60 = vld [vmem:[%s13848_s1 + $0x6a0] ss:$28 sps:$4 sm:$0xff]   ;;  %v9973_v61 = vld [vmem:[%s13848_s1 + $0x478] ss:$28 sps:$4 sm:$0xff]  }
 0x1ca   :  { %8934 = vmatprep.subr.bf16.mxu1 %v9912_v62  ;;  %v9976_v62 = vld [vmem:[%s13848_s1 + $0x6dc] ss:$28 sps:$4 sm:$0xff]  }
 0x1cc   :  { %5294 = vmatmul.mubr.bf16.vlgmr.msra.gmra.mrb[4].mxu1 %v10798_v43  ;;  %5348 = vmatpush1.bf16.msra.mxu0 %v9909_v63  ;;  %v9977_v63 = vld [vmem:[%s13848_s1 + $0x670] ss:$28 sps:$4 sm:$0xff]  }
 0x1cd   :  { %8935 = vmatpush3.bf16.msra.mxu1 %v9913_v0  ;;  %5349 = vmatprep.subr.bf16.mxu0 %v9916_v1  ;;  %v9974_v0 = vld [vmem:[%s13848_s1 + $0x6d8] ss:$28 sps:$4 sm:$0xff]   ;;  %v9978_v1 = vld [vmem:[%s13848_s1 + $0x4b0] ss:$28 sps:$4 sm:$0xff]  }
 0x1ce   :  { %8936 = vmatprep.subr.bf16.mxu1 %v9917_v2  ;;  %5621 = vmatprep.mubr.bf16.mxu1 %v10831_v54  ;;  %v9924_v54 = vld [vmem:[%s13848_s1 + $0x4a8] ss:$28 sps:$4 sm:$0xff]   ;;  %v9981_v2 = vld [vmem:[%s13848_s1 + $0x714] ss:$28 sps:$4 sm:$0xff]  }
 0x1d0   :  { %5350 = vmatpush1.bf16.msra.mxu0 %v9914_v3  ;;  %v9982_v3 = vld [vmem:[%s13848_s1 + $0x6a8] ss:$28 sps:$4 sm:$0xff]  }
 0x1d1   :  { %8937 = vmatpush3.bf16.msra.mxu1 %v9918_v4  ;;  %5351 = vmatprep.subr.bf16.mxu0 %v9921_v6  ;;  %v9979_v4 = vld [vmem:[%s13848_s1 + $0x710] ss:$28 sps:$4 sm:$0xff]   ;;  %v9983_v6 = vld [vmem:[%s13848_s1 + $0x4e8] ss:$28 sps:$4 sm:$0xff]  }
 0x1d2   :  { %8938 = vmatprep.subr.bf16.mxu1 %v9922_v7  ;;  %v9986_v7 = vld [vmem:[%s13848_s1 + $0x74c] ss:$28 sps:$4 sm:$0xff]  }
 0x1d4   :  { %5352 = vmatpush1.bf16.msra.mxu0 %v9919_v8  ;;  %v9987_v8 = vld [vmem:[%s13848_s1 + $0x6e0] ss:$28 sps:$4 sm:$0xff]  }
 0x1d5   :  { %8939 = vmatpush3.bf16.msra.mxu1 %v9923_v9  ;;  %5353 = vmatprep.subr.bf16.mxu0 %v9926_v10  ;;  %v9984_v9 = vld [vmem:[%s13848_s1 + $0x748] ss:$28 sps:$4 sm:$0xff]   ;;  %v9988_v10 = vld [vmem:[%s13848_s1 + $0x520] ss:$28 sps:$4 sm:$0xff]  }
 0x1d6   :  { %8940 = vmatprep.subr.bf16.mxu1 %v9927_v13  ;;  %v9991_v13 = vld [vmem:[%s13848_s1 + $0x784] ss:$28 sps:$4 sm:$0xff]  }
 0x1d8   :  { %5354 = vmatpush1.bf16.msra.mxu0 %v9924_v54  ;;  %v9992_v54 = vld [vmem:[%s13848_s1 + $0x8d8] ss:$28 sps:$4 sm:$0xff]  }
 0x1d9   :  { %8941 = vmatpush3.bf16.msra.mxu1 %v9928_v14  ;;  %5355 = vmatprep.subr.bf16.mxu0 %v9931_v15  ;;  %v9989_v14 = vld [vmem:[%s13848_s1 + $0x780] ss:$28 sps:$4 sm:$0xff]   ;;  %v9993_v15 = vld [vmem:[%s13848_s1 + $0x718] ss:$28 sps:$4 sm:$0xff]  }
 0x1da   :  { %8942 = vmatprep.subr.bf16.mxu1 %v9932_v16  ;;  %v9996_v16 = vld [vmem:[%s13848_s1 + $0x7bc] ss:$28 sps:$4 sm:$0xff]  }
 0x1dc   :  { %5356 = vmatpush1.bf16.msra.mxu0 %v9929_v17  ;;  %v9997_v17 = vld [vmem:[%s13848_s1 + $0x910] ss:$28 sps:$4 sm:$0xff]  }
 0x1dd   :  { %8943 = vmatpush3.bf16.msra.mxu1 %v9933_v18  ;;  %5357 = vmatprep.subr.bf16.mxu0 %v9936_v19  ;;  %v9994_v18 = vld [vmem:[%s13848_s1 + $0x7b8] ss:$28 sps:$4 sm:$0xff]   ;;  %v9998_v19 = vld [vmem:[%s13848_s1 + $0x750] ss:$28 sps:$4 sm:$0xff]  }
 0x1de   :  { %8944 = vmatprep.subr.bf16.mxu1 %v9937_v20  ;;  %v10001_v20 = vld [vmem:[%s13848_s1 + $0x7f4] ss:$28 sps:$4 sm:$0xff]  }
 0x1e0   :  { %5358 = vmatpush1.bf16.msra.mxu0 %v9934_v22  ;;  %v9999_v22 = vld [vmem:[%s13848_s1 + $0x7f0] ss:$28 sps:$4 sm:$0xff]  }
 0x1e1   :  { %8945 = vmatpush3.bf16.msra.mxu1 %v9938_v23  ;;  %5359 = vmatprep.subr.bf16.mxu0 %v9941_v24  ;;  %v10003_v23 = vld [vmem:[%s13848_s1 + $0x788] ss:$28 sps:$4 sm:$0xff]  }
 0x1e2   :  { %8946 = vmatprep.subr.bf16.mxu1 %v9942_v26  ;;  %v10006_v24 = vld [vmem:[%s13848_s1 + $0x82c] ss:$28 sps:$4 sm:$0xff]  }
 0x1e3   :  { %v10004_v26 = vld [vmem:[%s13848_s1 + $0x828] ss:$28 sps:$4 sm:$0xff]  }
 0x1e4   :  { %5360 = vmatpush1.bf16.msra.mxu0 %v9939_v28  ;;  %v10008_v28 = vld [vmem:[%s13848_s1 + $0x7c0] ss:$28 sps:$4 sm:$0xff]  }
 0x1e5   :  { %8947 = vmatpush3.bf16.msra.mxu1 %v9943_v29  ;;  %5361 = vmatprep.subr.bf16.mxu0 %v9946_v30  ;;  %v10011_v29 = vld [vmem:[%s13848_s1 + $0x864] ss:$28 sps:$4 sm:$0xff]   ;;  %v10012_v30 = vld [vmem:[%s13848_s1 + $0x9b8] ss:$28 sps:$4 sm:$0xff]  }
 0x1e6   :  { %8948 = vmatprep.subr.bf16.mxu1 %v9947_v33  ;;  %v10009_v33 = vld [vmem:[%s13848_s1 + $0x860] ss:$28 sps:$4 sm:$0xff]  }
 0x1e8   :  { %5362 = vmatpush1.bf16.msra.mxu0 %v9944_v34  ;;  %v10013_v34 = vld [vmem:[%s13848_s1 + $0x7f8] ss:$28 sps:$4 sm:$0xff]  }
 0x1e9   :  { %8949 = vmatpush3.bf16.msra.mxu1 %v9948_v35  ;;  %5363 = vmatprep.subr.bf16.mxu0 %v9951_v36  ;;  %v10016_v35 = vld [vmem:[%s13848_s1 + $0x89c] ss:$28 sps:$4 sm:$0xff]   ;;  %v10017_v36 = vld [vmem:[%s13848_s1 + $0x9f0] ss:$28 sps:$4 sm:$0xff]  }
 0x1ea   :  { %8956 = vmatprep.subr.bf16.mxu1 %v9952_v39  ;;  %v10014_v39 = vld [vmem:[%s13848_s1 + $0x898] ss:$28 sps:$4 sm:$0xff]  }
 0x1ec   :  { %5622 = vmatmul.mubr.bf16.vlgmr.msra.gmra.mrb[8].mxu1 %v10898_v12  ;;  %5364 = vmatpush1.bf16.msra.mxu0 %v9949_v40  ;;  %v9962_v12 = vld [vmem:[%s13848_s1 + $0x5c8] ss:$28 sps:$4 sm:$0xff]   ;;  %v10018_v40 = vld [vmem:[%s13848_s1 + $0x830] ss:$28 sps:$4 sm:$0xff]  }
 0x1ed   :  { %8957 = vmatpush3.bf16.msra.mxu1 %v9953_v41  ;;  %5365 = vmatprep.subr.bf16.mxu0 %v9956_v42  ;;  %v10021_v41 = vld [vmem:[%s13848_s1 + $0x8d4] ss:$28 sps:$4 sm:$0xff]   ;;  %v10022_v42 = vld [vmem:[%s13848_s1 + $0xa28] ss:$28 sps:$4 sm:$0xff]  }
 0x1ee   :  { %8958 = vmatprep.subr.bf16.mxu1 %v9957_v45  ;;  %5661 = vmatprep.mubr.bf16.mxu1 %v10973_v38  ;;  %v9967_v38 = vld [vmem:[%s13848_s1 + $0x600] ss:$28 sps:$4 sm:$0xff]   ;;  %v10019_v45 = vld [vmem:[%s13848_s1 + $0x8d0] ss:$28 sps:$4 sm:$0xff]  }
 0x1f0   :  { %5366 = vmatpush1.bf16.msra.mxu0 %v9954_v46  ;;  %v10023_v46 = vld [vmem:[%s13848_s1 + $0x868] ss:$28 sps:$4 sm:$0xff]  }
 0x1f1   :  { %8959 = vmatpush3.bf16.msra.mxu1 %v9958_v48  ;;  %5367 = vmatprep.subr.bf16.mxu0 %v9961_v49  ;;  %v10026_v48 = vld [vmem:[%s13848_s1 + $0x90c] ss:$28 sps:$4 sm:$0xff]   ;;  %v10027_v49 = vld [vmem:[%s13848_s1 + $0xa60] ss:$28 sps:$4 sm:$0xff]  }
 0x1f2   :  { %8960 = vmatprep.subr.bf16.mxu1 %v9962_v12  ;;  %v10024_v12 = vld [vmem:[%s13848_s1 + $0x908] ss:$28 sps:$4 sm:$0xff]  }
 0x1f4   :  { %5368 = vmatpush1.bf16.msra.mxu0 %v9959_v51  ;;  %v10028_v51 = vld [vmem:[%s13848_s1 + $0x8a0] ss:$28 sps:$4 sm:$0xff]  }
 0x1f5   :  { %8961 = vmatpush3.bf16.msra.mxu1 %v9963_v52  ;;  %5369 = vmatprep.subr.bf16.mxu0 %v9966_v53  ;;  %v10031_v52 = vld [vmem:[%s13848_s1 + $0x944] ss:$28 sps:$4 sm:$0xff]   ;;  %v10032_v53 = vld [vmem:[%s13848_s1 + $0xc58] ss:$28 sps:$4 sm:$0xff]  }
 0x1f6   :  { %8962 = vmatprep.subr.bf16.mxu1 %v9967_v38  ;;  %v10029_v38 = vld [vmem:[%s13848_s1 + $0x940] ss:$28 sps:$4 sm:$0xff]  }
 0x1f8   :  { %5370 = vmatpush1.bf16.msra.mxu0 %v9964_v55  ;;  %v10033_v55 = vld [vmem:[%s13848_s1 + $0xa98] ss:$28 sps:$4 sm:$0xff]  }
 0x1f9   :  { %8963 = vmatpush3.bf16.msra.mxu1 %v9968_v56  ;;  %5371 = vmatprep.subr.bf16.mxu0 %v9971_v58  ;;  %v10036_v56 = vld [vmem:[%s13848_s1 + $0x97c] ss:$28 sps:$4 sm:$0xff]   ;;  %v10037_v58 = vld [vmem:[%s13848_s1 + $0xc90] ss:$28 sps:$4 sm:$0xff]  }
 0x1fa   :  { %8964 = vmatprep.subr.bf16.mxu1 %v9972_v59  ;;  %v10034_v59 = vld [vmem:[%s13848_s1 + $0x978] ss:$28 sps:$4 sm:$0xff]  }
 0x1fc   :  { %5372 = vmatpush1.bf16.msra.mxu0 %v9969_v60  ;;  %v10038_v60 = vld [vmem:[%s13848_s1 + $0xad0] ss:$28 sps:$4 sm:$0xff]  }
 0x1fd   :  { %8965 = vmatpush3.bf16.msra.mxu1 %v9973_v61  ;;  %5373 = vmatprep.subr.bf16.mxu0 %v9976_v62  ;;  %v10041_v61 = vld [vmem:[%s13848_s1 + $0x9b4] ss:$28 sps:$4 sm:$0xff]   ;;  %v10042_v62 = vld [vmem:[%s13848_s1 + $0xcc8] ss:$28 sps:$4 sm:$0xff]  }
 0x1fe   :  { %8966 = vmatprep.subr.bf16.mxu1 %v9977_v63  ;;  %v10039_v63 = vld [vmem:[%s13848_s1 + $0x9b0] ss:$28 sps:$4 sm:$0xff]  }
 0x200   :  { %5374 = vmatpush1.bf16.msra.mxu0 %v9974_v0  ;;  %v10043_v0 = vld [vmem:[%s13848_s1 + $0xb08] ss:$28 sps:$4 sm:$0xff]  }
 0x201   :  { %8967 = vmatpush3.bf16.msra.mxu1 %v9978_v1  ;;  %5384 = vmatprep.subr.bf16.mxu0 %v9981_v2  ;;  %v10046_v1 = vld [vmem:[%s13848_s1 + $0x9ec] ss:$28 sps:$4 sm:$0xff]   ;;  %v10047_v2 = vld [vmem:[%s13848_s1 + $0xd00] ss:$28 sps:$4 sm:$0xff]  }
 0x202   :  { %8968 = vmatprep.subr.bf16.mxu1 %v9982_v3  ;;  %v10044_v3 = vld [vmem:[%s13848_s1 + $0x9e8] ss:$28 sps:$4 sm:$0xff]  }
 0x203   :  { %5376 = vmatmul.mubr.bf16.vlgmr.msra.gmra.mrb[4].mxu0 %v11107_v21 }
 0x204   :  { %5385 = vmatpush1.bf16.msra.mxu0 %v9979_v4  ;;  %5416 = vmatprep.mubr.bf16.mxu0 %v11118_v25  ;;  %v10048_v4 = vld [vmem:[%s13848_s1 + $0xb40] ss:$28 sps:$4 sm:$0xff]  }
 0x205   :  { %8969 = vmatpush3.bf16.msra.mxu1 %v9983_v6  ;;  %5386 = vmatprep.subr.bf16.mxu0 %v9986_v7  ;;  %v10051_v6 = vld [vmem:[%s13848_s1 + $0xa24] ss:$28 sps:$4 sm:$0xff]   ;;  %v10052_v7 = vld [vmem:[%s13848_s1 + $0xd38] ss:$28 sps:$4 sm:$0xff]  }
 0x206   :  { %8970 = vmatprep.subr.bf16.mxu1 %v9987_v8  ;;  %v10049_v8 = vld [vmem:[%s13848_s1 + $0xa20] ss:$28 sps:$4 sm:$0xff]  }
 0x208   :  { %5387 = vmatpush1.bf16.msra.mxu0 %v9984_v9  ;;  %v10053_v9 = vld [vmem:[%s13848_s1 + $0xb78] ss:$28 sps:$4 sm:$0xff]  }
 0x209   :  { %8971 = vmatpush3.bf16.msra.mxu1 %v9988_v10  ;;  %5388 = vmatprep.subr.bf16.mxu0 %v9991_v13  ;;  %v10056_v10 = vld [vmem:[%s13848_s1 + $0xa5c] ss:$28 sps:$4 sm:$0xff]   ;;  %v10057_v13 = vld [vmem:[%s13848_s1 + $0xd70] ss:$28 sps:$4 sm:$0xff]  }
 0x20a   :  { %8978 = vmatprep.subr.bf16.mxu1 %v9992_v54  ;;  %v10054_v54 = vld [vmem:[%s13848_s1 + $0xa58] ss:$28 sps:$4 sm:$0xff]  }
 0x20c   :  { %5662 = vmatmul.mubr.bf16.vlgmr.msra.gmra.mrb[12].mxu1 %v11107_v21  ;;  %5389 = vmatpush1.bf16.msra.mxu0 %v9989_v14  ;;  %v10002_v21 = vld [vmem:[%s13848_s1 + $0x948] ss:$28 sps:$4 sm:$0xff]   ;;  %v10058_v14 = vld [vmem:[%s13848_s1 + $0xbb0] ss:$28 sps:$4 sm:$0xff]  }
 0x20d   :  { %8979 = vmatpush3.bf16.msra.mxu1 %v9993_v15  ;;  %5390 = vmatprep.subr.bf16.mxu0 %v9996_v16  ;;  %v10061_v15 = vld [vmem:[%s13848_s1 + $0xa94] ss:$28 sps:$4 sm:$0xff]   ;;  %v10062_v16 = vld [vmem:[%s13848_s1 + $0xda8] ss:$28 sps:$4 sm:$0xff]  }
 0x20e   :  { %8980 = vmatprep.subr.bf16.mxu1 %v9997_v17  ;;  %5701 = vmatprep.mubr.bf16.mxu1 %v11118_v25  ;;  %v10007_v25 = vld [vmem:[%s13848_s1 + $0x980] ss:$28 sps:$4 sm:$0xff]   ;;  %v10059_v17 = vld [vmem:[%s13848_s1 + $0xa90] ss:$28 sps:$4 sm:$0xff]  }
 0x210   :  { %5391 = vmatpush1.bf16.msra.mxu0 %v9994_v18  ;;  %v10063_v18 = vld [vmem:[%s13848_s1 + $0xbe8] ss:$28 sps:$4 sm:$0xff]  }
 0x211   :  { %8981 = vmatpush3.bf16.msra.mxu1 %v9998_v19  ;;  %5392 = vmatprep.subr.bf16.mxu0 %v10001_v20  ;;  %v10066_v19 = vld [vmem:[%s13848_s1 + $0xacc] ss:$28 sps:$4 sm:$0xff]   ;;  %v10067_v20 = vld [vmem:[%s13848_s1 + $0xde0] ss:$28 sps:$4 sm:$0xff]  }
 0x212   :  { %8982 = vmatprep.subr.bf16.mxu1 %v10002_v21  ;;  %v10064_v21 = vld [vmem:[%s13848_s1 + $0xac8] ss:$28 sps:$4 sm:$0xff]  }
 0x214   :  { %5393 = vmatpush1.bf16.msra.mxu0 %v9999_v22  ;;  %v10068_v22 = vld [vmem:[%s13848_s1 + $0xc20] ss:$28 sps:$4 sm:$0xff]  }
 0x215   :  { %8983 = vmatpush3.bf16.msra.mxu1 %v10003_v23  ;;  %5394 = vmatprep.subr.bf16.mxu0 %v10006_v24  ;;  %v10071_v23 = vld [vmem:[%s13848_s1 + $0xb04] ss:$28 sps:$4 sm:$0xff]   ;;  %v905_v24 = vlaneseq }
 0x216   :  { %8984 = vmatprep.subr.bf16.mxu1 %v10007_v25  ;;  %v10069_v25 = vld [vmem:[%s13848_s1 + $0xb00] ss:$28 sps:$4 sm:$0xff]  }
 0x218   :  { %5395 = vmatpush1.bf16.msra.mxu0 %v10004_v26  ;;  %v10073_v26 = vld [vmem:[%s13848_s1 + $0xe18] ss:$28 sps:$4 sm:$0xff]  }
 0x219   :  { %8985 = vmatpush3.bf16.msra.mxu1 %v10008_v28  ;;  %5396 = vmatprep.subr.bf16.mxu0 %v10011_v29  ;;  %v10076_v28 = vld [vmem:[%s13848_s1 + $0xb3c] ss:$28 sps:$4 sm:$0xff]   ;;  %v12562_v29 = vshrl.u32 %v905_v24, 7  ;;  %v10126_v24 = vld [vmem:[%s13848_s1 + $0xd6c] ss:$28 sps:$4 sm:$0xff]  }
 0x21a   :  { %8986 = vmatprep.subr.bf16.mxu1 %v10012_v30  ;;  %v10074_v30 = vld [vmem:[%s13848_s1 + $0xb38] ss:$28 sps:$4 sm:$0xff]  }
 0x21c   :  { %5397 = vmatpush1.bf16.msra.mxu0 %v10009_v33  ;;  %v10078_v33 = vld [vmem:[%s13848_s1 + $0xe50] ss:$28 sps:$4 sm:$0xff]  }
 0x21d   :  { %8987 = vmatpush3.bf16.msra.mxu1 %v10013_v34  ;;  %5398 = vmatprep.subr.bf16.mxu0 %v10016_v35  ;;  %v10081_v34 = vld [vmem:[%s13848_s1 + $0xb74] ss:$28 sps:$4 sm:$0xff]   ;;  %v10082_v35 = vld [vmem:[%s13848_s1 + $0x1048] ss:$28 sps:$4 sm:$0xff]  }
 0x21e   :  { %8988 = vmatprep.subr.bf16.mxu1 %v10017_v36  ;;  %v10079_v36 = vld [vmem:[%s13848_s1 + $0xb70] ss:$28 sps:$4 sm:$0xff]  }
 0x220   :  { %5399 = vmatpush1.bf16.msra.mxu0 %v10014_v39  ;;  %v907_v39 = vsub.s32 0, %v12562_v29 }
 0x221   :  { %8989 = vmatpush3.bf16.msra.mxu1 %v10018_v40  ;;  %5400 = vmatprep.subr.bf16.mxu0 %v10021_v41  ;;  %v10083_v40 = vld [vmem:[%s13848_s1 + $0xe88] ss:$28 sps:$4 sm:$0xff]  }
 0x222   :  { %8990 = vmatprep.subr.bf16.mxu1 %v10022_v42  ;;  %v12587_v41 = vld [vmem:[%s13851_s2] sm:$0x7f]  ;;  %v911_v42 = vsub.s32 1, %v12562_v29 }
 0x224   :  { %5401 = vmatpush1.bf16.msra.mxu0 %v10019_v45  ;;  %v10086_v45 = vld [vmem:[%s13848_s1 + $0xbac] ss:$28 sps:$4 sm:$0xff]  }
 0x225   :  { %8991 = vmatpush3.bf16.msra.mxu1 %v10023_v46  ;;  %5402 = vmatprep.subr.bf16.mxu0 %v10026_v48  ;;  %v10087_v46 = vld [vmem:[%s13848_s1 + $0x1080] ss:$28 sps:$4 sm:$0xff]   ;;  %v908_v48 = vrot.slane %v12587_v41, %v907_v39 }
 0x226   :  { %8992 = vmatprep.subr.bf16.mxu1 %v10027_v49  ;;  %v912_v49 = vrot.slane %v12587_v41, %v911_v42 }
 0x228   :  { %5403 = vmatpush1.bf16.msra.mxu0 %v10024_v12  ;;  %v10084_v12 = vld [vmem:[%s13848_s1 + $0xba8] ss:$28 sps:$4 sm:$0xff]  }
 0x229   :  { %8993 = vmatpush3.bf16.msra.mxu1 %v10028_v51  ;;  %5404 = vmatprep.subr.bf16.mxu0 %v10031_v52  ;;  %v10088_v51 = vld [vmem:[%s13848_s1 + $0xec0] ss:$28 sps:$4 sm:$0xff]  }
 0x22a   :  { %9000 = vmatprep.subr.bf16.mxu1 %v10032_v53  ;;  %v10091_v52 = vld [vmem:[%s13848_s1 + $0xbe4] ss:$28 sps:$4 sm:$0xff]   ;;  %v10092_v53 = vld [vmem:[%s13848_s1 + $0x10b8] ss:$28 sps:$4 sm:$0xff]  }
 0x22c   :  { %5702 = vmatmul.mubr.bf16.vlgmr.msra.gmra.mrb[16].mxu1 %v11310_v32  ;;  %5405 = vmatpush1.bf16.msra.mxu0 %v10029_v38 }
 0x22d   :  { %9001 = vmatpush3.bf16.msra.mxu1 %v10033_v55  ;;  %5406 = vmatprep.subr.bf16.mxu0 %v10036_v56 }
 0x22e   :  { %9002 = vmatprep.subr.bf16.mxu1 %v10037_v58  ;;  %5741 = vmatprep.mubr.bf16.mxu1 %v11324_v37 }
 0x230   :  { %5407 = vmatpush1.bf16.msra.mxu0 %v10034_v59 }
 0x231   :  { %9003 = vmatpush3.bf16.msra.mxu1 %v10038_v60  ;;  %5408 = vmatprep.subr.bf16.mxu0 %v10041_v61  ;;  %v10089_v60 = vld [vmem:[%s13848_s1 + $0xbe0] ss:$28 sps:$4 sm:$0xff]   ;;  %v10093_v61 = vld [vmem:[%s13848_s1 + $0xef8] ss:$28 sps:$4 sm:$0xff]  }
 0x232   :  { %9004 = vmatprep.subr.bf16.mxu1 %v10042_v62 }
 0x234   :  { %5409 = vmatpush1.bf16.msra.mxu0 %v10039_v63 }
 0x235   :  { %9005 = vmatpush3.bf16.msra.mxu1 %v10043_v0  ;;  %5410 = vmatprep.subr.bf16.mxu0 %v10046_v1  ;;  %v10096_v0 = vld [vmem:[%s13848_s1 + $0xc1c] ss:$28 sps:$4 sm:$0xff]   ;;  %v10097_v1 = vld [vmem:[%s13848_s1 + $0x10f0] ss:$28 sps:$4 sm:$0xff]  }
 0x236   :  { %9006 = vmatprep.subr.bf16.mxu1 %v10047_v2 }
 0x238   :  { %5411 = vmatpush1.bf16.msra.mxu0 %v10044_v3  ;;  %v10098_v3 = vld [vmem:[%s13848_s1 + $0xf30] ss:$28 sps:$4 sm:$0xff]  }
 0x239   :  { %9007 = vmatpush3.bf16.msra.mxu1 %v10048_v4  ;;  %5412 = vmatprep.subr.bf16.mxu0 %v10051_v6  ;;  %v10101_v4 = vld [vmem:[%s13848_s1 + $0xc54] ss:$28 sps:$4 sm:$0xff]  }
 0x23a   :  { %9008 = vmatprep.subr.bf16.mxu1 %v10052_v7  ;;  %v10099_v6 = vld [vmem:[%s13848_s1 + $0xc50] ss:$28 sps:$4 sm:$0xff]   ;;  %v10103_v7 = vld [vmem:[%s13848_s1 + $0xf68] ss:$28 sps:$4 sm:$0xff]  }
 0x23c   :  { %5413 = vmatpush1.bf16.msra.mxu0 %v10049_v8  ;;  %v10106_v8 = vld [vmem:[%s13848_s1 + $0xc8c] ss:$28 sps:$4 sm:$0xff]  }
 0x23d   :  { %9009 = vmatpush3.bf16.msra.mxu1 %v10053_v9  ;;  %5414 = vmatprep.subr.bf16.mxu0 %v10056_v10  ;;  %v10107_v9 = vld [vmem:[%s13848_s1 + $0x1160] ss:$28 sps:$4 sm:$0xff]   ;;  %v10104_v10 = vld [vmem:[%s13848_s1 + $0xc88] ss:$28 sps:$4 sm:$0xff]  }
 0x23e   :  { %9010 = vmatprep.subr.bf16.mxu1 %v10057_v13  ;;  %v10108_v13 = vld [vmem:[%s13848_s1 + $0xfa0] ss:$28 sps:$4 sm:$0xff]  }
 0x240   :  { %5415 = vmatpush1.bf16.msra.mxu0 %v10054_v54  ;;  %v10111_v54 = vld [vmem:[%s13848_s1 + $0xcc4] ss:$28 sps:$4 sm:$0xff]  }
 0x241   :  { %9011 = vmatpush3.bf16.msra.mxu1 %v10058_v14  ;;  %5425 = vmatprep.subr.bf16.mxu0 %v10061_v15  ;;  %v10112_v14 = vld [vmem:[%s13848_s1 + $0x1358] ss:$28 sps:$4 sm:$0xff]   ;;  %v10109_v15 = vld [vmem:[%s13848_s1 + $0xcc0] ss:$28 sps:$4 sm:$0xff]  }
 0x242   :  { %9012 = vmatprep.subr.bf16.mxu1 %v10062_v16  ;;  %v10113_v16 = vld [vmem:[%s13848_s1 + $0x1198] ss:$28 sps:$4 sm:$0xff]  }
 0x243   :  { %5417 = vmatmul.mubr.bf16.vlgmr.msra.gmra.mrb[4].mxu0 %v11310_v32  ;;  %v10072_v32 = vld [vmem:[%s13848_s1 + $0xfd8] ss:$28 sps:$4 sm:$0xff]  }
 0x244   :  { %5426 = vmatpush1.bf16.msra.mxu0 %v10059_v17  ;;  %5457 = vmatprep.mubr.bf16.mxu0 %v11324_v37  ;;  %v10077_v37 = vld [vmem:[%s13848_s1 + $0x1010] ss:$28 sps:$4 sm:$0xff]   ;;  %v10116_v17 = vld [vmem:[%s13848_s1 + $0xcfc] ss:$28 sps:$4 sm:$0xff]  }
 0x245   :  { %9013 = vmatpush3.bf16.msra.mxu1 %v10063_v18  ;;  %5427 = vmatprep.subr.bf16.mxu0 %v10066_v19  ;;  %v10117_v18 = vld [vmem:[%s13848_s1 + $0x1390] ss:$28 sps:$4 sm:$0xff]   ;;  %v10114_v19 = vld [vmem:[%s13848_s1 + $0xcf8] ss:$28 sps:$4 sm:$0xff]  }
 0x246   :  { %9014 = vmatprep.subr.bf16.mxu1 %v10067_v20  ;;  %v10118_v20 = vld [vmem:[%s13848_s1 + $0x11d0] ss:$28 sps:$4 sm:$0xff]  }
 0x248   :  { %5428 = vmatpush1.bf16.msra.mxu0 %v10064_v21  ;;  %v10121_v21 = vld [vmem:[%s13848_s1 + $0xd34] ss:$28 sps:$4 sm:$0xff]  }
 0x249   :  { %9015 = vmatpush3.bf16.msra.mxu1 %v10068_v22  ;;  %5429 = vmatprep.subr.bf16.mxu0 %v10071_v23  ;;  %v10122_v22 = vld [vmem:[%s13848_s1 + $0x13c8] ss:$28 sps:$4 sm:$0xff]   ;;  %v10119_v23 = vld [vmem:[%s13848_s1 + $0xd30] ss:$28 sps:$4 sm:$0xff]  }
 0x24a   :  { %9022 = vmatprep.subr.bf16.mxu1 %v10072_v32  ;;  %v10123_v32 = vld [vmem:[%s13848_s1 + $0x1208] ss:$28 sps:$4 sm:$0xff]  }
 0x24c   :  { %5742 = vmatmul.mubr.bf16.vlgmr.msra.gmra.mrb[20].mxu1 %v11520_v50  ;;  %5430 = vmatpush1.bf16.msra.mxu0 %v10069_v25  ;;  %v10127_v25 = vld [vmem:[%s13848_s1 + $0x1400] ss:$28 sps:$4 sm:$0xff]  }
 0x24d   :  { %9023 = vmatpush3.bf16.msra.mxu1 %v10073_v26  ;;  %5431 = vmatprep.subr.bf16.mxu0 %v10076_v28  ;;  %v10124_v26 = vld [vmem:[%s13848_s1 + $0xd68] ss:$28 sps:$4 sm:$0xff]   ;;  %v10128_v28 = vld [vmem:[%s13848_s1 + $0x1240] ss:$28 sps:$4 sm:$0xff]  }
 0x24e   :  { %9024 = vmatprep.subr.bf16.mxu1 %v10077_v37  ;;  %5781 = vmatprep.mubr.bf16.mxu1 %v11534_v57  ;;  %v10131_v37 = vld [vmem:[%s13848_s1 + $0xda4] ss:$28 sps:$4 sm:$0xff]  }
 0x250   :  { %5432 = vmatpush1.bf16.msra.mxu0 %v10074_v30  ;;  %v10132_v30 = vld [vmem:[%s13848_s1 + $0x1438] ss:$28 sps:$4 sm:$0xff]  }
 0x251   :  { %9025 = vmatpush3.bf16.msra.mxu1 %v10078_v33  ;;  %5433 = vmatprep.subr.bf16.mxu0 %v10081_v34  ;;  %v10129_v33 = vld [vmem:[%s13848_s1 + $0xda0] ss:$28 sps:$4 sm:$0xff]   ;;  %v10133_v34 = vld [vmem:[%s13848_s1 + $0x1278] ss:$28 sps:$4 sm:$0xff]  }
 0x252   :  { %9026 = vmatprep.subr.bf16.mxu1 %v10082_v35  ;;  %v10136_v35 = vld [vmem:[%s13848_s1 + $0xddc] ss:$28 sps:$4 sm:$0xff]  }
 0x254   :  { %5434 = vmatpush1.bf16.msra.mxu0 %v10079_v36  ;;  %v10137_v36 = vld [vmem:[%s13848_s1 + $0x1470] ss:$28 sps:$4 sm:$0xff]  }
 0x255   :  { %9027 = vmatpush3.bf16.msra.mxu1 %v10083_v40  ;;  %5435 = vmatprep.subr.bf16.mxu0 %v10086_v45  ;;  %v10134_v40 = vld [vmem:[%s13848_s1 + $0xdd8] ss:$28 sps:$4 sm:$0xff]   ;;  %v10138_v45 = vld [vmem:[%s13848_s1 + $0x12b0] ss:$28 sps:$4 sm:$0xff]  }
 0x256   :  { %9028 = vmatprep.subr.bf16.mxu1 %v10087_v46  ;;  %v4967_v38 = vpop.f32.mrb[0].mxu0  ;;  %v10141_v46 = vld [vmem:[%s13848_s1 + $0xe14] ss:$28 sps:$4 sm:$0xff]  }
 0x257   :  { %v9122_v55 = vadd.f32 %v4967_v38, %v908_v48  ;;  %v4969_v56 = vpop.f32.mrb[1].mxu0  ;;  %v10142_v48 = vld [vmem:[%s13848_s1 + $0x14a8] ss:$28 sps:$4 sm:$0xff]   ;;  %v10148_v38 = vld [vmem:[%s13848_s1 + $0x1320] ss:$28 sps:$4 sm:$0xff]  }
 0x258   :  { %v9124_v58 = vadd.f32 %v4969_v56, %v912_v49  ;;  %v4971_v59 = vpop.f32.mrb[2].mxu0  ;;  %5436 = vmatpush1.bf16.msra.mxu0 %v10084_v12  ;;  %v10139_v49 = vld [vmem:[%s13848_s1 + $0xe10] ss:$28 sps:$4 sm:$0xff]   ;;  %v10143_v12 = vld [vmem:[%s13848_s1 + $0x12e8] ss:$28 sps:$4 sm:$0xff]  }
 0x259   :  { %9029 = vmatpush3.bf16.msra.mxu1 %v10088_v51  ;;  %v12621_v62 = vadd.f32 %v9122_v55, %v11507_v44  ;;  %v4972_v63 = vpop.f32.mrb[3].mxu0  ;;  %5437 = vmatprep.subr.bf16.mxu0 %v10091_v52  ;;  %v10094_v44 = vld [vmem:[%s13848_s1 + $0xc18] ss:$28 sps:$4 sm:$0xff]   ;;  %v10146_v51 = vld [vmem:[%s13848_s1 + $0xe4c] ss:$28 sps:$4 sm:$0xff]  }
 0x25a   :  { %9030 = vmatprep.subr.bf16.mxu1 %v10092_v53  ;;  %v12630_v2 = vadd.f32 %v9124_v58, %v11515_v47  ;;  %v10102_v47 = vld [vmem:[%s13848_s1 + $0x1128] ss:$28 sps:$4 sm:$0xff]   ;;  %v10147_v52 = vld [vmem:[%s13848_s1 + $0x14e0] ss:$28 sps:$4 sm:$0xff]   ;;  %v10152_v56 = vld [vmem:[%s13848_s1 + $0x1518] ss:$28 sps:$4 sm:$0xff]  }
 0x25b   :  { %v10144_v53 = vld [vmem:[%s13848_s1 + $0xe48] ss:$28 sps:$4 sm:$0xff]   ;;  %v10612_v58 = vmov 0   ;;  %v10155_v59 = vld [vmem:[%s13848_s1 + $0xebc] ss:$28 sps:$4 sm:$0xff]   ;;  %vm5869_vm3 = vcmp.ge.f32.partialorder %v12621_v62, 0.0 }
 0x25c   :  { %5438 = vmatpush1.bf16.msra.mxu0 %v10089_v60  ;;  %v10151_v55 = vld [vmem:[%s13848_s1 + $0xe84] ss:$28 sps:$4 sm:$0xff]   ;;  %v10156_v60 = vld [vmem:[%s13848_s1 + $0x1550] ss:$28 sps:$4 sm:$0xff]   ;;  %vm5870_vm2 = vcmp.ge.f32.partialorder %v12630_v2, 0.0 }
 0x25d   :  { %9031 = vmatpush3.bf16.msra.mxu1 %v10093_v61  ;;  %5439 = vmatprep.subr.bf16.mxu0 %v10096_v0  ;;  %v10159_v61 = vld [vmem:[%s13848_s1 + $0xef4] ss:$28 sps:$4 sm:$0xff]   ;;  %v10160_v0 = vld [vmem:[%s13848_s1 + $0x1588] ss:$28 sps:$4 sm:$0xff]  }
 0x25e   :  { %9032 = vmatprep.subr.bf16.mxu1 %v10097_v1  ;;  %v10157_v63 = vld [vmem:[%s13848_s1 + $0xef0] ss:$28 sps:$4 sm:$0xff]  }
 0x25f   :  { %v10163_v1 = vld [vmem:[%s13848_s1 + $0xf2c] ss:$28 sps:$4 sm:$0xff]  }
 0x260   :  { %5440 = vmatpush1.bf16.msra.mxu0 %v10094_v44  ;;  %v10161_v44 = vld [vmem:[%s13848_s1 + $0xf28] ss:$28 sps:$4 sm:$0xff]  }
 0x261   :  { %9033 = vmatpush3.bf16.msra.mxu1 %v10098_v3  ;;  %5441 = vmatprep.subr.bf16.mxu0 %v10101_v4  ;;  %v10164_v3 = vld [vmem:[%s13848_s1 + $0x15c0] ss:$28 sps:$4 sm:$0xff]  }
 0x262   :  { %9034 = vmatprep.subr.bf16.mxu1 %v10102_v47  ;;  %v10167_v4 = vld [vmem:[%s13848_s1 + $0xf64] ss:$28 sps:$4 sm:$0xff]  }
 0x263   :  { %v10165_v47 = vld [vmem:[%s13848_s1 + $0xf60] ss:$28 sps:$4 sm:$0xff]  }
 0x264   :  { %5442 = vmatpush1.bf16.msra.mxu0 %v10099_v6  ;;  %v10168_v6 = vld [vmem:[%s13848_s1 + $0x15f8] ss:$28 sps:$4 sm:$0xff]  }
 0x265   :  { %9035 = vmatpush3.bf16.msra.mxu1 %v10103_v7  ;;  %5443 = vmatprep.subr.bf16.mxu0 %v10106_v8  ;;  %v10171_v7 = vld [vmem:[%s13848_s1 + $0xf9c] ss:$28 sps:$4 sm:$0xff]  }
 0x266   :  { %9036 = vmatprep.subr.bf16.mxu1 %v10107_v9  ;;  %v10169_v8 = vld [vmem:[%s13848_s1 + $0xf98] ss:$28 sps:$4 sm:$0xff]   ;;  %v10172_v9 = vld [vmem:[%s13848_s1 + $0x1630] ss:$28 sps:$4 sm:$0xff]  }
 0x268   :  { %5444 = vmatpush1.bf16.msra.mxu0 %v10104_v10  ;;  %v10175_v10 = vld [vmem:[%s13848_s1 + $0xfd4] ss:$28 sps:$4 sm:$0xff]  }
 0x269   :  { %9037 = vmatpush3.bf16.msra.mxu1 %v10108_v13  ;;  %5445 = vmatprep.subr.bf16.mxu0 %v10111_v54 }
 0x26a   :  { %9044 = vmatprep.subr.bf16.mxu1 %v10112_v14 }
 0x26c   :  { %5782 = vmatmul.mubr.bf16.vlgmr.msra.gmra.mrb[24].mxu1 %v11726_v5  ;;  %5446 = vmatpush1.bf16.msra.mxu0 %v10109_v15  ;;  %v10173_v15 = vld [vmem:[%s13848_s1 + $0xfd0] ss:$28 sps:$4 sm:$0xff]  }
 0x26d   :  { %9045 = vmatpush3.bf16.msra.mxu1 %v10113_v16  ;;  %5447 = vmatprep.subr.bf16.mxu0 %v10116_v17  ;;  %v10176_v16 = vld [vmem:[%s13848_s1 + $0x1668] ss:$28 sps:$4 sm:$0xff]  }
 0x26e   :  { %9046 = vmatprep.subr.bf16.mxu1 %v10117_v18  ;;  %5821 = vmatprep.mubr.bf16.mxu1 %v11743_v11  ;;  %v10179_v18 = vld [vmem:[%s13848_s1 + $0x100c] ss:$28 sps:$4 sm:$0xff]  }
 0x270   :  { %5448 = vmatpush1.bf16.msra.mxu0 %v10114_v19  ;;  %v10177_v19 = vld [vmem:[%s13848_s1 + $0x1008] ss:$28 sps:$4 sm:$0xff]  }
 0x271   :  { %9047 = vmatpush3.bf16.msra.mxu1 %v10118_v20  ;;  %5449 = vmatprep.subr.bf16.mxu0 %v10121_v21  ;;  %v10180_v20 = vld [vmem:[%s13848_s1 + $0x16a0] ss:$28 sps:$4 sm:$0xff]  }
 0x272   :  { %9048 = vmatprep.subr.bf16.mxu1 %v10122_v22  ;;  %v10183_v21 = vld [vmem:[%s13848_s1 + $0x1044] ss:$28 sps:$4 sm:$0xff]   ;;  %v10184_v22 = vld [vmem:[%s13848_s1 + $0x16d8] ss:$0 sps:$4 sm:$0x33]  }
 0x274   :  { %5450 = vmatpush1.bf16.msra.mxu0 %v10119_v23  ;;  %v5877_v23 = vmul.f32 0.01, %v12630_v2 }
 0x275   :  { %9049 = vmatpush3.bf16.msra.mxu1 %v10123_v32  ;;  %5451 = vmatprep.subr.bf16.mxu0 %v10126_v24  ;;  %v10181_v32 = vld [vmem:[%s13848_s1 + $0x1040] ss:$28 sps:$4 sm:$0xff]   ;;  %v4726_v24 = vsel %vm4706_vm1, %v10184_v22, 0  ;;  %v10245_v22 = vld [vmem:[%s13848_s1 + $0x12a8] ss:$28 sps:$4 sm:$0xff]  }
 0x276   :  { %9050 = vmatprep.subr.bf16.mxu1 %v10127_v25  ;;  %v10187_v25 = vld [vmem:[%s13848_s1 + $0x107c] ss:$28 sps:$4 sm:$0xff]  }
 0x278   :  { %5452 = vmatpush1.bf16.msra.mxu0 %v10124_v26  ;;  %v10190_v26 = vld [vmem:[%s13850_s3 + $0x4] ss:$16 sps:$4 sm:$0xff]  }
 0x279   :  { %9051 = vmatpush3.bf16.msra.mxu1 %v10128_v28  ;;  %5453 = vmatprep.subr.bf16.mxu0 %v10131_v37  ;;  %v10185_v28 = vld [vmem:[%s13848_s1 + $0x1078] ss:$28 sps:$4 sm:$0xff]   ;;  %v10188_v37 = vld [vmem:[%s13850_s3] ss:$16 sps:$4 sm:$0xff]  }
 0x27a   :  { %9052 = vmatprep.subr.bf16.mxu1 %v10132_v30  ;;  %v5884_v30 = vsel %vm5870_vm2, %v12630_v2, %v5877_v23  ;;  %v10191_v2 = vld [vmem:[%s13848_s1 + $0x10b0] ss:$28 sps:$4 sm:$0xff]   ;;  %vm7890_vm2 = vcmask 1044480  }
 0x27b   :  { %v10248_v23 = vld [vmem:[%s13850_s3 + $0x140] ss:$16 sps:$4 sm:$0xff]  }
 0x27c   :  { %5454 = vmatpush1.bf16.msra.mxu0 %v10129_v33  ;;  %v10193_v33 = vld [vmem:[%s13848_s1 + $0x10b4] ss:$28 sps:$4 sm:$0xff]  }
 0x27d   :  { %9053 = vmatpush3.bf16.msra.mxu1 %v10133_v34  ;;  %5455 = vmatprep.subr.bf16.mxu0 %v10136_v35  ;;  %v10196_v34 = vld [vmem:[%s13850_s3 + $0x24] ss:$16 sps:$4 sm:$0xff]   ;;  %v12882_v35 = vpack.c.bf16 %v5884_v30, %v5884_v30 }
 0x27e   :  { %9054 = vmatprep.subr.bf16.mxu1 %v10137_v36  ;;  %v10194_v36 = vld [vmem:[%s13850_s3 + $0x20] ss:$16 sps:$4 sm:$0xff]   ;;  %v10262_v30 = vld [vmem:[%s13850_s3 + $0x184] ss:$16 sps:$4 sm:$0xff]  }
 0x280   :  { %5456 = vmatpush1.bf16.msra.mxu0 %v10134_v40  ;;  %v10199_v40 = vld [vmem:[%s13848_s1 + $0x10ec] ss:$28 sps:$4 sm:$0xff]  }
 0x281   :  { %9055 = vmatpush3.bf16.msra.mxu1 %v10138_v45  ;;  %5466 = vmatprep.subr.bf16.mxu0 %v10141_v46  ;;  %v10202_v45 = vld [vmem:[%s13850_s3 + $0x44] ss:$16 sps:$4 sm:$0xff]  }
 0x282   :  { %9056 = vmatprep.subr.bf16.mxu1 %v10142_v48  ;;  %v10197_v46 = vld [vmem:[%s13848_s1 + $0x10e8] ss:$28 sps:$4 sm:$0xff]   ;;  %v10200_v48 = vld [vmem:[%s13850_s3 + $0x40] ss:$16 sps:$4 sm:$0xff]  }
 0x283   :  { %5458 = vmatmul.mubr.bf16.vlgmr.msra.gmra.mrb[4].mxu0 %v11520_v50  ;;  %v10149_v50 = vld [vmem:[%s13848_s1 + $0xe80] ss:$28 sps:$4 sm:$0xff]  }
 0x284   :  { %5467 = vmatpush1.bf16.msra.mxu0 %v10139_v49  ;;  %5498 = vmatprep.mubr.bf16.mxu0 %v11534_v57  ;;  %v10153_v57 = vld [vmem:[%s13848_s1 + $0xeb8] ss:$28 sps:$4 sm:$0xff]   ;;  %v10205_v49 = vld [vmem:[%s13848_s1 + $0x1124] ss:$28 sps:$4 sm:$0xff]  }
 0x285   :  { %9057 = vmatpush3.bf16.msra.mxu1 %v10143_v12  ;;  %5468 = vmatprep.subr.bf16.mxu0 %v10146_v51  ;;  %v10208_v12 = vld [vmem:[%s13850_s3 + $0x64] ss:$16 sps:$4 sm:$0xff]   ;;  %v10203_v51 = vld [vmem:[%s13848_s1 + $0x1120] ss:$28 sps:$4 sm:$0xff]  }
 0x286   :  { %9058 = vmatprep.subr.bf16.mxu1 %v10147_v52  ;;  %v10206_v52 = vld [vmem:[%s13850_s3 + $0x60] ss:$16 sps:$4 sm:$0xff]  }
 0x288   :  { %5469 = vmatpush1.bf16.msra.mxu0 %v10144_v53  ;;  %v10211_v53 = vld [vmem:[%s13848_s1 + $0x115c] ss:$28 sps:$4 sm:$0xff]  }
 0x289   :  { %9059 = vmatpush3.bf16.msra.mxu1 %v10148_v38  ;;  %5470 = vmatprep.subr.bf16.mxu0 %v10151_v55  ;;  %v10214_v38 = vld [vmem:[%s13850_s3 + $0x84] ss:$16 sps:$4 sm:$0xff]  }
 0x28a   :  { %5829 = vmatprep.subr.bf16.mxu1 %v10612_v58  ;;  %v10209_v55 = vld [vmem:[%s13848_s1 + $0x1158] ss:$28 sps:$4 sm:$0xff]  }
 0x28c   :  { %5822 = vmatmul.mubr.bf16.vlgmr.msra.gmra.mrb[28].mxu1 %v11932_v27  ;;  %5471 = vmatpush1.bf16.msra.mxu0 %v10149_v50  ;;  %v10212_v50 = vld [vmem:[%s13850_s3 + $0x80] ss:$16 sps:$4 sm:$0xff]  }
 0x28d   :  { %5830 = vmatpush1.bf16.msra.mxu1 %v10152_v56  ;;  %5472 = vmatprep.subr.bf16.mxu0 %v10155_v59  ;;  %v10217_v56 = vld [vmem:[%s13848_s1 + $0x1194] ss:$28 sps:$4 sm:$0xff]  }
 0x28e   :  { %5831 = vmatprep.subr.bf16.mxu1 %v10612_v58  ;;  %8692 = vmatprep.mubr.msk.bf16.mxu1 %vm4702_vm0, %v10768_v31  ;;  %v10220_v59 = vld [vmem:[%s13850_s3 + $0xa4] ss:$16 sps:$4 sm:$0xff]  }
 0x290   :  { %5473 = vmatpush1.bf16.msra.mxu0 %v10153_v57 }
 0x291   :  { %5832 = vmatpush1.bf16.msra.mxu1 %v10156_v60  ;;  %5474 = vmatprep.subr.bf16.mxu0 %v10159_v61  ;;  %v10215_v61 = vld [vmem:[%s13848_s1 + $0x1190] ss:$28 sps:$4 sm:$0xff]  }
 0x292   :  { %5833 = vmatprep.subr.bf16.mxu1 %v10612_v58 }
 0x294   :  { %5475 = vmatpush1.bf16.msra.mxu0 %v10157_v63  ;;  %v10218_v63 = vld [vmem:[%s13850_s3 + $0xa0] ss:$16 sps:$4 sm:$0xff]  }
 0x295   :  { %5834 = vmatpush1.bf16.msra.mxu1 %v10160_v0  ;;  %5476 = vmatprep.subr.bf16.mxu0 %v10163_v1 }
 0x296   :  { %5835 = vmatprep.subr.bf16.mxu1 %v10612_v58 }
 0x298   :  { %5477 = vmatpush1.bf16.msra.mxu0 %v10161_v44  ;;  %v10223_v44 = vld [vmem:[%s13848_s1 + $0x11cc] ss:$28 sps:$4 sm:$0xff]  }
 0x299   :  { %5836 = vmatpush1.bf16.msra.mxu1 %v10164_v3  ;;  %5478 = vmatprep.subr.bf16.mxu0 %v10167_v4  ;;  %v10226_v3 = vld [vmem:[%s13850_s3 + $0xc4] ss:$16 sps:$4 sm:$0xff]  }
 0x29a   :  { %5837 = vmatprep.subr.bf16.mxu1 %v10612_v58 }
 0x29c   :  { %5479 = vmatpush1.bf16.msra.mxu0 %v10165_v47  ;;  %v10221_v47 = vld [vmem:[%s13848_s1 + $0x11c8] ss:$28 sps:$4 sm:$0xff]  }
 0x29d   :  { %5838 = vmatpush1.bf16.msra.mxu1 %v10168_v6  ;;  %5480 = vmatprep.subr.bf16.mxu0 %v10171_v7  ;;  %v10224_v6 = vld [vmem:[%s13850_s3 + $0xc0] ss:$16 sps:$4 sm:$0xff]  }
 0x29e   :  { %5839 = vmatprep.subr.bf16.mxu1 %v10612_v58  ;;  %v10229_v7 = vld [vmem:[%s13848_s1 + $0x1204] ss:$28 sps:$4 sm:$0xff]  }
 0x29f   :  { %v12828_v13 = vpop.f32.mrb[4].mxu1 }
 0x2a0   :  { %v12830_v54 = vpop.f32.mrb[5].mxu1  ;;  %5481 = vmatpush1.bf16.msra.mxu0 %v10169_v8  ;;  %v10227_v8 = vld [vmem:[%s13848_s1 + $0x1200] ss:$28 sps:$4 sm:$0xff]  }
 0x2a1   :  { %v5299_v14 = vpop.f32.mrb[6].mxu1  ;;  %5840 = vmatpush1.bf16.msra.mxu1 %v10172_v9  ;;  %5482 = vmatprep.subr.bf16.mxu0 %v10175_v10  ;;  %v10230_v9 = vld [vmem:[%s13850_s3 + $0xe0] ss:$16 sps:$4 sm:$0xff]   ;;  %v10235_v10 = vld [vmem:[%s13848_s1 + $0x123c] ss:$28 sps:$4 sm:$0xff]  }
 0x2a2   :  { %v5300_v17 = vpop.f32.mrb[7].mxu1  ;;  %5841 = vmatprep.subr.bf16.mxu1 %v10612_v58  ;;  %v10233_v14 = vld [vmem:[%s13848_s1 + $0x1238] ss:$28 sps:$4 sm:$0xff]  }
 0x2a3   :  { %v10244_v17 = vld [vmem:[%s13850_s3 + $0x124] ss:$16 sps:$4 sm:$0xff]  }
 0x2a4   :  { %5483 = vmatpush1.bf16.msra.mxu0 %v10173_v15  ;;  %v10236_v15 = vld [vmem:[%s13850_s3 + $0x100] ss:$16 sps:$4 sm:$0xff]  }
 0x2a5   :  { %5842 = vmatpush1.bf16.msra.mxu1 %v10176_v16  ;;  %5484 = vmatprep.subr.bf16.mxu0 %v10179_v18  ;;  %v10241_v16 = vld [vmem:[%s13848_s1 + $0x1274] ss:$28 sps:$4 sm:$0xff]  }
 0x2a6   :  { %5843 = vmatprep.subr.bf16.mxu1 %v10612_v58  ;;  %v10239_v18 = vld [vmem:[%s13848_s1 + $0x1270] ss:$28 sps:$4 sm:$0xff]  }
 0x2a8   :  { %5485 = vmatpush1.bf16.msra.mxu0 %v10177_v19  ;;  %v10242_v19 = vld [vmem:[%s13850_s3 + $0x120] ss:$16 sps:$4 sm:$0xff]  }
 0x2a9   :  { %5844 = vmatpush1.bf16.msra.mxu1 %v10180_v20  ;;  %5486 = vmatprep.subr.bf16.mxu0 %v10183_v21  ;;  %v10247_v20 = vld [vmem:[%s13848_s1 + $0x12ac] ss:$28 sps:$4 sm:$0xff]   ;;  %v10250_v21 = vld [vmem:[%s13850_s3 + $0x144] ss:$16 sps:$4 sm:$0xff]  }
 0x2aa   :  { %5845 = vmatprep.subr.bf16.mxu1 %v10612_v58 }
 0x2ac   :  { %5487 = vmatpush1.bf16.msra.mxu0 %v10181_v32  ;;  %v10253_v32 = vld [vmem:[%s13848_s1 + $0x12e4] ss:$28 sps:$4 sm:$0xff]  }
 0x2ad   :  { %5846 = vmatpush1.bf16.msra.mxu1 %v4726_v24  ;;  %5488 = vmatprep.subr.bf16.mxu0 %v10187_v25  ;;  %v10256_v24 = vld [vmem:[%s13850_s3 + $0x164] ss:$16 sps:$4 sm:$0xff]   ;;  %v931_v25 = vsub.s32 6, %v12562_v29 }
 0x2ae   :  { %7123 = vmatprep.subr.bf16.mxu1 %v10190_v26  ;;  %v10251_v26 = vld [vmem:[%s13848_s1 + $0x12e0] ss:$28 sps:$4 sm:$0xff]  }
 0x2b0   :  { %5862 = vmatmul.mubr.bf16.vlgmr.msra.gmra.mrb[32].mxu1 %v10798_v43  ;;  %5489 = vmatpush1.bf16.msra.mxu0 %v10185_v28  ;;  %v10254_v28 = vld [vmem:[%s13850_s3 + $0x160] ss:$16 sps:$4 sm:$0xff]  }
 0x2b1   :  { %7124 = vmatpush1.bf16.msra.mxu1 %v10188_v37  ;;  %7155 = vmatprep.mubr.bf16.mxu1 %v12882_v35  ;;  %v10259_v37 = vld [vmem:[%s13848_s1 + $0x131c] ss:$28 sps:$4 sm:$0xff]  }
 0x2b2   :  { %5490 = vmatprep.subr.bf16.mxu0 %v10193_v33  ;;  %7125 = vmatprep.subr.bf16.mxu1 %v10196_v34  ;;  %v932_v33 = vrot.slane %v12587_v41, %v931_v25  ;;  %v919_v34 = vsub.s32 3, %v12562_v29  ;;  %v10308_v25 = vld [vmem:[%s13850_s3 + $0x280] ss:$16 sps:$4 sm:$0xff]  }
 0x2b4   :  { %5491 = vmatpush1.bf16.msra.mxu0 %v10191_v2  ;;  %v10257_v2 = vld [vmem:[%s13848_s1 + $0x1318] ss:$28 sps:$4 sm:$0xff]  }
 0x2b5   :  { %7126 = vmatpush1.bf16.msra.mxu1 %v10194_v36  ;;  %5492 = vmatprep.subr.bf16.mxu0 %v10199_v40  ;;  %v10260_v36 = vld [vmem:[%s13850_s3 + $0x180] ss:$16 sps:$4 sm:$0xff]  }
 0x2b6   :  { %7127 = vmatprep.subr.bf16.mxu1 %v10202_v45  ;;  %v10265_v40 = vld [vmem:[%s13848_s1 + $0x1354] ss:$28 sps:$4 sm:$0xff]  }
 0x2b7   :  { %v10268_v45 = vld [vmem:[%s13850_s3 + $0x1a4] ss:$16 sps:$4 sm:$0xff]  }
 0x2b8   :  { %5493 = vmatpush1.bf16.msra.mxu0 %v10197_v46 }
 0x2b9   :  { %7128 = vmatpush1.bf16.msra.mxu1 %v10200_v48  ;;  %5494 = vmatprep.subr.bf16.mxu0 %v10205_v49 }
 0x2ba   :  { %7129 = vmatprep.subr.bf16.mxu1 %v10208_v12  ;;  %v920_v12 = vrot.slane %v12587_v41, %v919_v34  ;;  %v10274_v41 = vld [vmem:[%s13850_s3 + $0x1c4] ss:$16 sps:$4 sm:$0xff]  }
 0x2bc   :  { %5495 = vmatpush1.bf16.msra.mxu0 %v10203_v51  ;;  %v10263_v51 = vld [vmem:[%s13848_s1 + $0x1350] ss:$28 sps:$4 sm:$0xff]  }
 0x2bd   :  { %7130 = vmatpush1.bf16.msra.mxu1 %v10206_v52  ;;  %5496 = vmatprep.subr.bf16.mxu0 %v10211_v53  ;;  %v10266_v52 = vld [vmem:[%s13850_s3 + $0x1a0] ss:$16 sps:$4 sm:$0xff]  }
 0x2be   :  { %7131 = vmatprep.subr.bf16.mxu1 %v10214_v38 }
 0x2bf   :  { %v8950_v57 = vpop.f32.mrb[8].mxu1 }
 0x2c0   :  { %v8951_v60 = vpop.f32.mrb[9].mxu1  ;;  %5497 = vmatpush1.bf16.msra.mxu0 %v10209_v55  ;;  %v10271_v55 = vld [vmem:[%s13848_s1 + $0x138c] ss:$28 sps:$4 sm:$0xff]  }
 0x2c1   :  { %7132 = vmatpush1.bf16.msra.mxu1 %v10212_v50  ;;  %v12939_v0 = vadd.f32 %v8951_v60, %v8950_v57  ;;  %v8953_v1 = vpop.f32.mrb[10].mxu1  ;;  %5507 = vmatprep.subr.bf16.mxu0 %v10217_v56  ;;  %v10269_v57 = vld [vmem:[%s13848_s1 + $0x1388] ss:$28 sps:$4 sm:$0xff]   ;;  %v10272_v60 = vld [vmem:[%s13850_s3 + $0x1c0] ss:$16 sps:$4 sm:$0xff]  }
 0x2c2   :  { %7133 = vmatprep.subr.bf16.mxu1 %v10220_v59  ;;  %v8954_v4 = vpop.f32.mrb[11].mxu1  ;;  %v9127_v59 = vadd.f32 %v12830_v54, %v920_v12  ;;  %v10280_v54 = vld [vmem:[%s13850_s3 + $0x1e4] ss:$16 sps:$4 sm:$0xff]   ;;  %v10275_v1 = vld [vmem:[%s13848_s1 + $0x13c0] ss:$28 sps:$4 sm:$0xff]  }
 0x2c3   :  { %5499 = vmatmul.mubr.bf16.vlgmr.msra.gmra.mrb[4].mxu0 %v11726_v5  ;;  %v10232_v5 = vld [vmem:[%s13850_s3 + $0xe4] ss:$16 sps:$4 sm:$0xff]   ;;  %v5624_v46 = vadd.f32 %v12939_v0, %v932_v33  ;;  %v10311_v33 = vld [vmem:[%s13848_s1 + $0x1510] ss:$28 sps:$4 sm:$0xff]  }
 0x2c4   :  { %5508 = vmatpush1.bf16.msra.mxu0 %v10215_v61  ;;  %5539 = vmatprep.mubr.bf16.mxu0 %v11743_v11  ;;  %v10238_v11 = vld [vmem:[%s13850_s3 + $0x104] ss:$16 sps:$4 sm:$0xff]   ;;  %v5879_v0 = vmul.f32 0.01, %v9127_v59  ;;  %vm5872_vm4 = vcmp.ge.f32.partialorder %v9127_v59, 0.0 }
 0x2c5   :  { %7134 = vmatpush1.bf16.msra.mxu1 %v10218_v63  ;;  %5509 = vmatprep.subr.bf16.mxu0 %v10223_v44  ;;  %v10277_v61 = vld [vmem:[%s13848_s1 + $0x13c4] ss:$28 sps:$4 sm:$0xff]   ;;  %v5876_v63 = vmul.f32 0.01, %v12621_v62 }
 0x2c6   :  { %7135 = vmatprep.subr.bf16.mxu1 %v10226_v3  ;;  %v10278_v44 = vld [vmem:[%s13850_s3 + $0x1e0] ss:$16 sps:$4 sm:$0xff]   ;;  %v10283_v3 = vld [vmem:[%s13848_s1 + $0x13fc] ss:$28 sps:$4 sm:$0xff]   ;;  %v10286_v4 = vld [vmem:[%s13850_s3 + $0x204] ss:$16 sps:$4 sm:$0xff]  }
 0x2c7   :  { %v10317_v12 = vld [vmem:[%s13848_s1 + $0x1548] ss:$28 sps:$4 sm:$0xff]  }
 0x2c8   :  { %5510 = vmatpush1.bf16.msra.mxu0 %v10221_v47  ;;  %v5883_v47 = vsel %vm5869_vm3, %v12621_v62, %v5876_v63  ;;  %v10292_v62 = vld [vmem:[%s13850_s3 + $0x224] ss:$16 sps:$4 sm:$0xff]  }
 0x2c9   :  { %7136 = vmatpush1.bf16.msra.mxu1 %v10224_v6  ;;  %5511 = vmatprep.subr.bf16.mxu0 %v10229_v7  ;;  %v10281_v6 = vld [vmem:[%s13848_s1 + $0x13f8] ss:$28 sps:$4 sm:$0xff]   ;;  %v10284_v7 = vld [vmem:[%s13850_s3 + $0x200] ss:$16 sps:$4 sm:$0xff]   ;;  %v10341_v63 = vld [vmem:[%s13848_s1 + $0x1628] ss:$28 sps:$4 sm:$0xff]  }
 0x2ca   :  { %7137 = vmatprep.subr.bf16.mxu1 %v10232_v5  ;;  %v5886_v5 = vsel %vm5872_vm4, %v9127_v59, %v5879_v0  ;;  %v10340_v59 = vld [vmem:[%s13850_s3 + $0x324] ss:$16 sps:$4 sm:$0xff]   ;;  %v10344_v0 = vld [vmem:[%s13850_s3 + $0x340] ss:$16 sps:$4 sm:$0xff]   ;;  %vm7886_vm4 = vcmask 80896  }
 0x2cc   :  { %5512 = vmatpush1.bf16.msra.mxu0 %v10227_v8  ;;  %v13088_v8 = vpack.c.bf16 %v5883_v47, %v5883_v47  ;;  %v10355_v47 = vld [vmem:[%s13848_s1 + $0x169c] ss:$28 sps:$4 sm:$0xff]  }
 0x2cd   :  { %7138 = vmatpush1.bf16.msra.mxu1 %v10230_v9  ;;  %5513 = vmatprep.subr.bf16.mxu0 %v10235_v10  ;;  %v10289_v9 = vld [vmem:[%s13848_s1 + $0x1434] ss:$28 sps:$4 sm:$0xff]   ;;  %v13097_v10 = vpack.c.bf16 %v5886_v5, %v5886_v5 }
 0x2ce   :  { %7139 = vmatprep.subr.bf16.mxu1 %v10238_v11  ;;  %v10287_v11 = vld [vmem:[%s13848_s1 + $0x1430] ss:$28 sps:$4 sm:$0xff]  }
 0x2cf   :  { %v901_v5 = vld [vmem:[%s13848_s1 + $0x16d0] sm:$0x33] }
 0x2d0   :  { %5514 = vmatpush1.bf16.msra.mxu0 %v10233_v14  ;;  %v10290_v14 = vld [vmem:[%s13850_s3 + $0x220] ss:$16 sps:$4 sm:$0xff]  }
 0x2d1   :  { %7140 = vmatpush1.bf16.msra.mxu1 %v10236_v15  ;;  %5515 = vmatprep.subr.bf16.mxu0 %v10241_v16  ;;  %v10295_v15 = vld [vmem:[%s13848_s1 + $0x146c] ss:$28 sps:$4 sm:$0xff]   ;;  %v10298_v16 = vld [vmem:[%s13850_s3 + $0x244] ss:$16 sps:$4 sm:$0xff]  }
 0x2d2   :  { %7141 = vmatprep.subr.bf16.mxu1 %v10244_v17  ;;  %v10293_v17 = vld [vmem:[%s13848_s1 + $0x1468] ss:$28 sps:$4 sm:$0xff]  }
 0x2d4   :  { %5516 = vmatpush1.bf16.msra.mxu0 %v10239_v18  ;;  %v10296_v18 = vld [vmem:[%s13850_s3 + $0x240] ss:$16 sps:$4 sm:$0xff]  }
 0x2d5   :  { %7142 = vmatpush1.bf16.msra.mxu1 %v10242_v19  ;;  %5517 = vmatprep.subr.bf16.mxu0 %v10247_v20  ;;  %v10301_v19 = vld [vmem:[%s13848_s1 + $0x14a4] ss:$28 sps:$4 sm:$0xff]  }
 0x2d6   :  { %7143 = vmatprep.subr.bf16.mxu1 %v10250_v21  ;;  %v10304_v20 = vld [vmem:[%s13850_s3 + $0x264] ss:$16 sps:$4 sm:$0xff]   ;;  %v10299_v21 = vld [vmem:[%s13848_s1 + $0x14a0] ss:$28 sps:$4 sm:$0xff]  }
 0x2d8   :  { %5518 = vmatpush1.bf16.msra.mxu0 %v10245_v22  ;;  %v10302_v22 = vld [vmem:[%s13850_s3 + $0x260] ss:$16 sps:$4 sm:$0xff]  }
 0x2d9   :  { %7144 = vmatpush1.bf16.msra.mxu1 %v10248_v23  ;;  %5519 = vmatprep.subr.bf16.mxu0 %v10253_v32  ;;  %v10307_v23 = vld [vmem:[%s13848_s1 + $0x14dc] ss:$28 sps:$4 sm:$0xff]   ;;  %v10310_v32 = vld [vmem:[%s13850_s3 + $0x284] ss:$16 sps:$4 sm:$0xff]  }
 0x2da   :  { %7145 = vmatprep.subr.bf16.mxu1 %v10256_v24  ;;  %v10305_v24 = vld [vmem:[%s13848_s1 + $0x14d8] ss:$28 sps:$4 sm:$0xff]  }
 0x2dc   :  { %5520 = vmatpush1.bf16.msra.mxu0 %v10251_v26  ;;  %v10313_v26 = vld [vmem:[%s13848_s1 + $0x1514] ss:$28 sps:$4 sm:$0xff]  }
 0x2dd   :  { %7146 = vmatpush1.bf16.msra.mxu1 %v10254_v28  ;;  %5521 = vmatprep.subr.bf16.mxu0 %v10259_v37  ;;  %v10316_v28 = vld [vmem:[%s13850_s3 + $0x2a4] ss:$16 sps:$4 sm:$0xff]  }
 0x2de   :  { %7147 = vmatprep.subr.bf16.mxu1 %v10262_v30 }
 0x2df   :  { %v8972_v48 = vpop.f32.mrb[12].mxu1 }
 0x2e0   :  { %v8973_v49 = vpop.f32.mrb[13].mxu1  ;;  %5522 = vmatpush1.bf16.msra.mxu0 %v10257_v2  ;;  %v10314_v2 = vld [vmem:[%s13850_s3 + $0x2a0] ss:$16 sps:$4 sm:$0xff]  }
 0x2e1   :  { %7148 = vmatpush1.bf16.msra.mxu1 %v10260_v36  ;;  %v8974_v53 = vadd.f32 %v8973_v49, %v8972_v48  ;;  %v8975_v38 = vpop.f32.mrb[14].mxu1  ;;  %5523 = vmatprep.subr.bf16.mxu0 %v10265_v40 }
 0x2e2   :  { %7149 = vmatprep.subr.bf16.mxu1 %v10268_v45  ;;  %v8976_v50 = vpop.f32.mrb[15].mxu1  ;;  %v10319_v45 = vld [vmem:[%s13848_s1 + $0x154c] ss:$28 sps:$4 sm:$0xff]   ;;  %v10326_v38 = vld [vmem:[%s13850_s3 + $0x2e0] ss:$16 sps:$4 sm:$0xff]  }
 0x2e3   :  { %v13052_v56 = vadd.f32 %v8974_v53, %v5624_v46  ;;  %v10322_v46 = vld [vmem:[%s13850_s3 + $0x2c4] ss:$16 sps:$4 sm:$0xff]   ;;  %v10323_v53 = vld [vmem:[%s13848_s1 + $0x1580] ss:$28 sps:$4 sm:$0xff]  }
 0x2e4   :  { %5524 = vmatpush1.bf16.msra.mxu0 %v10263_v51  ;;  %v10320_v51 = vld [vmem:[%s13850_s3 + $0x2c0] ss:$16 sps:$4 sm:$0xff]  }
 0x2e5   :  { %7150 = vmatpush1.bf16.msra.mxu1 %v10266_v52  ;;  %5525 = vmatprep.subr.bf16.mxu0 %v10271_v55  ;;  %v10325_v52 = vld [vmem:[%s13848_s1 + $0x1584] ss:$28 sps:$4 sm:$0xff]   ;;  %v10331_v55 = vld [vmem:[%s13848_s1 + $0x15bc] ss:$28 sps:$4 sm:$0xff]  }
 0x2e6   :  { %7151 = vmatprep.subr.bf16.mxu1 %v10274_v41  ;;  %v10329_v41 = vld [vmem:[%s13848_s1 + $0x15b8] ss:$28 sps:$4 sm:$0xff]   ;;  %v10332_v50 = vld [vmem:[%s13850_s3 + $0x300] ss:$16 sps:$4 sm:$0xff]  }
 0x2e8   :  { %5526 = vmatpush1.bf16.msra.mxu0 %v10269_v57  ;;  %v10335_v57 = vld [vmem:[%s13848_s1 + $0x15f0] ss:$28 sps:$4 sm:$0xff]  }
 0x2e9   :  { %7152 = vmatpush1.bf16.msra.mxu1 %v10272_v60  ;;  %5527 = vmatprep.subr.bf16.mxu0 %v10277_v61  ;;  %v10338_v60 = vld [vmem:[%s13850_s3 + $0x320] ss:$16 sps:$4 sm:$0xff]   ;;  %v10343_v61 = vld [vmem:[%s13848_s1 + $0x162c] ss:$28 sps:$4 sm:$0xff]  }
 0x2ea   :  { %7153 = vmatprep.subr.bf16.mxu1 %v10280_v54  ;;  %v10346_v54 = vld [vmem:[%s13850_s3 + $0x344] ss:$16 sps:$4 sm:$0xff]  }
 0x2ec   :  { %5528 = vmatpush1.bf16.msra.mxu0 %v10275_v1  ;;  %v10349_v1 = vld [vmem:[%s13848_s1 + $0x1664] ss:$28 sps:$4 sm:$0xff]  }
 0x2ed   :  { %7154 = vmatpush1.bf16.msra.mxu1 %v10278_v44  ;;  %5529 = vmatprep.subr.bf16.mxu0 %v10283_v3  ;;  %v10352_v44 = vld [vmem:[%s13850_s3 + $0x364] ss:$16 sps:$4 sm:$0xff]   ;;  %v10347_v3 = vld [vmem:[%s13848_s1 + $0x1660] ss:$28 sps:$4 sm:$0xff]  }
 0x2ee   :  { %7164 = vmatprep.subr.bf16.mxu1 %v10286_v4  ;;  %v10350_v4 = vld [vmem:[%s13850_s3 + $0x360] ss:$16 sps:$4 sm:$0xff]  }
 0x2f0   :  { %7156 = vmatmul.mubr.bf16.vlgmr.msra.gmra.mrb[36].mxu1 %v13088_v8  ;;  %5530 = vmatpush1.bf16.msra.mxu0 %v10281_v6  ;;  %v10358_v6 = vld [vmem:[%s13850_s3 + $0x384] ss:$16 sps:$4 sm:$0xff]  }
 0x2f1   :  { %7165 = vmatpush1.bf16.msra.mxu1 %v10284_v7  ;;  %7196 = vmatprep.mubr.bf16.mxu1 %v13097_v10  ;;  %v915_v7 = vsub.s32 2, %v12562_v29 }
 0x2f2   :  { %5531 = vmatprep.subr.bf16.mxu0 %v10289_v9  ;;  %7166 = vmatprep.subr.bf16.mxu1 %v10292_v62  ;;  %v10353_v9 = vld [vmem:[%s13848_s1 + $0x1698] ss:$28 sps:$4 sm:$0xff]   ;;  %v10356_v62 = vld [vmem:[%s13850_s3 + $0x380] ss:$16 sps:$4 sm:$0xff]  }
 0x2f4   :  { %5532 = vmatpush1.bf16.msra.mxu0 %v10287_v11  ;;  %v8684_v11 = vcombine.high %v901_v5, %v901_v5 }
 0x2f5   :  { %7167 = vmatpush1.bf16.msra.mxu1 %v10290_v14  ;;  %5533 = vmatprep.subr.bf16.mxu0 %v10295_v15  ;;  %v10362_v14 = vld [vmem:[%s13850_s3 + $0x3a4] ss:$16 sps:$4 sm:$0xff]   ;;  %v8683_v15 = vcombine.low %v901_v5, %v901_v5  ;;  %v10396_v5 = vld [vmem:[%s13850_s3 + $0x10c] ss:$16 sps:$4 sm:$0xff]  }
 0x2f6   :  { %7168 = vmatprep.subr.bf16.mxu1 %v10298_v16  ;;  %v13254_v16 = vld [vmem:[%s13851_s2] sm:$0x7f] }
 0x2f8   :  { %5534 = vmatpush1.bf16.msra.mxu0 %v10293_v17  ;;  %v916_v17 = vrot.slane %v13254_v16, %v915_v7 }
 0x2f9   :  { %7169 = vmatpush1.bf16.msra.mxu1 %v10296_v18  ;;  %5535 = vmatprep.subr.bf16.mxu0 %v10301_v19 }
 0x2fa   :  { %7170 = vmatprep.subr.bf16.mxu1 %v10304_v20  ;;  %v10360_v20 = vld [vmem:[%s13850_s3 + $0x3a0] ss:$16 sps:$4 sm:$0xff]  }
 0x2fc   :  { %5536 = vmatpush1.bf16.msra.mxu0 %v10299_v21 }
 0x2fd   :  { %7171 = vmatpush1.bf16.msra.mxu1 %v10302_v22  ;;  %5537 = vmatprep.subr.bf16.mxu0 %v10307_v23  ;;  %v4720_v23 = vsel %vm4706_vm1, %v8683_v15, 0  ;;  %v10502_v15 = vld [vmem:[%s13850_s3 + $0x4c0] ss:$16 sps:$4 sm:$0xff]  }
 0x2fe   :  { %7172 = vmatprep.subr.bf16.mxu1 %v10310_v32  ;;  %v10366_v32 = vld [vmem:[%s13850_s3 + $0x3c4] ss:$16 sps:$4 sm:$0xff]  }
 0x2ff   :  { %v8994_v37 = vpop.f32.mrb[16].mxu1 }
 0x300   :  { %v8995_v30 = vpop.f32.mrb[17].mxu1  ;;  %5538 = vmatpush1.bf16.msra.mxu0 %v10305_v24  ;;  %v10369_v24 = vld [vmem:[%s13850_s3 + $0xc] ss:$16 sps:$4 sm:$0xff]  }
 0x301   :  { %7173 = vmatpush1.bf16.msra.mxu1 %v10308_v25  ;;  %v8996_v36 = vadd.f32 %v8995_v30, %v8994_v37  ;;  %v8997_v40 = vpop.f32.mrb[18].mxu1  ;;  %5548 = vmatprep.subr.bf16.mxu0 %v10313_v26  ;;  %v9126_v26 = vadd.f32 %v12828_v13, %v916_v17  ;;  %v10364_v37 = vld [vmem:[%s13850_s3 + $0x3c0] ss:$16 sps:$4 sm:$0xff]   ;;  %v10367_v30 = vld [vmem:[%s13850_s3 + $0x8] ss:$16 sps:$4 sm:$0xff]  }
 0x302   :  { %7174 = vmatprep.subr.bf16.mxu1 %v10316_v28  ;;  %v8998_v48 = vpop.f32.mrb[19].mxu1  ;;  %v10373_v40 = vld [vmem:[%s13850_s3 + $0x28] ss:$16 sps:$4 sm:$0xff]   ;;  %v10399_v17 = vld [vmem:[%s13850_s3 + $0x12c] ss:$16 sps:$4 sm:$0xff]  }
 0x303   :  { %v13161_v49 = vadd.f32 %v8996_v36, %v13052_v56  ;;  %5540 = vmatmul.mubr.bf16.vlgmr.msra.gmra.mrb[4].mxu0 %v11932_v27  ;;  %v10328_v27 = vld [vmem:[%s13850_s3 + $0x2e4] ss:$16 sps:$4 sm:$0xff]   ;;  %v5878_v13 = vmul.f32 0.01, %v9126_v26  ;;  %vm5871_vm5 = vcmp.ge.f32.partialorder %v9126_v26, 0.0 }
 0x304   :  { %5549 = vmatpush1.bf16.msra.mxu0 %v10311_v33  ;;  %8691 = vmatprep.mubr.msk.bf16.mxu0 %vm4702_vm0, %v10768_v31  ;;  %v10334_v31 = vld [vmem:[%s13850_s3 + $0x304] ss:$16 sps:$4 sm:$0xff]   ;;  %v10370_v36 = vld [vmem:[%s13850_s3 + $0x3e0] ss:$16 sps:$4 sm:$0xff]   ;;  %v10376_v48 = vld [vmem:[%s13850_s3 + $0x48] ss:$16 sps:$4 sm:$0xff]  }
 0x305   :  { %7175 = vmatpush1.bf16.msra.mxu1 %v10314_v2  ;;  %5550 = vmatprep.subr.bf16.mxu0 %v10319_v45  ;;  %v10337_v56 = vld [vmem:[%s13848_s1 + $0x15f4] ss:$28 sps:$4 sm:$0xff]   ;;  %v10375_v2 = vld [vmem:[%s13850_s3 + $0x2c] ss:$16 sps:$4 sm:$0xff]  }
 0x306   :  { %7176 = vmatprep.subr.bf16.mxu1 %v10322_v46  ;;  %v10372_v33 = vld [vmem:[%s13850_s3 + $0x3e4] ss:$16 sps:$4 sm:$0xff]   ;;  %v10378_v45 = vld [vmem:[%s13850_s3 + $0x4c] ss:$16 sps:$4 sm:$0xff]   ;;  %v5885_v46 = vsel %vm5871_vm5, %v9126_v26, %v5878_v13  ;;  %v10403_v26 = vld [vmem:[%s13850_s3 + $0x168] ss:$16 sps:$4 sm:$0xff]  }
 0x307   :  { %v10526_v13 = vld [vmem:[%s13850_s3 + $0x540] ss:$16 sps:$4 sm:$0xff]   ;;  %vm7934_vm5 = vcmask 15360  }
 0x308   :  { %5551 = vmatpush1.bf16.msra.mxu0 %v10317_v12  ;;  %v10381_v12 = vld [vmem:[%s13850_s3 + $0x6c] ss:$16 sps:$4 sm:$0xff]  }
 0x309   :  { %7177 = vmatpush1.bf16.msra.mxu1 %v10320_v51  ;;  %5552 = vmatprep.subr.bf16.mxu0 %v10325_v52  ;;  %v10474_v51 = vld [vmem:[%s13850_s3 + $0x424] ss:$16 sps:$4 sm:$0xff]   ;;  %v10379_v52 = vld [vmem:[%s13850_s3 + $0x68] ss:$16 sps:$4 sm:$0xff]  }
 0x30a   :  { %7178 = vmatprep.subr.bf16.mxu1 %v10328_v27  ;;  %v10472_v27 = vld [vmem:[%s13850_s3 + $0x420] ss:$16 sps:$4 sm:$0xff]  }
 0x30c   :  { %5553 = vmatpush1.bf16.msra.mxu0 %v10323_v53  ;;  %v10384_v53 = vld [vmem:[%s13850_s3 + $0x8c] ss:$16 sps:$4 sm:$0xff]  }
 0x30d   :  { %7179 = vmatpush1.bf16.msra.mxu1 %v10326_v38  ;;  %5554 = vmatprep.subr.bf16.mxu0 %v10331_v55  ;;  %v10480_v38 = vld [vmem:[%s13850_s3 + $0x444] ss:$16 sps:$4 sm:$0xff]   ;;  %v10382_v55 = vld [vmem:[%s13850_s3 + $0x88] ss:$16 sps:$4 sm:$0xff]  }
 0x30e   :  { %7180 = vmatprep.subr.bf16.mxu1 %v10334_v31  ;;  %v10478_v31 = vld [vmem:[%s13850_s3 + $0x440] ss:$16 sps:$4 sm:$0xff]  }
 0x310   :  { %5555 = vmatpush1.bf16.msra.mxu0 %v10329_v41  ;;  %v10387_v41 = vld [vmem:[%s13850_s3 + $0xac] ss:$16 sps:$4 sm:$0xff]  }
 0x311   :  { %7181 = vmatpush1.bf16.msra.mxu1 %v10332_v50  ;;  %5556 = vmatprep.subr.bf16.mxu0 %v10337_v56  ;;  %v10486_v50 = vld [vmem:[%s13850_s3 + $0x464] ss:$16 sps:$4 sm:$0xff]   ;;  %v10385_v56 = vld [vmem:[%s13850_s3 + $0xa8] ss:$16 sps:$4 sm:$0xff]  }
 0x312   :  { %7182 = vmatprep.subr.bf16.mxu1 %v10340_v59  ;;  %v10484_v59 = vld [vmem:[%s13850_s3 + $0x460] ss:$16 sps:$4 sm:$0xff]  }
 0x314   :  { %5557 = vmatpush1.bf16.msra.mxu0 %v10335_v57  ;;  %v10390_v57 = vld [vmem:[%s13850_s3 + $0xcc] ss:$16 sps:$4 sm:$0xff]  }
 0x315   :  { %7183 = vmatpush1.bf16.msra.mxu1 %v10338_v60  ;;  %5558 = vmatprep.subr.bf16.mxu0 %v10343_v61  ;;  %v10492_v60 = vld [vmem:[%s13850_s3 + $0x484] ss:$16 sps:$4 sm:$0xff]   ;;  %v10388_v61 = vld [vmem:[%s13850_s3 + $0xc8] ss:$16 sps:$4 sm:$0xff]  }
 0x316   :  { %7184 = vmatprep.subr.bf16.mxu1 %v10346_v54  ;;  %v10490_v54 = vld [vmem:[%s13850_s3 + $0x480] ss:$16 sps:$4 sm:$0xff]  }
 0x318   :  { %5559 = vmatpush1.bf16.msra.mxu0 %v10341_v63  ;;  %v10393_v63 = vld [vmem:[%s13850_s3 + $0xec] ss:$16 sps:$4 sm:$0xff]  }
 0x319   :  { %7185 = vmatpush1.bf16.msra.mxu1 %v10344_v0  ;;  %5560 = vmatprep.subr.bf16.mxu0 %v10349_v1  ;;  %v10498_v0 = vld [vmem:[%s13850_s3 + $0x4a4] ss:$16 sps:$4 sm:$0xff]  }
 0x31a   :  { %7186 = vmatprep.subr.bf16.mxu1 %v10352_v44 }
 0x31c   :  { %5561 = vmatpush1.bf16.msra.mxu0 %v10347_v3  ;;  %v10391_v3 = vld [vmem:[%s13850_s3 + $0xe8] ss:$16 sps:$4 sm:$0xff]  }
 0x31d   :  { %7187 = vmatpush1.bf16.msra.mxu1 %v10350_v4  ;;  %5562 = vmatprep.subr.bf16.mxu0 %v10355_v47 }
 0x31e   :  { %7188 = vmatprep.subr.bf16.mxu1 %v10358_v6  ;;  %v10496_v6 = vld [vmem:[%s13850_s3 + $0x4a0] ss:$16 sps:$4 sm:$0xff]  }
 0x31f   :  { %v9016_v18 = vpop.f32.mrb[20].mxu1 }
 0x320   :  { %v9017_v19 = vpop.f32.mrb[21].mxu1  ;;  %5563 = vmatpush1.bf16.msra.mxu0 %v10353_v9 }
 0x321   :  { %7189 = vmatpush1.bf16.msra.mxu1 %v10356_v62  ;;  %v9018_v21 = vadd.f32 %v9017_v19, %v9016_v18  ;;  %v9019_v22 = vpop.f32.mrb[22].mxu1  ;;  %8690 = vmatprep.subr.msk.bf16.mxu0 %vm4706_vm1, %v8684_v11  ;;  %v10504_v62 = vld [vmem:[%s13850_s3 + $0x4c4] ss:$16 sps:$4 sm:$0xff]   ;;  %v10397_v19 = vld [vmem:[%s13850_s3 + $0x128] ss:$16 sps:$4 sm:$0xff]  }
 0x322   :  { %7190 = vmatprep.subr.bf16.mxu1 %v10362_v14  ;;  %v9020_v25 = vpop.f32.mrb[23].mxu1  ;;  %v10394_v14 = vld [vmem:[%s13850_s3 + $0x108] ss:$16 sps:$4 sm:$0xff]   ;;  %v10510_v18 = vld [vmem:[%s13850_s3 + $0x4e4] ss:$16 sps:$4 sm:$0xff]  }
 0x323   :  { %v13272_v28 = vadd.f32 %v9018_v21, %v13161_v49  ;;  %v13306_v49 = vpack.c.bf16 %v5885_v46, %v5885_v46  ;;  %v10402_v21 = vld [vmem:[%s13850_s3 + $0x14c] ss:$16 sps:$4 sm:$0xff]   ;;  %v10516_v22 = vld [vmem:[%s13850_s3 + $0x504] ss:$16 sps:$4 sm:$0xff]  }
 0x324   :  { %5565 = vmatpush1.bf16.msra.mxu0 %v4720_v23  ;;  %v10400_v23 = vld [vmem:[%s13850_s3 + $0x148] ss:$16 sps:$4 sm:$0xff]   ;;  %v10522_v25 = vld [vmem:[%s13850_s3 + $0x524] ss:$16 sps:$4 sm:$0xff]  }
 0x325   :  { %7191 = vmatpush1.bf16.msra.mxu1 %v10360_v20  ;;  %7287 = vmatprep.subr.bf16.mxu0 %v10369_v24  ;;  %v10508_v20 = vld [vmem:[%s13850_s3 + $0x4e0] ss:$16 sps:$4 sm:$0xff]   ;;  %v10405_v24 = vld [vmem:[%s13850_s3 + $0x16c] ss:$16 sps:$4 sm:$0xff]   ;;  %v10540_v46 = vld [vmem:[%s13850_s3 + $0x584] ss:$16 sps:$4 sm:$0xff]  }
 0x326   :  { %7192 = vmatprep.subr.bf16.mxu1 %v10366_v32  ;;  %v10514_v32 = vld [vmem:[%s13850_s3 + $0x500] ss:$16 sps:$4 sm:$0xff]  }
 0x327   :  { %5581 = vmatmul.mubr.bf16.vlgmr.msra.gmra.mrb[4].mxu0 %v10798_v43  ;;  %v10468_v43 = vld [vmem:[%s13850_s3 + $0x404] ss:$16 sps:$4 sm:$0xff]  }
 0x328   :  { %7288 = vmatpush1.bf16.msra.mxu0 %v10367_v30  ;;  %7319 = vmatprep.mubr.bf16.mxu0 %v12882_v35  ;;  %v10466_v35 = vld [vmem:[%s13850_s3 + $0x400] ss:$16 sps:$4 sm:$0xff]   ;;  %v10528_v30 = vld [vmem:[%s13850_s3 + $0x544] ss:$16 sps:$4 sm:$0xff]  }
 0x329   :  { %7193 = vmatpush1.bf16.msra.mxu1 %v10364_v37  ;;  %7289 = vmatprep.subr.bf16.mxu0 %v10375_v2  ;;  %v10408_v37 = vld [vmem:[%s13850_s3 + $0x18c] ss:$16 sps:$4 sm:$0xff]  }
 0x32a   :  { %7194 = vmatprep.subr.bf16.mxu1 %v10372_v33  ;;  %v10406_v33 = vld [vmem:[%s13850_s3 + $0x188] ss:$16 sps:$4 sm:$0xff]   ;;  %v10411_v2 = vld [vmem:[%s13850_s3 + $0x1ac] ss:$16 sps:$4 sm:$0xff]  }
 0x32c   :  { %7290 = vmatpush1.bf16.msra.mxu0 %v10373_v40  ;;  %v10409_v40 = vld [vmem:[%s13850_s3 + $0x1a8] ss:$16 sps:$4 sm:$0xff]  }
 0x32d   :  { %7195 = vmatpush1.bf16.msra.mxu1 %v10370_v36  ;;  %7291 = vmatprep.subr.bf16.mxu0 %v10378_v45  ;;  %v10534_v36 = vld [vmem:[%s13850_s3 + $0x564] ss:$16 sps:$4 sm:$0xff]   ;;  %v10532_v45 = vld [vmem:[%s13850_s3 + $0x560] ss:$16 sps:$4 sm:$0xff]  }
 0x32e   :  { %7205 = vmatprep.subr.bf16.mxu1 %v10468_v43  ;;  %v10414_v43 = vld [vmem:[%s13850_s3 + $0x1cc] ss:$16 sps:$4 sm:$0xff]  }
 0x330   :  { %7197 = vmatmul.mubr.bf16.vlgmr.msra.gmra.mrb[36].mxu1 %v13306_v49  ;;  %7292 = vmatpush1.bf16.msra.mxu0 %v10376_v48  ;;  %v10412_v48 = vld [vmem:[%s13850_s3 + $0x1c8] ss:$16 sps:$4 sm:$0xff]  }
 0x331   :  { %7206 = vmatpush1.bf16.msra.mxu1 %v10466_v35  ;;  %7293 = vmatprep.subr.bf16.mxu0 %v10381_v12  ;;  %v10538_v35 = vld [vmem:[%s13850_s3 + $0x580] ss:$16 sps:$4 sm:$0xff]   ;;  %v10417_v12 = vld [vmem:[%s13850_s3 + $0x1ec] ss:$16 sps:$4 sm:$0xff]  }
 0x332   :  { %7207 = vmatprep.subr.bf16.mxu1 %v10474_v51  ;;  %v10546_v51 = vld [vmem:[%s13850_s3 + $0x5a4] ss:$16 sps:$4 sm:$0xff]  }
 0x334   :  { %7294 = vmatpush1.bf16.msra.mxu0 %v10379_v52 }
 0x335   :  { %7208 = vmatpush1.bf16.msra.mxu1 %v10472_v27  ;;  %7295 = vmatprep.subr.bf16.mxu0 %v10384_v53 }
 0x336   :  { %7209 = vmatprep.subr.bf16.mxu1 %v10480_v38  ;;  %v10415_v38 = vld [vmem:[%s13850_s3 + $0x1e8] ss:$16 sps:$4 sm:$0xff]  }
 0x338   :  { %7296 = vmatpush1.bf16.msra.mxu0 %v10382_v55 }
 0x339   :  { %7210 = vmatpush1.bf16.msra.mxu1 %v10478_v31  ;;  %7297 = vmatprep.subr.bf16.mxu0 %v10387_v41  ;;  %v10544_v31 = vld [vmem:[%s13850_s3 + $0x5a0] ss:$16 sps:$4 sm:$0xff]   ;;  %v10420_v41 = vld [vmem:[%s13850_s3 + $0x20c] ss:$16 sps:$4 sm:$0xff]  }
 0x33a   :  { %7211 = vmatprep.subr.bf16.mxu1 %v10486_v50 }
 0x33c   :  { %7298 = vmatpush1.bf16.msra.mxu0 %v10385_v56 }
 0x33d   :  { %7212 = vmatpush1.bf16.msra.mxu1 %v10484_v59  ;;  %7299 = vmatprep.subr.bf16.mxu0 %v10390_v57  ;;  %v10418_v59 = vld [vmem:[%s13850_s3 + $0x208] ss:$16 sps:$4 sm:$0xff]   ;;  %v10423_v57 = vld [vmem:[%s13850_s3 + $0x22c] ss:$16 sps:$4 sm:$0xff]  }
 0x33e   :  { %7213 = vmatprep.subr.bf16.mxu1 %v10492_v60  ;;  %v10421_v60 = vld [vmem:[%s13850_s3 + $0x228] ss:$16 sps:$4 sm:$0xff]  }
 0x33f   :  { %v9038_v1 = vpop.f32.mrb[24].mxu1 }
 0x340   :  { %v9039_v44 = vpop.f32.mrb[25].mxu1  ;;  %7300 = vmatpush1.bf16.msra.mxu0 %v10388_v61  ;;  %v10426_v61 = vld [vmem:[%s13850_s3 + $0x24c] ss:$16 sps:$4 sm:$0xff]  }
 0x341   :  { %v9040_v4 = vadd.f32 %v9039_v44, %v9038_v1  ;;  %v9041_v47 = vpop.f32.mrb[26].mxu1  ;;  %7214 = vmatpush1.bf16.msra.mxu1 %v10490_v54  ;;  %7301 = vmatprep.subr.bf16.mxu0 %v10393_v63  ;;  %v10424_v54 = vld [vmem:[%s13850_s3 + $0x248] ss:$16 sps:$4 sm:$0xff]   ;;  %v10432_v63 = vld [vmem:[%s13850_s3 + $0x28c] ss:$16 sps:$4 sm:$0xff]  }
 0x342   :  { %v9042_v9 = vpop.f32.mrb[27].mxu1  ;;  %7215 = vmatprep.subr.bf16.mxu1 %v10498_v0  ;;  %v10430_v0 = vld [vmem:[%s13850_s3 + $0x288] ss:$16 sps:$4 sm:$0xff]   ;;  %v10435_v1 = vld [vmem:[%s13850_s3 + $0x2ac] ss:$16 sps:$4 sm:$0xff]  }
 0x343   :  { %v13376_v11 = vadd.f32 %v9040_v4, %v13272_v28  ;;  %v10520_v28 = vld [vmem:[%s13850_s3 + $0x520] ss:$16 sps:$4 sm:$0xff]   ;;  %v10433_v44 = vld [vmem:[%s13850_s3 + $0x2a8] ss:$16 sps:$4 sm:$0xff]   ;;  %v10552_v4 = vld [vmem:[%s13850_s3 + $0x5c4] ss:$16 sps:$4 sm:$0xff]  }
 0x344   :  { %7302 = vmatpush1.bf16.msra.mxu0 %v10391_v3  ;;  %v10438_v3 = vld [vmem:[%s13850_s3 + $0x2cc] ss:$16 sps:$4 sm:$0xff]   ;;  %v10436_v47 = vld [vmem:[%s13850_s3 + $0x2c8] ss:$16 sps:$4 sm:$0xff]   ;;  %v10558_v9 = vld [vmem:[%s13850_s3 + $0x5e4] ss:$16 sps:$4 sm:$0xff]  }
 0x345   :  { %7216 = vmatpush1.bf16.msra.mxu1 %v10496_v6  ;;  %7303 = vmatprep.subr.bf16.mxu0 %v10396_v5  ;;  %v10550_v6 = vld [vmem:[%s13850_s3 + $0x5c0] ss:$16 sps:$4 sm:$0xff]   ;;  %v10441_v5 = vld [vmem:[%s13850_s3 + $0x2ec] ss:$16 sps:$4 sm:$0xff]  }
 0x346   :  { %7217 = vmatprep.subr.bf16.mxu1 %v10504_v62  ;;  %v10439_v62 = vld [vmem:[%s13850_s3 + $0x2e8] ss:$16 sps:$4 sm:$0xff]  }
 0x348   :  { %7304 = vmatpush1.bf16.msra.mxu0 %v10394_v14  ;;  %v10444_v14 = vld [vmem:[%s13850_s3 + $0x30c] ss:$16 sps:$4 sm:$0xff]  }
 0x349   :  { %7218 = vmatpush1.bf16.msra.mxu1 %v10502_v15  ;;  %7305 = vmatprep.subr.bf16.mxu0 %v10399_v17 }
 0x34a   :  { %7219 = vmatprep.subr.bf16.mxu1 %v10510_v18  ;;  %v10564_v18 = vld [vmem:[%s13850_s3 + $0x604] ss:$16 sps:$4 sm:$0xff]  }
 0x34c   :  { %7306 = vmatpush1.bf16.msra.mxu0 %v10397_v19 }
 0x34d   :  { %7220 = vmatpush1.bf16.msra.mxu1 %v10508_v20  ;;  %7307 = vmatprep.subr.bf16.mxu0 %v10402_v21  ;;  %v10442_v20 = vld [vmem:[%s13850_s3 + $0x308] ss:$16 sps:$4 sm:$0xff]  }
 0x34e   :  { %7221 = vmatprep.subr.bf16.mxu1 %v10516_v22  ;;  %v10447_v22 = vld [vmem:[%s13850_s3 + $0x32c] ss:$16 sps:$4 sm:$0xff]  }
 0x350   :  { %7308 = vmatpush1.bf16.msra.mxu0 %v10400_v23 }
 0x351   :  { %7222 = vmatpush1.bf16.msra.mxu1 %v10514_v32  ;;  %7309 = vmatprep.subr.bf16.mxu0 %v10405_v24  ;;  %v10445_v32 = vld [vmem:[%s13850_s3 + $0x328] ss:$16 sps:$4 sm:$0xff]   ;;  %v10450_v24 = vld [vmem:[%s13850_s3 + $0x34c] ss:$16 sps:$4 sm:$0xff]  }
 0x352   :  { %7223 = vmatprep.subr.bf16.mxu1 %v10522_v25  ;;  %v10448_v25 = vld [vmem:[%s13850_s3 + $0x348] ss:$16 sps:$4 sm:$0xff]  }
 0x354   :  { %7310 = vmatpush1.bf16.msra.mxu0 %v10403_v26  ;;  %v10453_v26 = vld [vmem:[%s13850_s3 + $0x36c] ss:$16 sps:$4 sm:$0xff]  }
 0x355   :  { %7224 = vmatpush1.bf16.msra.mxu1 %v10520_v28  ;;  %7311 = vmatprep.subr.bf16.mxu0 %v10408_v37  ;;  %v10451_v28 = vld [vmem:[%s13850_s3 + $0x368] ss:$16 sps:$4 sm:$0xff]   ;;  %v10456_v37 = vld [vmem:[%s13850_s3 + $0x38c] ss:$16 sps:$4 sm:$0xff]  }
 0x356   :  { %7225 = vmatprep.subr.bf16.mxu1 %v10528_v30  ;;  %v10454_v30 = vld [vmem:[%s13850_s3 + $0x388] ss:$16 sps:$4 sm:$0xff]  }
 0x358   :  { %7312 = vmatpush1.bf16.msra.mxu0 %v10406_v33  ;;  %v10459_v33 = vld [vmem:[%s13850_s3 + $0x3ac] ss:$16 sps:$4 sm:$0xff]  }
 0x359   :  { %7226 = vmatpush1.bf16.msra.mxu1 %v10526_v13  ;;  %7313 = vmatprep.subr.bf16.mxu0 %v10411_v2  ;;  %v10457_v13 = vld [vmem:[%s13850_s3 + $0x3a8] ss:$16 sps:$4 sm:$0xff]   ;;  %v10462_v2 = vld [vmem:[%s13850_s3 + $0x3cc] ss:$16 sps:$4 sm:$0xff]  }
 0x35a   :  { %7227 = vmatprep.subr.bf16.mxu1 %v10534_v36  ;;  %v10460_v36 = vld [vmem:[%s13850_s3 + $0x3c8] ss:$16 sps:$4 sm:$0xff]  }
 0x35c   :  { %7314 = vmatpush1.bf16.msra.mxu0 %v10409_v40  ;;  %v10465_v40 = vld [vmem:[%s13850_s3 + $0x3ec] ss:$16 sps:$4 sm:$0xff]  }
 0x35d   :  { %7228 = vmatpush1.bf16.msra.mxu1 %v10532_v45  ;;  %7315 = vmatprep.subr.bf16.mxu0 %v10414_v43  ;;  %v10463_v45 = vld [vmem:[%s13850_s3 + $0x3e8] ss:$16 sps:$4 sm:$0xff]   ;;  %v10471_v43 = vld [vmem:[%s13850_s3 + $0x40c] ss:$16 sps:$4 sm:$0xff]  }
 0x35e   :  { %7229 = vmatprep.subr.bf16.mxu1 %v10540_v46  ;;  %v10469_v46 = vld [vmem:[%s13850_s3 + $0x408] ss:$16 sps:$4 sm:$0xff]  }
 0x35f   :  { %v9060_v52 = vpop.f32.mrb[28].mxu1 }
 0x360   :  { %v9061_v27 = vpop.f32.mrb[29].mxu1  ;;  %7316 = vmatpush1.bf16.msra.mxu0 %v10412_v48  ;;  %v10477_v48 = vld [vmem:[%s13850_s3 + $0x42c] ss:$16 sps:$4 sm:$0xff]  }
 0x361   :  { %v9062_v53 = vadd.f32 %v9061_v27, %v9060_v52  ;;  %v9063_v55 = vpop.f32.mrb[30].mxu1  ;;  %7230 = vmatpush1.bf16.msra.mxu1 %v10538_v35  ;;  %7317 = vmatprep.subr.bf16.mxu0 %v10417_v12  ;;  %v10475_v35 = vld [vmem:[%s13850_s3 + $0x428] ss:$16 sps:$4 sm:$0xff]   ;;  %v10483_v12 = vld [vmem:[%s13850_s3 + $0x44c] ss:$16 sps:$4 sm:$0xff]  }
 0x362   :  { %v9064_v50 = vpop.f32.mrb[31].mxu1  ;;  %7231 = vmatprep.subr.bf16.mxu1 %v10546_v51  ;;  %v10481_v51 = vld [vmem:[%s13850_s3 + $0x448] ss:$16 sps:$4 sm:$0xff]   ;;  %v10489_v52 = vld [vmem:[%s13850_s3 + $0x46c] ss:$16 sps:$4 sm:$0xff]  }
 0x363   :  { %v5824_v56 = vadd.f32 %v9062_v53, %v13376_v11  ;;  %v10556_v11 = vld [vmem:[%s13850_s3 + $0x5e0] ss:$16 sps:$4 sm:$0xff]   ;;  %v10495_v27 = vld [vmem:[%s13850_s3 + $0x48c] ss:$16 sps:$4 sm:$0xff]   ;;  %v10493_v53 = vld [vmem:[%s13850_s3 + $0x488] ss:$16 sps:$4 sm:$0xff]  }
 0x364   :  { %7318 = vmatpush1.bf16.msra.mxu0 %v10415_v38  ;;  %v10501_v38 = vld [vmem:[%s13850_s3 + $0x4ac] ss:$16 sps:$4 sm:$0xff]   ;;  %v10499_v55 = vld [vmem:[%s13850_s3 + $0x4a8] ss:$16 sps:$4 sm:$0xff]  }
 0x365   :  { %7232 = vmatpush1.bf16.msra.mxu1 %v10544_v31  ;;  %7328 = vmatprep.subr.bf16.mxu0 %v10420_v41  ;;  %v10507_v31 = vld [vmem:[%s13850_s3 + $0x4cc] ss:$16 sps:$4 sm:$0xff]   ;;  %v10505_v41 = vld [vmem:[%s13850_s3 + $0x4c8] ss:$16 sps:$4 sm:$0xff]  }
 0x366   :  { %7233 = vmatprep.subr.bf16.mxu1 %v10552_v4  ;;  %v10513_v50 = vld [vmem:[%s13850_s3 + $0x4ec] ss:$16 sps:$4 sm:$0xff]  }
 0x367   :  { %7320 = vmatmul.mubr.bf16.vlgmr.msra.gmra.mrb[8].mxu0 %v13088_v8  ;;  %v10429_v8 = vld [vmem:[%s13850_s3 + $0x26c] ss:$16 sps:$4 sm:$0xff]  }
 0x368   :  { %7329 = vmatpush1.bf16.msra.mxu0 %v10418_v59  ;;  %7360 = vmatprep.mubr.bf16.mxu0 %v13097_v10  ;;  %v10427_v10 = vld [vmem:[%s13850_s3 + $0x268] ss:$16 sps:$4 sm:$0xff]   ;;  %v10519_v59 = vld [vmem:[%s13850_s3 + $0x50c] ss:$16 sps:$4 sm:$0xff]  }
 0x369   :  { %7330 = vmatprep.subr.bf16.mxu0 %v10423_v57  ;;  %7234 = vmatpush1.bf16.msra.mxu1 %v10550_v6  ;;  %v10517_v57 = vld [vmem:[%s13850_s3 + $0x508] ss:$16 sps:$4 sm:$0xff]   ;;  %v10555_v4 = vld [vmem:[%s13850_s3 + $0x5cc] ss:$16 sps:$4 sm:$0xff]  }
 0x36a   :  { %7235 = vmatprep.subr.bf16.mxu1 %v10558_v9  ;;  %v10561_v6 = vld [vmem:[%s13850_s3 + $0x5ec] ss:$16 sps:$4 sm:$0xff]   ;;  %v923_v9 = vsub.s32 4, %v12562_v29 }
 0x36c   :  { %7331 = vmatpush1.bf16.msra.mxu0 %v10421_v60  ;;  %v10525_v60 = vld [vmem:[%s13850_s3 + $0x52c] ss:$16 sps:$4 sm:$0xff]  }
 0x36d   :  { %7332 = vmatprep.subr.bf16.mxu0 %v10426_v61  ;;  %7236 = vmatpush1.bf16.msra.mxu1 %v10556_v11  ;;  %v10523_v61 = vld [vmem:[%s13850_s3 + $0x528] ss:$16 sps:$4 sm:$0xff]   ;;  %v924_v11 = vrot.slane %v13254_v16, %v923_v9 }
 0x36e   :  { %7246 = vmatprep.subr.bf16.mxu1 %v10564_v18 }
 0x370   :  { %7333 = vmatpush1.bf16.msra.mxu0 %v10424_v54  ;;  %v10531_v54 = vld [vmem:[%s13850_s3 + $0x54c] ss:$16 sps:$4 sm:$0xff]  }
 0x371   :  { %7334 = vmatprep.subr.bf16.mxu0 %v10429_v8  ;;  %v10529_v8 = vld [vmem:[%s13850_s3 + $0x548] ss:$16 sps:$4 sm:$0xff]  }
 0x374   :  { %7335 = vmatpush1.bf16.msra.mxu0 %v10427_v10  ;;  %v10537_v10 = vld [vmem:[%s13850_s3 + $0x56c] ss:$16 sps:$4 sm:$0xff]  }
 0x375   :  { %7336 = vmatprep.subr.bf16.mxu0 %v10432_v63  ;;  %v10535_v63 = vld [vmem:[%s13850_s3 + $0x568] ss:$16 sps:$4 sm:$0xff]  }
 0x378   :  { %7337 = vmatpush1.bf16.msra.mxu0 %v10430_v0  ;;  %v10543_v0 = vld [vmem:[%s13850_s3 + $0x58c] ss:$16 sps:$4 sm:$0xff]  }
 0x379   :  { %7338 = vmatprep.subr.bf16.mxu0 %v10435_v1  ;;  %v10541_v1 = vld [vmem:[%s13850_s3 + $0x588] ss:$16 sps:$4 sm:$0xff]  }
 0x37c   :  { %7339 = vmatpush1.bf16.msra.mxu0 %v10433_v44  ;;  %v10549_v44 = vld [vmem:[%s13850_s3 + $0x5ac] ss:$16 sps:$4 sm:$0xff]  }
 0x37d   :  { %7340 = vmatprep.subr.bf16.mxu0 %v10438_v3  ;;  %v10547_v3 = vld [vmem:[%s13850_s3 + $0x5a8] ss:$16 sps:$4 sm:$0xff]  }
 0x380   :  { %7341 = vmatpush1.bf16.msra.mxu0 %v10436_v47  ;;  %v10553_v47 = vld [vmem:[%s13850_s3 + $0x5c8] ss:$16 sps:$4 sm:$0xff]  }
 0x381   :  { %7342 = vmatprep.subr.bf16.mxu0 %v10441_v5  ;;  %v10559_v5 = vld [vmem:[%s13850_s3 + $0x5e8] ss:$16 sps:$4 sm:$0xff]  }
 0x383   :  { %v5863_v15 = vpop.f32.mrb[32].mxu1 }
 0x384   :  { %v13534_v17 = vadd.f32 %v5863_v15, %v5824_v56  ;;  %v5865_v19 = vpop.f32.mrb[33].mxu1  ;;  %7343 = vmatpush1.bf16.msra.mxu0 %v10439_v62  ;;  %v10511_v56 = vld [vmem:[%s13850_s3 + $0x4e8] ss:$16 sps:$4 sm:$0xff]   ;;  %v927_v62 = vsub.s32 5, %v12562_v29 }
 0x385   :  { %v5866_v21 = vpop.f32.mrb[34].mxu1  ;;  %7344 = vmatprep.subr.bf16.mxu0 %v10444_v14 }
 0x386   :  { %v5867_v23 = vpop.f32.mrb[35].mxu1  ;;  %v928_v14 = vrot.slane %v13254_v16, %v927_v62  ;;  %v10567_v16 = vld [vmem:[%s13850_s3 + $0x624] ss:$16 sps:$4 sm:$0xff]   ;;  %vm5875_vm8 = vcmp.ge.f32.partialorder %v13534_v17, 0.0 }
 0x388   :  { %7345 = vmatpush1.bf16.msra.mxu0 %v10442_v20 }
 0x389   :  { %7346 = vmatprep.subr.bf16.mxu0 %v10447_v22 }
 0x38c   :  { %7347 = vmatpush1.bf16.msra.mxu0 %v10445_v32 }
 0x38d   :  { %7348 = vmatprep.subr.bf16.mxu0 %v10450_v24 }
 0x390   :  { %7349 = vmatpush1.bf16.msra.mxu0 %v10448_v25 }
 0x391   :  { %7350 = vmatprep.subr.bf16.mxu0 %v10453_v26 }
 0x394   :  { %7351 = vmatpush1.bf16.msra.mxu0 %v10451_v28  ;;  %v10562_v28 = vld [vmem:[%s13850_s3 + $0x600] ss:$16 sps:$4 sm:$0xff]  }
 0x395   :  { %7352 = vmatprep.subr.bf16.mxu0 %v10456_v37 }
 0x398   :  { %7353 = vmatpush1.bf16.msra.mxu0 %v10454_v30  ;;  %v10565_v30 = vld [vmem:[%s13850_s3 + $0x620] ss:$16 sps:$4 sm:$0xff]  }
 0x399   :  { %7354 = vmatprep.subr.bf16.mxu0 %v10459_v33  ;;  %v10570_v33 = vld [vmem:[%s13850_s3 + $0x60c] ss:$16 sps:$4 sm:$0xff]  }
 0x39c   :  { %7355 = vmatpush1.bf16.msra.mxu0 %v10457_v13  ;;  %v5882_v13 = vmul.f32 0.01, %v13534_v17 }
 0x39d   :  { %7356 = vmatprep.subr.bf16.mxu0 %v10462_v2 }
 0x39e   :  { %v5889_v2 = vsel %vm5875_vm8, %v13534_v17, %v5882_v13  ;;  %v10574_v17 = vld [vmem:[%s13852_s5 + $0x40] sm:$0xff]  }
 0x39f   :  { %v10598_v13 = vld [vmem:[%s13852_s5 + $0xc0] sm:$0xff]  }
 0x3a0   :  { %7357 = vmatpush1.bf16.msra.mxu0 %v10460_v36  ;;  %v10568_v36 = vld [vmem:[%s13850_s3 + $0x608] ss:$16 sps:$4 sm:$0xff]  }
 0x3a1   :  { %7358 = vmatprep.subr.bf16.mxu0 %v10465_v40  ;;  %v5896_v40 = vpack.c.bf16 %v5889_v2, %v5889_v2 }
 0x3a4   :  { %7359 = vmatpush1.bf16.msra.mxu0 %v10463_v45  ;;  %v10573_v45 = vld [vmem:[%s13850_s3 + $0x62c] ss:$16 sps:$4 sm:$0xff]  }
 0x3a5   :  { %7369 = vmatprep.subr.bf16.mxu0 %v10471_v43  ;;  %v10571_v43 = vld [vmem:[%s13850_s3 + $0x628] ss:$16 sps:$4 sm:$0xff]  }
 0x3a7   :  { %7361 = vmatmul.mubr.bf16.vlgmr.msra.gmra.mrb[8].mxu0 %v13306_v49  ;;  %v10487_v49 = vld [vmem:[%s13850_s3 + $0x468] ss:$16 sps:$4 sm:$0xff]  }
 0x3a8   :  { %7370 = vmatpush1.bf16.msra.mxu0 %v10469_v46  ;;  %v10575_v46 = vld [vmem:[%s13852_s5] sm:$0xff]  }
 0x3a9   :  { %7371 = vmatprep.subr.bf16.mxu0 %v10477_v48  ;;  %v10576_v48 = vld [vmem:[%s13852_s5 + $0x48] sm:$0xff]  }
 0x3ac   :  { %7372 = vmatpush1.bf16.msra.mxu0 %v10475_v35  ;;  %v10577_v35 = vld [vmem:[%s13852_s5 + $0x8] sm:$0xff]  }
 0x3ad   :  { %7373 = vmatprep.subr.bf16.mxu0 %v10483_v12  ;;  %v10578_v12 = vld [vmem:[%s13852_s5 + $0x50] sm:$0xff]  }
 0x3b0   :  { %7374 = vmatpush1.bf16.msra.mxu0 %v10481_v51  ;;  %v10579_v51 = vld [vmem:[%s13852_s5 + $0x10] sm:$0xff]  }
 0x3b1   :  { %7375 = vmatprep.subr.bf16.mxu0 %v10489_v52  ;;  %v10580_v52 = vld [vmem:[%s13852_s5 + $0x58] sm:$0xff]  }
 0x3b4   :  { %7376 = vmatpush1.bf16.msra.mxu0 %v10487_v49  ;;  %v10581_v49 = vld [vmem:[%s13852_s5 + $0x18] sm:$0xff]  }
 0x3b5   :  { %7377 = vmatprep.subr.bf16.mxu0 %v10495_v27  ;;  %v10582_v27 = vld [vmem:[%s13852_s5 + $0x60] sm:$0xff]  }
 0x3b8   :  { %7378 = vmatpush1.bf16.msra.mxu0 %v10493_v53  ;;  %v10583_v53 = vld [vmem:[%s13852_s5 + $0x20] sm:$0xff]  }
 0x3b9   :  { %7379 = vmatprep.subr.bf16.mxu0 %v10501_v38  ;;  %v10584_v38 = vld [vmem:[%s13852_s5 + $0x68] sm:$0xff]  }
 0x3bc   :  { %7380 = vmatpush1.bf16.msra.mxu0 %v10499_v55  ;;  %v10585_v55 = vld [vmem:[%s13852_s5 + $0x28] sm:$0xff]  }
 0x3bd   :  { %7381 = vmatprep.subr.bf16.mxu0 %v10507_v31  ;;  %v10586_v31 = vld [vmem:[%s13852_s5 + $0x70] sm:$0xff]  }
 0x3c0   :  { %7382 = vmatpush1.bf16.msra.mxu0 %v10505_v41  ;;  %v10587_v41 = vld [vmem:[%s13852_s5 + $0x30] sm:$0xff]  }
 0x3c1   :  { %7383 = vmatprep.subr.bf16.mxu0 %v10513_v50  ;;  %v10588_v50 = vld [vmem:[%s13852_s5 + $0x78] sm:$0xff]  }
 0x3c4   :  { %7384 = vmatpush1.bf16.msra.mxu0 %v10511_v56  ;;  %v10589_v56 = vld [vmem:[%s13852_s5 + $0x38] sm:$0xff]  }
 0x3c5   :  { %7385 = vmatprep.subr.bf16.mxu0 %v10519_v59 }
 0x3c8   :  { %7386 = vmatpush1.bf16.msra.mxu0 %v10517_v57 }
 0x3c9   :  { %7387 = vmatprep.subr.bf16.mxu0 %v10525_v60 }
 0x3cc   :  { %7388 = vmatpush1.bf16.msra.mxu0 %v10523_v61 }
 0x3cd   :  { %7389 = vmatprep.subr.bf16.mxu0 %v10531_v54  ;;  %v6097_v54 = vld [vmem:[%s13853_s4] sm:$0xf] }
 0x3d0   :  { %7390 = vmatpush1.bf16.msra.mxu0 %v10529_v8  ;;  %v6102_v8 = vrot.slane %v6097_v54, %v907_v39 }
 0x3d1   :  { %7391 = vmatprep.subr.bf16.mxu0 %v10537_v10  ;;  %v6106_v10 = vrot.slane %v6097_v54, %v911_v42 }
 0x3d4   :  { %7392 = vmatpush1.bf16.msra.mxu0 %v10535_v63 }
 0x3d5   :  { %7393 = vmatprep.subr.bf16.mxu0 %v10543_v0 }
 0x3d8   :  { %7394 = vmatpush1.bf16.msra.mxu0 %v10541_v1 }
 0x3d9   :  { %7395 = vmatprep.subr.bf16.mxu0 %v10549_v44 }
 0x3dc   :  { %7396 = vmatpush1.bf16.msra.mxu0 %v10547_v3 }
 0x3dd   :  { %7397 = vmatprep.subr.bf16.mxu0 %v10555_v4  ;;  %v6110_v4 = vrot.slane %v6097_v54, %v915_v7 }
 0x3e0   :  { %7398 = vmatpush1.bf16.msra.mxu0 %v10553_v47 }
 0x3e1   :  { %7399 = vmatprep.subr.bf16.mxu0 %v10561_v6 }
 0x3e4   :  { %7400 = vmatpush1.bf16.msra.mxu0 %v10559_v5  ;;  %v6114_v5 = vrot.slane %v6097_v54, %v919_v34  ;;  %v10591_v34 = vld [vmem:[%s13852_s5 + $0x88] sm:$0xff]   ;;  %v10606_v54 = vld [vmem:[%s13856_s9] sm:$0x1f]  }
 0x3fa   :  { %v5582_v15 = vpop.f32.mrb[4].mxu0 }
 0x3fb   :  { %v9128_v18 = vadd.f32 %v5582_v15, %v924_v11  ;;  %v5584_v19 = vpop.f32.mrb[5].mxu0 }
 0x3fc   :  { %v9129_v20 = vadd.f32 %v5584_v19, %v928_v14  ;;  %v5586_v21 = vpop.f32.mrb[6].mxu0  ;;  %v10590_v14 = vld [vmem:[%s13852_s5 + $0x80] sm:$0xff]  }
 0x3fd   :  { %vm5873_vm6 = vcmp.ge.f32.partialorder %v9128_v18, 0.0  ;;  %v5880_v22 = vmul.f32 0.01, %v9128_v18  ;;  %v5587_v23 = vpop.f32.mrb[7].mxu0 }
 0x3fe   :  { %vm5874_vm7 = vcmp.ge.f32.partialorder %v9129_v20, 0.0  ;;  %v5881_v32 = vmul.f32 0.01, %v9129_v20 }
 0x3ff   :  { %v5887_v24 = vsel %vm5873_vm6, %v9128_v18, %v5880_v22 }
 0x400   :  { %v5888_v25 = vsel %vm5874_vm7, %v9129_v20, %v5881_v32  ;;  %v5894_v37 = vpack.c.bf16 %v5887_v24, %v5887_v24 }
 0x401   :  { %v5895_v26 = vpack.c.bf16 %v5888_v25, %v5888_v25  ;;  %v10592_v25 = vld [vmem:[%s13852_s5 + $0x90] sm:$0xff]  }
 0x403   :  { %7237 = vmatprep.mubr.bf16.mxu1 %v5895_v26  ;;  %7401 = vmatprep.mubr.bf16.mxu0 %v5895_v26  ;;  %v10593_v26 = vld [vmem:[%s13852_s5 + $0x98] sm:$0xff]  }
 0x404   :  { %7238 = vmatmul.mubr.bf16.vlgmr.msra.gmra.mrb[36].mxu1 %v5894_v37  ;;  %7402 = vmatmul.mubr.bf16.vlgmr.msra.gmra.mrb[8].mxu0 %v5894_v37  ;;  %v10595_v37 = vld [vmem:[%s13852_s5 + $0xa8] sm:$0xff]  }
 0x405   :  { %7247 = vmatpush1.bf16.msra.mxu1 %v10562_v28  ;;  %7278 = vmatprep.mubr.bf16.mxu1 %v10612_v58  ;;  %v10594_v28 = vld [vmem:[%s13852_s5 + $0xa0] sm:$0xff]  }
 0x406   :  { %7248 = vmatprep.subr.bf16.mxu1 %v10567_v16  ;;  %v10596_v16 = vld [vmem:[%s13852_s5 + $0xb0] sm:$0xff]  }
 0x409   :  { %7249 = vmatpush1.bf16.msra.mxu1 %v10565_v30  ;;  %v10597_v30 = vld [vmem:[%s13852_s5 + $0xb8] sm:$0xff]  }
 0x40a   :  { %7410 = vmatprep.subr.bf16.mxu1 %v10570_v33 }
 0x410   :  { %8893 = vmatmul.mubr.msk.bf16.vlgmr.msra.gmra.mrb[36].mxu1 %vm7119_vm9, %v5896_v40 }
 0x411   :  { %7411 = vmatpush1.bf16.msra.mxu1 %v10568_v36  ;;  %7442 = vmatprep.mubr.bf16.mxu1 %v10612_v58 }
 0x412   :  { %7412 = vmatprep.subr.bf16.mxu1 %v10573_v45  ;;  %v10599_v45 = vld [vmem:[%s13854_s7] sm:$0xff]  }
 0x415   :  { %7413 = vmatpush1.bf16.msra.mxu1 %v10571_v43  ;;  %v10600_v43 = vld [vmem:[%s13854_s7 + $0x8] sm:$0xff]  }
 0x416   :  { %9066 = vmatprep.subr.bf16.mxu1 %v10574_v17  ;;  %v10602_v17 = vld [vmem:[%s13854_s7 + $0x18] sm:$0xff]  }
 0x418   :  { %8894 = vmatmul.mubr.msk.bf16.vlgmr.msra.gmra.mrb[40].mxu1 %vm7119_vm9, %v5896_v40  ;;  %v10613_v40 = vmov 0.0  }
 0x419   :  { %9067 = vmatpush3.bf16.msra.mxu1 %v10575_v46  ;;  %v10603_v46 = vld [vmem:[%s13854_s7 + $0x20] sm:$0xff]  }
 0x41a   :  { %9068 = vmatprep.subr.bf16.mxu1 %v10576_v48  ;;  %v10604_v48 = vld [vmem:[%s13854_s7 + $0x28] sm:$0xff]  }
 0x41d   :  { %9069 = vmatpush3.bf16.msra.mxu1 %v10577_v35  ;;  %v10605_v35 = vld [vmem:[%s13854_s7 + $0x30] ss:$0 sps:$4 sm:$0x33]  }
 0x41e   :  { %9070 = vmatprep.subr.bf16.mxu1 %v10578_v12  ;;  %v7826_v12 = vsel %vm4706_vm1, %v10605_v35, 0  ;;  %vm7821_vm1 = vcmask 818176  }
 0x421   :  { %9071 = vmatpush3.bf16.msra.mxu1 %v10579_v51 }
 0x422   :  { %9072 = vmatprep.subr.bf16.mxu1 %v10580_v52 }
 0x425   :  { %9073 = vmatpush3.bf16.msra.mxu1 %v10581_v49 }
 0x426   :  { %9074 = vmatprep.subr.bf16.mxu1 %v10582_v27 }
 0x429   :  { %9075 = vmatpush3.bf16.msra.mxu1 %v10583_v53 }
 0x42a   :  { %9076 = vmatprep.subr.bf16.mxu1 %v10584_v38  ;;  %v8895_v38 = vld [vmem:[%s13855_s6] ss:$0 sm:$0xff] }
 0x42d   :  { %9077 = vmatpush3.bf16.msra.mxu1 %v10585_v55 }
 0x42e   :  { %9078 = vmatprep.subr.bf16.mxu1 %v10586_v31 }
 0x431   :  { %9079 = vmatpush3.bf16.msra.mxu1 %v10587_v41 }
 0x432   :  { %9080 = vmatprep.subr.bf16.mxu1 %v10588_v50 }
 0x435   :  { %9081 = vmatpush3.bf16.msra.mxu1 %v10589_v56 }
 0x436   :  { %7718 = vmatprep.subr.bf16.mxu1 %v10612_v58 }
 0x4d7   :  { %v7403_v59 = vpop.f32.mrb[8].mxu0 }
 0x4d8   :  { %v7405_v57 = vpop.f32.mrb[9].mxu0  ;;  %v9132_v11 = vadd.f32 %v7403_v59, %v6110_v4 }
 0x4d9   :  { %v7407_v60 = vpop.f32.mrb[10].mxu0  ;;  %v9134_v15 = vadd.f32 %v7405_v57, %v6114_v5  ;;  %v8931_v5 = vld [vmem:[%s13858_s10] ss:$0 sm:$0xff] }
 0x4da   :  { %v7408_v61 = vpop.f32.mrb[11].mxu0 }
 0x4e3   :  { %v7280_v63 = vpop.f32.mrb[36].mxu1 }
 0x4e4   :  { %v9130_v0 = vadd.f32 %v7280_v63, %v6102_v8  ;;  %v7282_v1 = vpop.f32.mrb[37].mxu1  ;;  %v7892_v8 = vsel %vm7890_vm2, %v10606_v54, 0 }
 0x4e5   :  { %v9131_v44 = vadd.f32 %v7282_v1, %v6106_v10  ;;  %v7284_v3 = vpop.f32.mrb[38].mxu1  ;;  %v8922_v10 = vld [vmem:[%s13857_s8] ss:$0 sm:$0xff] }
 0x4e6   :  { %vm7451_vm10 = vcmp.ge.f32.partialorder %v9130_v0, 0.0  ;;  %v7455_v47 = vmul.f32 0.01, %v9130_v0  ;;  %v7285_v6 = vpop.f32.mrb[39].mxu1 }
 0x4e7   :  { %vm7452_vm11 = vcmp.ge.f32.partialorder %v9131_v44, 0.0  ;;  %v7456_v9 = vmul.f32 0.01, %v9131_v44 }
 0x4e8   :  { %v7459_v39 = vsel %vm7451_vm10, %v9130_v0, %v7455_v47 }
 0x4e9   :  { %v7460_v62 = vsel %vm7452_vm11, %v9131_v44, %v7456_v9  ;;  %v7463_v18 = vpack.c.bf16 %v7459_v39, %v7459_v39 }
 0x4ea   :  { %v7464_v42 = vpack.c.bf16 %v7460_v62, %v7460_v62 }
 0x4eb   :  { %v7444_v19 = vpop.f32.mrb[40].mxu1 }
 0x4ec   :  { %v9133_v7 = vadd.f32 %v9132_v11, %v7444_v19  ;;  %v7446_v20 = vpop.f32.mrb[41].mxu1  ;;  %7710 = vmatprep.mubr.bf16.mxu1 %v7464_v42 }
 0x4ed   :  { %v9135_v21 = vadd.f32 %v9134_v15, %v7446_v20  ;;  %v7448_v22 = vpop.f32.mrb[42].mxu1  ;;  %7711 = vmatmul.mubr.bf16.vlgmr.msra.gmra.mrb[44].mxu1 %v7463_v18 }
 0x4ee   :  { %7719 = vmatpush1.bf16.msra.mxu1 %v10590_v14  ;;  %v7449_v29 = vpop.f32.mrb[43].mxu1  ;;  %v7457_v33 = vmul.f32 0.01, %v9133_v7  ;;  %vm7453_vm14 = vcmp.ge.f32.partialorder %v9133_v7, 0.0 }
 0x4ef   :  { %vm7454_vm12 = vcmp.ge.f32.partialorder %v9135_v21, 0.0  ;;  %v7458_v23 = vmul.f32 0.01, %v9135_v21  ;;  %7720 = vmatprep.subr.bf16.mxu1 %v10612_v58 }
 0x4f0   :  { %v7461_v2 = vsel %vm7453_vm14, %v9133_v7, %v7457_v33 }
 0x4f1   :  { %v7462_v32 = vsel %vm7454_vm12, %v9135_v21, %v7458_v23  ;;  %v7465_v36 = vpack.c.bf16 %v7461_v2, %v7461_v2 }
 0x4f2   :  { %v7466_v24 = vpack.c.bf16 %v7462_v32, %v7462_v32  ;;  %7721 = vmatpush1.bf16.msra.mxu1 %v10591_v34 }
 0x4f3   :  { %7722 = vmatprep.subr.bf16.mxu1 %v10612_v58 }
 0x4f4   :  { %8921 = vmatprep.mubr.msk.bf16.mxu1 %vm7674_vm13, %v7466_v24 }
 0x4f6   :  { %7723 = vmatpush1.bf16.msra.mxu1 %v10592_v25 }
 0x4f7   :  { %7724 = vmatprep.subr.bf16.mxu1 %v10612_v58 }
 0x4fa   :  { %7725 = vmatpush1.bf16.msra.mxu1 %v10593_v26 }
 0x4fb   :  { %7726 = vmatprep.subr.bf16.mxu1 %v10612_v58 }
 0x4fe   :  { %7727 = vmatpush1.bf16.msra.mxu1 %v10594_v28 }
 0x4ff   :  { %7728 = vmatprep.subr.bf16.mxu1 %v10612_v58 }
 0x502   :  { %7729 = vmatpush1.bf16.msra.mxu1 %v10595_v37 }
 0x503   :  { %7730 = vmatprep.subr.bf16.mxu1 %v10612_v58 }
 0x506   :  { %7731 = vmatpush1.bf16.msra.mxu1 %v10596_v16 }
 0x507   :  { %7732 = vmatprep.subr.bf16.mxu1 %v10612_v58 }
 0x50a   :  { %7733 = vmatpush1.bf16.msra.mxu1 %v10597_v30 }
 0x50b   :  { %7734 = vmatprep.subr.bf16.mxu1 %v10612_v58  ;;  %v10601_v58 = vld [vmem:[%s13854_s7 + $0x10] sm:$0xff]  }
 0x50e   :  { %7735 = vmatpush1.bf16.msra.mxu1 %v10598_v13 }
 0x50f   :  { %9098 = vmatprep.subr.bf16.mxu1 %v10613_v40 }
 0x511   :  { %7751 = vmatmul.mubr.bf16.vlgmr.msra.gmra.mrb[48].mxu1 %v7465_v36 }
 0x512   :  { %9099 = vmatpush3.bf16.msra.mxu1 %v10599_v45  ;;  %9112 = vmatprep.mubr.msk.bf16.mxu1 %vm10614_vm15, %v10613_v40 }
 0x513   :  { %9100 = vmatprep.subr.bf16.mxu1 %v10613_v40 }
 0x516   :  { %9101 = vmatpush3.bf16.msra.mxu1 %v10600_v43 }
 0x517   :  { %9102 = vmatprep.subr.bf16.mxu1 %v10613_v40 }
 0x51a   :  { %9103 = vmatpush3.bf16.msra.mxu1 %v10601_v58 }
 0x51b   :  { %9104 = vmatprep.subr.bf16.mxu1 %v10613_v40 }
 0x51e   :  { %9105 = vmatpush3.bf16.msra.mxu1 %v10602_v17 }
 0x51f   :  { %9106 = vmatprep.subr.bf16.mxu1 %v10613_v40 }
 0x522   :  { %9107 = vmatpush3.bf16.msra.mxu1 %v10603_v46 }
 0x523   :  { %9108 = vmatprep.subr.bf16.mxu1 %v10613_v40 }
 0x526   :  { %9109 = vmatpush3.bf16.msra.mxu1 %v10604_v48 }
 0x527   :  { %9110 = vmatprep.subr.bf16.mxu1 %v10613_v40 }
 0x52a   :  { %9111 = vmatpush3.bf16.msra.mxu1 %v7826_v12 }
 0x52b   :  { %9116 = vmatprep.subr.bf16.mxu1 %v10613_v40 }
 0x5c0   :  { %v9082_v51 = vpop.f32.mrb[44].mxu1 }
 0x5c1   :  { %v9083_v52 = vpop.f32.mrb[45].mxu1 }
 0x5c2   :  { %v9084_v49 = vadd.f32 %v9083_v52, %v9082_v51  ;;  %v9085_v27 = vpop.f32.mrb[46].mxu1 }
 0x5c3   :  { %v9086_v53 = vpop.f32.mrb[47].mxu1 }
 0x5c4   :  { %v7713_v55 = vadd.f32 %v9084_v49, %v8895_v38 }
 0x5e4   :  { %v7752_v31 = vpop.f32.mrb[48].mxu1 }
 0x5e5   :  { %v7753_v41 = vadd.f32 %v7752_v31, %v7713_v55  ;;  %v7754_v50 = vpop.f32.mrb[49].mxu1 }
 0x5e6   :  { %v7755_v56 = vpop.f32.mrb[50].mxu1 }
 0x5e7   :  { %vm7758_vm0 = vcmp.ge.f32.partialorder %v7753_v41, 0.0  ;;  %v7759_v59 = vmul.f32 0.01, %v7753_v41  ;;  %v7756_v57 = vpop.f32.mrb[51].mxu1 }
 0x5e9   :  { %v7760_v60 = vsel %vm7758_vm0, %v7753_v41, %v7759_v59 }
 0x5ea   :  { %v7761_v61 = vpack.c.bf16 %v7760_v60, %v7760_v60 }
 0x5ec   :  { %9113 = vmatmul.mubr.msk.bf16.vlgmr.msra.gmra.mrb[52].mxu1 %vm7821_vm1, %v7761_v61 }
 0x5ed   :  { %9118 = vmatprep.mubr.msk.bf16.mxu1 %vm10614_vm15, %v10613_v40  ;;  %9117 = vmatpush3.bf16.msra.mxu1 %v7892_v8 }
 0x6bf   :  { %v7862_v63 = vpop.f32.mrb[52].mxu1 }
 0x6c0   :  { %v7863_v0 = vadd.f32 %v8922_v10, %v7862_v63  ;;  %v9114_v1 = vpop.f32.mrb[53].mxu1 }
 0x6c1   :  { %v7865_v44 = vpop.f32.mrb[54].mxu1 }
 0x6c2   :  { %vm7868_vm3 = vcmp.ge.f32.partialorder %v7863_v0, 0.0  ;;  %v7869_v3 = vmul.f32 0.01, %v7863_v0  ;;  %v9115_v4 = vpop.f32.mrb[55].mxu1 }
 0x6c4   :  { %v7870_v47 = vsel %vm7868_vm3, %v7863_v0, %v7869_v3 }
 0x6c5   :  { %v7871_v6 = vpack.c.bf16 %v7870_v47, %v7870_v47 }
 0x6c7   :  { %9119 = vmatmul.mubr.msk.bf16.vlgmr.msra.gmra.mrb[56].mxu1 %vm7886_vm4, %v7871_v6 }
 0x79a   :  { %v7928_v9 = vpop.f32.mrb[56].mxu1 }
 0x79b   :  { %v7929_v39 = vadd.f32 %v8931_v5, %v7928_v9  ;;  %v9120_v62 = vpop.f32.mrb[57].mxu1 }
 0x79c   :  { %v7931_v11 = vpop.f32.mrb[58].mxu1 }
 0x79d   :  { %v9121_v42 = vpop.f32.mrb[59].mxu1  ;;  %v7935_v14 = vsel %vm7934_vm5, %v7929_v39, -inf }
 0x79e   :  { %7936 = vmax.xlane.f32.xlu0 %v7935_v14 }
 0x82b   :  { %v7937_v15 = vpop.xlane.xlu0 %7936 }
 0x82c   :  { %v7938_v18 = vsub.f32 %v7929_v39, %v7937_v15 }
 0x82e   :  { %v7939_v19 = vmul.f32 1.442695, %v7938_v18 }
 0x830   :  { %10607 = vpow2.f32 %v7939_v19 }
 0x83a   :  { %v10608_v7 = vpop.eup %10607 }
 0x83b   :  { %v7941_v20 = vsel %vm7934_vm5, %v10608_v7, 0.0 }
 0x83c   :  { %7942 = vadd.xlane.f32.xlu0 %v7941_v20 }
 0x8c9   :  { %v7943_v21 = vpop.xlane.xlu0 %7942 }
 0x8ca   :  { %10609 = vrcp.f32 %v7943_v21 }
 0x8d4   :  { %v10610_v22 = vpop.eup %10609 }
 0x8d5   :  { %v7945_v29 = vmul.f32 %v10610_v22, %v10608_v7 }
 0x8d7   :  { %7946 = vst.msk [vmem:[%s13859_s11] sm:$0xff] %vm7934_vm5, %v7945_v29 }

</bundles_post_ra>
